<compile_context>
chip_gen: v7x
topology: tpu7x:2x2x1
jax: 0.10.0
libtpu: 0.0.40
codegen_flags: <defaults>
</compile_context>

<pallas_src>
import functools

import jax
import jax.numpy as jnp
from jax.experimental import pallas as pl
from jax.experimental.pallas import tpu as pltpu

BN_EPS = 1e-5
LANE = 128
KSIZE = 3

_TM = 512
_TN = 512
_TK = 512


# --------------------------------------------------------------------------- #
# Small helpers
# --------------------------------------------------------------------------- #
def _round_up(x, m):
    return ((x + m - 1) // m) * m


def _pick_tile(dim, target, quantum=LANE):
    """Largest tile <= target that divides `dim` (multiples of `quantum`),
    falling back to the full dim (always a legal block dim)."""
    if dim <= target:
        return dim
    for t in range(target - target % quantum, 0, -quantum):
        if dim % t == 0:
            return t
    return dim


def _pick_m_tile(mp, target):
    """Largest multiple of 8 <= target dividing mp, else the full dim."""
    if mp <= target:
        return mp
    for t in range(target - target % 8, 7, -8):
        if mp % t == 0:
            return t
    return mp


def _pad2(a, rows, cols):
    r, c = a.shape
    if r == rows and c == cols:
        return a
    return jnp.pad(a, ((0, rows - r), (0, cols - c)))


def _act(y, activation):
    if activation == "relu":
        return jnp.maximum(y, 0.0)
    if activation == "tanh":
        return jnp.tanh(y)
    return y


def _clamp_vmem(need_bytes):
    """vmem_limit derived from actual per-call block bytes (+headroom)."""
    return int(min(max(int(need_bytes) + (8 << 20), 16 << 20), 48 << 20))


# --------------------------------------------------------------------------- #
# Pallas kernels
# --------------------------------------------------------------------------- #
def _mm_bn_act_kernel(m_valid, need_mask, activation,
                      a_ref, w_ref, g_ref, b_ref, o_ref, acc_ref):
    """Fused y = a @ w -> train-mode BN (batch stats) -> activation.
    Requires the full (padded) M axis resident in one tile (nm == 1)."""
    k = pl.program_id(1)

    @pl.when(k == 0)
    def _():
        acc_ref[...] = jnp.zeros_like(acc_ref)

    acc_ref[...] += jnp.dot(a_ref[...], w_ref[...],
                            preferred_element_type=jnp.float32)

    @pl.when(k == pl.num_programs(1) - 1)
    def _():
        y = acc_ref[...]
        inv_m = 1.0 / m_valid
        if need_mask:  # exclude zero-padded rows from the batch statistics
            row = jax.lax.broadcasted_iota(jnp.int32, y.shape, 0)
            valid = row < m_valid
            mean = jnp.sum(jnp.where(valid, y, 0.0), axis=0,
                           keepdims=True) * inv_m
            cen = jnp.where(valid, y - mean, 0.0)
        else:
            mean = jnp.sum(y, axis=0, keepdims=True) * inv_m
            cen = y - mean
        # Centered second pass over the VMEM-resident accumulator: avoids the
        # E[x^2]-E[x]^2 cancellation flagged in the review.
        var = jnp.sum(cen * cen, axis=0, keepdims=True) * inv_m
        scale = g_ref[...] * jax.lax.rsqrt(var + BN_EPS)
        shift = b_ref[...] - mean * scale
        o_ref[...] = _act(y * scale + shift, activation).astype(o_ref.dtype)


def _mm_bias_act_kernel(activation, a_ref, w_ref, b_ref, o_ref, acc_ref):
    """y = act(a @ w + b) with K-accumulation."""
    k = pl.program_id(2)

    @pl.when(k == 0)
    def _():
        acc_ref[...] = jnp.zeros_like(acc_ref)

    acc_ref[...] += jnp.dot(a_ref[...], w_ref[...],
                            preferred_element_type=jnp.float32)

    @pl.when(k == pl.num_programs(2) - 1)
    def _():
        o_ref[...] = _act(acc_ref[...] + b_ref[...],
                          activation).astype(o_ref.dtype)


def _mm_stats_kernel(m_valid, tm, need_mask,
                     a_ref, w_ref, y_ref, stats_ref, acc_ref):
    """Two-pass fallback (large M): y = a @ w (bf16 out) + per-tile partial
    per-channel (sum, sum_sq) accumulated in f32."""
    k = pl.program_id(2)

    @pl.when(k == 0)
    def _():
        acc_ref[...] = jnp.zeros_like(acc_ref)

    acc_ref[...] += jnp.dot(a_ref[...], w_ref[...],
                            preferred_element_type=jnp.float32)

    @pl.when(k == pl.num_programs(2) - 1)
    def _():
        y = acc_ref[...]
        y_ref[...] = y.astype(y_ref.dtype)
        if need_mask:
            row = (pl.program_id(0) * tm
                   + jax.lax.broadcasted_iota(jnp.int32, y.shape, 0))
            y = jnp.where(row < m_valid, y, 0.0)
        # Direct row writes (no iota/select over the (8, tn) block).
        stats_ref[0:1, :] = jnp.sum(y, axis=0, keepdims=True)
        stats_ref[1:2, :] = jnp.sum(y * y, axis=0, keepdims=True)


def _scale_shift_act_kernel(activation, y_ref, scale_ref, shift_ref, o_ref):
    """BN apply (y*scale + shift) + activation, elementwise tiled sweep."""
    y = y_ref[...].astype(jnp.float32)
    o_ref[...] = _act(y * scale_ref[...] + shift_ref[...],
                      activation).astype(o_ref.dtype)


def _fc2_reparam_kernel(latent_pad, a_ref, w_ref, b_ref, eps_ref,
                        mu_ref, lv_ref, z_ref):
    """Fused fc2 -> chunk(mu, log_var) -> z = mu + eps * exp(0.5*log_var)."""
    h = jnp.dot(a_ref[...], w_ref[...],
                preferred_element_type=jnp.float32) + b_ref[...]
    mu = h[:, :latent_pad]          # lane-aligned 128-wide slices
    lv = h[:, latent_pad:]
    mu_ref[...] = mu
    lv_ref[...] = lv
    z_ref[...] = mu + eps_ref[...] * jnp.exp(0.5 * lv)


# --------------------------------------------------------------------------- #
# Tiled matmul wrappers
# --------------------------------------------------------------------------- #
def _fused_matmul_bn_act(a, layer, activation, out_dtype=jnp.bfloat16):
    """a: (M, K), w: (K, Np) bf16 (Np % 128 == 0). Full M in one tile (nm==1);
    BN computed in-kernel.  Returns the padded (Mp, Np) array in out_dtype."""
    M, K = a.shape
    w = layer["w"]
    Np = w.shape[1]
    Mp = _round_up(M, 8)
    tk = _pick_tile(K, _TK)
    tn = _pick_tile(Np, _TN)
    nn, nk = Np // tn, K // tk

    a_p = _pad2(a, Mp, K).astype(jnp.bfloat16)
    out_b = jnp.dtype(out_dtype).itemsize
    need = (2 * ((Mp * tk + tk * tn) * 2 + 2 * tn * 4 + Mp * tn * out_b)
            + Mp * tn * 4)

    return pl.pallas_call(
        functools.partial(_mm_bn_act_kernel, M, Mp != M, activation),
        out_shape=jax.ShapeDtypeStruct((Mp, Np), out_dtype),
        grid_spec=pltpu.PrefetchScalarGridSpec(
            num_scalar_prefetch=0,
            grid=(nn, nk),
            in_specs=[
                pl.BlockSpec((Mp, tk), lambda j, k: (0, k)),
                pl.BlockSpec((tk, tn), lambda j, k: (k, j)),
                pl.BlockSpec((1, tn), lambda j, k: (0, j)),
                pl.BlockSpec((1, tn), lambda j, k: (0, j)),
            ],
            out_specs=pl.BlockSpec((Mp, tn), lambda j, k: (0, j)),
            scratch_shapes=[pltpu.VMEM((Mp, tn), jnp.float32)],
        ),
        compiler_params=pltpu.CompilerParams(
            dimension_semantics=("parallel", "arbitrary"),
            vmem_limit_bytes=_clamp_vmem(need)),
    )(a_p, w, layer["gamma"], layer["beta"])


def _tiled_matmul_bias_act(a, w, b, activation, out_dtype=jnp.bfloat16):
    """act(a @ w + b); a: (M, K), w: (K, Np) bf16, b: (1, Np) f32.
    Returns the full padded (Mp, Np) array in out_dtype (callers slice)."""
    M, K = a.shape
    Kw, Np = w.shape
    assert Kw == K and Np % LANE == 0
    Mp = _round_up(M, 8)
    if Mp <= _TM:
        tm = Mp
    else:
        tm = _TM
        Mp = _round_up(M, tm)
    tk = _pick_tile(K, _TK)
    tn = _pick_tile(Np, _TN)
    nn = Np // tn
    # v7x megacore: ensure at least one "parallel" axis has >= 2 programs when
    # it is free to do so (harmless on single-TC v5e/v6e).
    if nn == 1 and tm == Mp and Mp % 16 == 0:
        tm = Mp // 2
    nm, nk = Mp // tm, K // tk

    a_p = _pad2(a, Mp, K).astype(jnp.bfloat16)
    out_b = jnp.dtype(out_dtype).itemsize
    need = (2 * ((tm * tk + tk * tn) * 2 + tn * 4 + tm * tn * out_b)
            + tm * tn * 4)

    return pl.pallas_call(
        functools.partial(_mm_bias_act_kernel, activation),
        out_shape=jax.ShapeDtypeStruct((Mp, Np), out_dtype),
        grid_spec=pltpu.PrefetchScalarGridSpec(
            num_scalar_prefetch=0,
            grid=(nm, nn, nk),
            in_specs=[
                pl.BlockSpec((tm, tk), lambda i, j, k: (i, k)),
                pl.BlockSpec((tk, tn), lambda i, j, k: (k, j)),
                pl.BlockSpec((1, tn), lambda i, j, k: (0, j)),
            ],
            out_specs=pl.BlockSpec((tm, tn), lambda i, j, k: (i, j)),
            scratch_shapes=[pltpu.VMEM((tm, tn), jnp.float32)],
        ),
        compiler_params=pltpu.CompilerParams(
            dimension_semantics=("parallel", "parallel", "arbitrary"),
            vmem_limit_bytes=_clamp_vmem(need)),
    )(a_p, w, b)


def _tiled_matmul_stats(a, w):
    """Fallback (M spans multiple tiles): y (bf16) + per-channel sums (f32)."""
    M, K = a.shape
    Kw, Np = w.shape
    assert Kw == K and Np % LANE == 0
    Mp = _round_up(M, 8)
    if Mp <= _TM:
        tm = Mp
    else:
        tm = _TM
        Mp = _round_up(M, tm)
    tk = _pick_tile(K, _TK)
    tn = _pick_tile(Np, _TN)
    nm, nn, nk = Mp // tm, Np // tn, K // tk

    a_p = _pad2(a, Mp, K).astype(jnp.bfloat16)
    need = (2 * ((tm * tk + tk * tn) * 2 + tm * tn * 2 + 8 * tn * 4)
            + tm * tn * 4)

    y, stats = pl.pallas_call(
        functools.partial(_mm_stats_kernel, M, tm, Mp != M),
        out_shape=(jax.ShapeDtypeStruct((Mp, Np), jnp.bfloat16),
                   jax.ShapeDtypeStruct((nm * 8, Np), jnp.float32)),
        grid_spec=pltpu.PrefetchScalarGridSpec(
            num_scalar_prefetch=0,
            grid=(nm, nn, nk),
            in_specs=[
                pl.BlockSpec((tm, tk), lambda i, j, k: (i, k)),
                pl.BlockSpec((tk, tn), lambda i, j, k: (k, j)),
            ],
            out_specs=(
                pl.BlockSpec((tm, tn), lambda i, j, k: (i, j)),
                pl.BlockSpec((8, tn), lambda i, j, k: (i, j)),
            ),
            scratch_shapes=[pltpu.VMEM((tm, tn), jnp.float32)],
        ),
        compiler_params=pltpu.CompilerParams(
            dimension_semantics=("parallel", "parallel", "arbitrary"),
            vmem_limit_bytes=_clamp_vmem(need)),
    )(a_p, w)

    stats = stats.reshape(nm, 8, Np)
    return y, jnp.sum(stats[:, 0, :], axis=0), jnp.sum(stats[:, 1, :], axis=0)


def _bn_act_apply(y, scale, shift, activation, out_dtype=jnp.bfloat16):
    """Second sweep for the fallback path: y*scale + shift, then activation."""
    Mp, Np = y.shape
    tm = _pick_m_tile(Mp, _TM)
    tn = _pick_tile(Np, _TN)
    nm, nn = Mp // tm, Np // tn
    need = 2 * (tm * tn * y.dtype.itemsize + 2 * tn * 4
                + tm * tn * jnp.dtype(out_dtype).itemsize)
    return pl.pallas_call(
        functools.partial(_scale_shift_act_kernel, activation),
        out_shape=jax.ShapeDtypeStruct((Mp, Np), out_dtype),
        grid_spec=pltpu.PrefetchScalarGridSpec(
            num_scalar_prefetch=0,
            grid=(nm, nn),
            in_specs=[
                pl.BlockSpec((tm, tn), lambda i, j: (i, j)),
                pl.BlockSpec((1, tn), lambda i, j: (0, j)),
                pl.BlockSpec((1, tn), lambda i, j: (0, j)),
            ],
            out_specs=pl.BlockSpec((tm, tn), lambda i, j: (i, j)),
        ),
        compiler_params=pltpu.CompilerParams(
            dimension_semantics=("parallel", "parallel"),
            vmem_limit_bytes=_clamp_vmem(need)),
    )(y, scale.reshape(1, Np).astype(jnp.float32),
      shift.reshape(1, Np).astype(jnp.float32))


def fc2_reparam(h1p, layer, eps_p, *, latent_pad):
    """Fused fc2 + chunk + reparameterize, tiled over the (padded) batch."""
    mp, k = h1p.shape
    two_lp = 2 * latent_pad
    tm = _pick_m_tile(mp, _TM)
    nm = mp // tm
    o = jax.ShapeDtypeStruct((mp, latent_pad), jnp.float32)
    need = 2 * (tm * k * 2 + k * two_lp * 2 + two_lp * 4
                + tm * latent_pad * 4 + 3 * tm * latent_pad * 4)
    return pl.pallas_call(
        functools.partial(_fc2_reparam_kernel, latent_pad),
        out_shape=(o, o, o),
        grid_spec=pltpu.PrefetchScalarGridSpec(
            num_scalar_prefetch=0,
            grid=(nm,),
            in_specs=[
                pl.BlockSpec((tm, k), lambda i: (i, 0)),
                pl.BlockSpec((k, two_lp), lambda i: (0, 0)),
                pl.BlockSpec((1, two_lp), lambda i: (0, 0)),
                pl.BlockSpec((tm, latent_pad), lambda i: (i, 0)),
            ],
            out_specs=(pl.BlockSpec((tm, latent_pad), lambda i: (i, 0)),
                       pl.BlockSpec((tm, latent_pad), lambda i: (i, 0)),
                       pl.BlockSpec((tm, latent_pad), lambda i: (i, 0))),
        ),
        compiler_params=pltpu.CompilerParams(
            dimension_semantics=("parallel",),
            vmem_limit_bytes=_clamp_vmem(need)),
    )(h1p, layer["w"], layer["b"], eps_p)


# --------------------------------------------------------------------------- #
# Plain-JAX glue: NHWC im2col / dilation (bf16, no per-layer layout transposes)
# --------------------------------------------------------------------------- #
def _im2col_nhwc(x, k, stride, pad_lo, pad_hi):
    """x: (N, H, W, C) -> (N*Ho*Wo, k*k*C), columns in (kh, kw, c) order."""
    n, h, w, c = x.shape
    xp = jnp.pad(x, ((0, 0), (pad_lo, pad_hi), (pad_lo, pad_hi), (0, 0)))
    ho = (h + pad_lo + pad_hi - k) // stride + 1
    wo = (w + pad_lo + pad_hi - k) // stride + 1
    cols = []
    for kh in range(k):
        for kw in range(k):
            cols.append(xp[:, kh:kh + (ho - 1) * stride + 1:stride,
                              kw:kw + (wo - 1) * stride + 1:stride, :])
    patches = jnp.concatenate(cols, axis=-1)     # (N, Ho, Wo, k*k*C)
    return patches.reshape(n * ho * wo, k * k * c), ho, wo


def _dilate_nhwc(x, stride):
    if stride == 1:
        return x
    n, h, w, c = x.shape
    out = jnp.zeros((n, (h - 1) * stride + 1, (w - 1) * stride + 1, c), x.dtype)
    return out.at[:, ::stride, ::stride, :].set(x)


# --------------------------------------------------------------------------- #
# Layer wrappers
# --------------------------------------------------------------------------- #
def _conv_bn_matmul(a, layer, activation):
    """Matmul + training-mode BatchNorm (batch stats) + activation -> bf16."""
    M = a.shape[0]
    Mp = _round_up(M, 8)
    if Mp <= _TM:
        return _fused_matmul_bn_act(a, layer, activation)
    # Two-pass fallback for M spanning multiple tiles.
    y, col_sum, col_sq = _tiled_matmul_stats(a, layer["w"])
    mean = col_sum / M
    # TODO(synk): this fallback still uses E[x^2]-E[x]^2; the fused single-tile
    # path (always taken at these sizes) uses a centered second pass instead.
    var = jnp.maximum(col_sq / M - mean * mean, 0.0)
    scale = layer["gamma"][0] * jax.lax.rsqrt(var + BN_EPS)
    shift = layer["beta"][0] - mean * scale
    return _bn_act_apply(y, scale, shift, activation)


def conv_bn_act(x, layer, *, n_out, stride, pad, activation):
    n = x.shape[0]
    a, ho, wo = _im2col_nhwc(x, KSIZE, stride, pad, pad)
    out = _conv_bn_matmul(a, layer, activation)
    return out[:n * ho * wo, :n_out].reshape(n, ho, wo, n_out)


def convT_bn_act(x, layer, *, n_out, stride, pad, output_pad, activation):
    n = x.shape[0]
    xd = _dilate_nhwc(x, stride)
    a, ho, wo = _im2col_nhwc(xd, KSIZE, 1, KSIZE - 1 - pad,
                             KSIZE - 1 - pad + output_pad)
    out = _conv_bn_matmul(a, layer, activation)
    return out[:n * ho * wo, :n_out].reshape(n, ho, wo, n_out)


def convT_bias_act(x, layer, *, n_out, stride, pad, output_pad, activation,
                   out_dtype):
    n = x.shape[0]
    xd = _dilate_nhwc(x, stride)
    a, ho, wo = _im2col_nhwc(xd, KSIZE, 1, KSIZE - 1 - pad,
                             KSIZE - 1 - pad + output_pad)
    out = _tiled_matmul_bias_act(a, layer["w"], layer["b"], activation,
                                 out_dtype=out_dtype)
    return out[:n * ho * wo, :n_out].reshape(n, ho, wo, n_out)


# --------------------------------------------------------------------------- #
# Parameters: PyTorch-layout init + one-time kernel-ready preparation
# --------------------------------------------------------------------------- #
def init_torch_params(key, input_shape, latent_dim, n_clusters):
    C, H, W = input_shape
    flat = 128 * (H // 8) * (W // 8)
    keys = iter(jax.random.split(key, 40))

    def nrm(shape, scale=0.05):
        return scale * jax.random.normal(next(keys), shape, dtype=jnp.float32)

    def conv(cin, cout):            # Conv2d weight (cout, cin, 3, 3) + BN params
        return dict(w=nrm((cout, cin, 3, 3)), b=nrm((cout,)),
                    gamma=jnp.ones((cout,), jnp.float32),
                    beta=jnp.zeros((cout,), jnp.float32))

    def convT(cin, cout, bn=True):  # ConvTranspose2d weight (cin, cout, 3, 3)
        d = dict(w=nrm((cin, cout, 3, 3)), b=nrm((cout,)))
        if bn:
            d["gamma"] = jnp.ones((cout,), jnp.float32)
            d["beta"] = jnp.zeros((cout,), jnp.float32)
        return d

    def lin(fin, fout):
        return dict(w=nrm((fout, fin)), b=nrm((fout,)))

    p = {}
    p["enc1"], p["enc2"], p["enc3"] = conv(C, 32), conv(32, 64), conv(64, 128)
    p["fc1"], p["fc2"] = lin(flat, 256), lin(256, 2 * latent_dim)
    p["dfc1"], p["dfc2"] = lin(latent_dim, 256), lin(256, flat)
    p["dec1"], p["dec2"] = convT(128, 64), convT(64, 32)
    p["dec3"] = convT(32, C, bn=False)
    # GMM prior params: present in the module but unused by forward().
    p["mu_c"] = jax.random.normal(next(keys), (n_clusters, latent_dim), jnp.float32)
    p["log_var_c"] = jnp.zeros((n_clusters,), jnp.float32)
    p["log_p_c"] = jnp.zeros((n_clusters,), jnp.float32)
    return p


def prepare_params(p, input_shape, latent_dim):
    """One-time layout work: im2col-matched (K, Np) bf16 weight matrices,
    lane-padded (1, Np) bias/gamma/beta, NHWC flatten permutations, fc2 column
    split, dfc1 K padding."""
    C, H, W = input_shape
    H8, W8 = H // 8, W // 8
    flat = 128 * H8 * W8
    latent_pad = _round_up(latent_dim, LANE)

    def pad_cols(m, cout):
        np_ = _round_up(cout, LANE)
        return jnp.pad(m, ((0, 0), (0, np_ - cout))) if np_ != cout else m

    def row_vec(v, cout):
        np_ = _round_up(cout, LANE)
        v = jnp.pad(v, (0, np_ - cout)) if np_ != cout else v
        return v.reshape(1, np_).astype(jnp.float32)

    def prep_conv(layer):
        w = layer["w"]                                  # (cout, cin, k, k)
        cout, cin, k, _ = w.shape
        wm = w.transpose(2, 3, 1, 0).reshape(k * k * cin, cout)
        # NOTE: Conv2d bias is dropped on purpose: with the train-mode BN right
        # after, the batch-mean subtraction cancels it exactly.  It would need
        # to be restored if an eval-mode (running-stats) BN path were added.
        return dict(w=pad_cols(wm, cout).astype(jnp.bfloat16),
                    gamma=row_vec(layer["gamma"], cout),
                    beta=row_vec(layer["beta"], cout))

    def prep_convT(layer, bn):
        wt = layer["w"]                                 # (cin, cout, k, k)
        cin, cout, k, _ = wt.shape
        w_eq = jnp.flip(wt, axis=(2, 3)).transpose(2, 3, 0, 1)  # (kh,kw,cin,cout)
        wm = w_eq.reshape(k * k * cin, cout)
        d = dict(w=pad_cols(wm, cout).astype(jnp.bfloat16))
        if bn:
            d["gamma"] = row_vec(layer["gamma"], cout)
            d["beta"] = row_vec(layer["beta"], cout)
        else:
            d["b"] = row_vec(layer["b"], cout)
        return d

    def prep_linear(layer, k_pad=None):
        w = layer["w"]                                  # (out, in)
        out, kin = w.shape
        wm = w.T
        if k_pad is not None and k_pad != kin:
            wm = jnp.pad(wm, ((0, k_pad - kin), (0, 0)))
        return dict(w=pad_cols(wm, out).astype(jnp.bfloat16),
                    b=row_vec(layer["b"], out))

    q = {}
    q["enc1"], q["enc2"], q["enc3"] = (prep_conv(p[k]) for k in
                                       ("enc1", "enc2", "enc3"))
    q["dec1"] = prep_convT(p["dec1"], bn=True)
    q["dec2"] = prep_convT(p["dec2"], bn=True)
    q["dec3"] = prep_convT(p["dec3"], bn=False)

    # fc1 consumes an NCHW flatten in PyTorch; activations here stay NHWC, so
    # permute the weight columns from (c, h, w) to (h, w, c) order once.
    w1 = p["fc1"]["w"].reshape(256, 128, H8, W8).transpose(0, 2, 3, 1).reshape(256, flat)
    q["fc1"] = dict(w=w1.T.astype(jnp.bfloat16), b=row_vec(p["fc1"]["b"], 256))

    # fc2: mu columns -> [0, latent_pad), log_var -> [latent_pad, 2*latent_pad)
    w2, b2 = p["fc2"]["w"], p["fc2"]["b"]               # (2*latent, 256), (2*latent,)
    w2p = jnp.zeros((2 * latent_pad, 256), jnp.float32)
    w2p = w2p.at[:latent_dim].set(w2[:latent_dim])
    w2p = w2p.at[latent_pad:latent_pad + latent_dim].set(w2[latent_dim:])
    b2p = jnp.zeros((2 * latent_pad,), jnp.float32)
    b2p = b2p.at[:latent_dim].set(b2[:latent_dim])
    b2p = b2p.at[latent_pad:latent_pad + latent_dim].set(b2[latent_dim:])
    q["fc2"] = dict(w=w2p.T.astype(jnp.bfloat16),
                    b=b2p.reshape(1, 2 * latent_pad).astype(jnp.float32))

    # dfc1 consumes the lane-padded z directly: zero-pad its K dim to latent_pad
    # (padded z columns are exactly zero, so this is exact).
    q["dfc1"] = prep_linear(p["dfc1"], k_pad=latent_pad)

    # dfc2 output feeds an NHWC unflatten; permute output rows (c,h,w)->(h,w,c).
    wd = p["dfc2"]["w"].reshape(128, H8, W8, 256).transpose(1, 2, 0, 3).reshape(flat, 256)
    bd = p["dfc2"]["b"].reshape(128, H8, W8).transpose(1, 2, 0).reshape(flat)
    q["dfc2"] = dict(w=wd.T.astype(jnp.bfloat16), b=row_vec(bd, flat))
    return q


# --------------------------------------------------------------------------- #
# VaDE forward
# --------------------------------------------------------------------------- #
def vade_forward(prep, x_nchw, eps, *, input_shape, latent_dim):
    C, H, W = input_shape
    H8, W8 = H // 8, W // 8
    flat = 128 * H8 * W8
    latent_pad = _round_up(latent_dim, LANE)
    n = x_nchw.shape[0]
    mp = _round_up(n, 8)

    # NCHW -> NHWC once; bf16 activations end-to-end (MXU operands).
    x = jnp.transpose(x_nchw, (0, 2, 3, 1)).astype(jnp.bfloat16)

    # encoder
    h = conv_bn_act(x, prep["enc1"], n_out=32, stride=2, pad=1, activation="relu")
    h = conv_bn_act(h, prep["enc2"], n_out=64, stride=2, pad=1, activation="relu")
    h = conv_bn_act(h, prep["enc3"], n_out=128, stride=2, pad=1, activation="relu")

    # fc chain: keep row-padded, lane-dense (mp, Np) activations flowing; slice
    # only at model boundaries.
    h_flat = jnp.pad(h.reshape(n, flat), ((0, mp - n), (0, 0)))          # bf16
    h1 = _tiled_matmul_bias_act(h_flat, prep["fc1"]["w"], prep["fc1"]["b"],
                                "relu")                                  # (mp,256)
    eps_p = jnp.pad(eps, ((0, mp - n), (0, latent_pad - latent_dim)))
    mu_p, lv_p, z_p = fc2_reparam(h1, prep["fc2"], eps_p, latent_pad=latent_pad)
    mu_q = mu_p[:n, :latent_dim]
    log_var_q = lv_p[:n, :latent_dim]
    z = z_p[:n, :latent_dim]

    # decoder (padded rows/columns of z_p are zero-weighted; sliced at reshape)
    d = _tiled_matmul_bias_act(z_p.astype(jnp.bfloat16), prep["dfc1"]["w"],
                               prep["dfc1"]["b"], "relu")                # (mp,256)
    d = _tiled_matmul_bias_act(d, prep["dfc2"]["w"], prep["dfc2"]["b"],
                               "relu")                                   # (mp,flat)
    d = d[:n].reshape(n, H8, W8, 128)

    d = convT_bn_act(d, prep["dec1"], n_out=64, stride=2, pad=1, output_pad=1,
                     activation="relu")
    d = convT_bn_act(d, prep["dec2"], n_out=32, stride=2, pad=1, output_pad=1,
                     activation="relu")
    xr = convT_bias_act(d, prep["dec3"], n_out=C, stride=2, pad=1, output_pad=1,
                        activation="tanh", out_dtype=jnp.float32)
    x_recon = jnp.transpose(xr, (0, 3, 1, 2))        # NHWC -> NCHW (once)
    return x_recon, mu_q, log_var_q, z


# --------------------------------------------------------------------------- #
if __name__ == "__main__":
    input_shape = (4, 16, 16)   # (C, H, W)
    latent_dim = 10
    n_clusters = 10
    batch = 2

    root = jax.random.PRNGKey(0)
    k_param, k_x, k_eps = jax.random.split(root, 3)

    torch_params = init_torch_params(k_param, input_shape, latent_dim, n_clusters)
    prep = prepare_params(torch_params, input_shape, latent_dim)

    x = jax.random.normal(k_x, (batch, *input_shape), dtype=jnp.float32)
    # TODO(synk): eps stands in for torch.randn_like(std) via a JAX PRNG stream.
    eps = jax.random.normal(k_eps, (batch, latent_dim), dtype=jnp.float32)

    fwd = jax.jit(functools.partial(vade_forward,
                                    input_shape=input_shape,
                                    latent_dim=latent_dim))
    x_recon, mu_q, log_var_q, z = fwd(prep, x, eps)
    jax.block_until_ready((x_recon, mu_q, log_var_q, z))

    assert x_recon.shape == (batch, *input_shape)
    assert x_recon.dtype == jnp.float32
    assert mu_q.shape == (batch, latent_dim)
    assert log_var_q.shape == (batch, latent_dim)
    assert z.shape == (batch, latent_dim)
    assert bool(jnp.all(jnp.isfinite(x_recon)))
    assert bool(jnp.all(jnp.isfinite(z)))
    print("KERNEL_OK")
</pallas_src>

<mosaic_0001>
module attributes {stable_mosaic.version = 11 : i64} {
  func.func @_mm_bn_act_kernel(%arg0: i32, %arg1: i32, %arg2: memref<128x36xbf16, #tpu.memory_space<vmem>>, %arg3: memref<36x128xbf16, #tpu.memory_space<vmem>>, %arg4: memref<1x128xf32, #tpu.memory_space<vmem>>, %arg5: memref<1x128xf32, #tpu.memory_space<vmem>>, %arg6: memref<128x128xbf16, #tpu.memory_space<vmem>>, %arg7: memref<128x128xf32, #tpu.memory_space<vmem>>) attributes {dimension_semantics = [#tpu.dimension_semantics<parallel>, #tpu.dimension_semantics<arbitrary>], iteration_bounds = array<i64: 1, 1>, scalar_prefetch = 0 : i64, scratch_operands = 1 : i64, tpu.core_type = #tpu.core_type<tc>, window_params = [{transform_indices = @transform_0, window_bounds = array<i64: 128, 36>}, {transform_indices = @transform_1, window_bounds = array<i64: 36, 128>}, {transform_indices = @transform_2, window_bounds = array<i64: 1, 128>}, {transform_indices = @transform_3, window_bounds = array<i64: 1, 128>}, {transform_indices = @transform_4, window_bounds = array<i64: 128, 128>}]} {
    %c0_i32 = arith.constant 0 : i32
    %0 = arith.cmpi eq, %arg1, %c0_i32 : i32
    %1 = arith.extui %0 : i1 to i32
    %c0_i32_0 = arith.constant 0 : i32
    %2 = arith.cmpi ne, %1, %c0_i32_0 : i32
    scf.if %2 {
      %cst_10 = arith.constant 0.000000e+00 : f32
      %12 = vector.broadcast %cst_10 : f32 to vector<128x128xf32>
      %c0_11 = arith.constant 0 : index
      %c0_12 = arith.constant 0 : index
      %13 = vector.load %arg7[%c0_11, %c0_12] : memref<128x128xf32, #tpu.memory_space<vmem>>, vector<128x128xf32>
      tpu.vector_store %arg7[%c0_11, %c0_12], %12 {strides = array<i32>} : memref<128x128xf32, #tpu.memory_space<vmem>>, vector<128x128xf32>,
    } else {
    }
    %c0 = arith.constant 0 : index
    %c0_1 = arith.constant 0 : index
    %3 = vector.load %arg7[%c0, %c0_1] : memref<128x128xf32, #tpu.memory_space<vmem>>, vector<128x128xf32>
    %c0_2 = arith.constant 0 : index
    %c0_3 = arith.constant 0 : index
    %4 = vector.load %arg2[%c0_2, %c0_3] : memref<128x36xbf16, #tpu.memory_space<vmem>>, vector<128x36xbf16>
    %c0_4 = arith.constant 0 : index
    %c0_5 = arith.constant 0 : index
    %5 = vector.load %arg3[%c0_4, %c0_5] : memref<36x128xbf16, #tpu.memory_space<vmem>>, vector<36x128xbf16>
    %cst = arith.constant dense<0.000000e+00> : vector<128x128xf32>
    %6 = tpu.matmul %4, %5, %cst {dimension_numbers = #tpu.dot_dimension_numbers<[1], [0], [0], [1], [0, 0, 1, 1], [], []>} : vector<128x36xbf16>, vector<36x128xbf16>, vector<128x128xf32> -> vector<128x128xf32>
    %7 = arith.addf %3, %6 : vector<128x128xf32>
    %c0_6 = arith.constant 0 : index
    %c0_7 = arith.constant 0 : index
    %8 = vector.load %arg7[%c0_6, %c0_7] : memref<128x128xf32, #tpu.memory_space<vmem>>, vector<128x128xf32>
    tpu.vector_store %arg7[%c0_6, %c0_7], %7 {strides = array<i32>} : memref<128x128xf32, #tpu.memory_space<vmem>>, vector<128x128xf32>,
    %c0_i32_8 = arith.constant 0 : i32
    %9 = arith.cmpi eq, %arg1, %c0_i32_8 : i32
    %10 = arith.extui %9 : i1 to i32
    %c0_i32_9 = arith.constant 0 : i32
    %11 = arith.cmpi ne, %10, %c0_i32_9 : i32
    scf.if %11 {
      %c0_10 = arith.constant 0 : index
      %c0_11 = arith.constant 0 : index
      %12 = vector.load %arg7[%c0_10, %c0_11] : memref<128x128xf32, #tpu.memory_space<vmem>>, vector<128x128xf32>
      %cst_12 = arith.constant dense<0.000000e+00> : vector<128xf32>
      %13 = vector.multi_reduction <add>, %12, %cst_12 [0] : vector<128x128xf32> to vector<128xf32>
      %14 = vector.shape_cast %13 : vector<128xf32> to vector<1x128xf32>
      %cst_13 = arith.constant 7.812500e-03 : f32
      %15 = vector.broadcast %cst_13 : f32 to vector<1x128xf32>
      %16 = arith.mulf %14, %15 : vector<1x128xf32>
      %17 = vector.broadcast %16 : vector<1x128xf32> to vector<128x128xf32>
      %18 = arith.subf %12, %17 : vector<128x128xf32>
      %19 = arith.mulf %18, %18 : vector<128x128xf32>
      %cst_14 = arith.constant dense<0.000000e+00> : vector<128xf32>
      %20 = vector.multi_reduction <add>, %19, %cst_14 [0] : vector<128x128xf32> to vector<128xf32>
      %21 = vector.shape_cast %20 : vector<128xf32> to vector<1x128xf32>
      %cst_15 = arith.constant 7.812500e-03 : f32
      %22 = vector.broadcast %cst_15 : f32 to vector<1x128xf32>
      %23 = arith.mulf %21, %22 : vector<1x128xf32>
      %c0_16 = arith.constant 0 : index
      %c0_17 = arith.constant 0 : index
      %24 = vector.load %arg4[%c0_16, %c0_17] : memref<1x128xf32, #tpu.memory_space<vmem>>, vector<1x128xf32>
      %cst_18 = arith.constant 9.99999974E-6 : f32
      %25 = vector.broadcast %cst_18 : f32 to vector<1x128xf32>
      %26 = arith.addf %23, %25 : vector<1x128xf32>
      %27 = math.rsqrt %26 : vector<1x128xf32>
      %28 = arith.mulf %24, %27 : vector<1x128xf32>
      %c0_19 = arith.constant 0 : index
      %c0_20 = arith.constant 0 : index
      %29 = vector.load %arg5[%c0_19, %c0_20] : memref<1x128xf32, #tpu.memory_space<vmem>>, vector<1x128xf32>
      %30 = arith.mulf %16, %28 : vector<1x128xf32>
      %31 = arith.subf %29, %30 : vector<1x128xf32>
      %32 = vector.broadcast %28 : vector<1x128xf32> to vector<128x128xf32>
      %33 = arith.mulf %12, %32 : vector<128x128xf32>
      %34 = vector.broadcast %31 : vector<1x128xf32> to vector<128x128xf32>
      %35 = arith.addf %33, %34 : vector<128x128xf32>
      %cst_21 = arith.constant 0.000000e+00 : f32
      %36 = vector.broadcast %cst_21 : f32 to vector<128x128xf32>
      %37 = arith.maximumf %35, %36 : vector<128x128xf32>
      %38 = arith.truncf %37 : vector<128x128xf32> to vector<128x128xbf16>
      %c0_22 = arith.constant 0 : index
      %c0_23 = arith.constant 0 : index
      %39 = vector.load %arg6[%c0_22, %c0_23] : memref<128x128xbf16, #tpu.memory_space<vmem>>, vector<128x128xbf16>
      tpu.vector_store %arg6[%c0_22, %c0_23], %38 {strides = array<i32>} : memref<128x128xbf16, #tpu.memory_space<vmem>>, vector<128x128xbf16>,
    } else {
    }
    return
  }
  func.func @transform_0(%arg0: i32, %arg1: i32) -> (i32, i32) {
    %c0_i32 = arith.constant 0 : i32
    %c0_i32_0 = arith.constant 0 : i32
    return %c0_i32, %arg1 : i32, i32
  }
  func.func @transform_1(%arg0: i32, %arg1: i32) -> (i32, i32) {
    %c0_i32 = arith.constant 0 : i32
    return %arg1, %arg0 : i32, i32
  }
  func.func @transform_2(%arg0: i32, %arg1: i32) -> (i32, i32) {
    %c0_i32 = arith.constant 0 : i32
    %c0_i32_0 = arith.constant 0 : i32
    return %c0_i32, %arg0 : i32, i32
  }
  func.func @transform_3(%arg0: i32, %arg1: i32) -> (i32, i32) {
    %c0_i32 = arith.constant 0 : i32
    %c0_i32_0 = arith.constant 0 : i32
    return %c0_i32, %arg0 : i32, i32
  }
  func.func @transform_4(%arg0: i32, %arg1: i32) -> (i32, i32) {
    %c0_i32 = arith.constant 0 : i32
    %c0_i32_0 = arith.constant 0 : i32
    return %c0_i32, %arg0 : i32, i32
  }
}

module attributes {stable_mosaic.version = 11 : i64} {
  func.func @_mm_bn_act_kernel(%arg0: i32, %arg1: i32, %arg2: memref<32x288xbf16, #tpu.memory_space<vmem>>, %arg3: memref<288x128xbf16, #tpu.memory_space<vmem>>, %arg4: memref<1x128xf32, #tpu.memory_space<vmem>>, %arg5: memref<1x128xf32, #tpu.memory_space<vmem>>, %arg6: memref<32x128xbf16, #tpu.memory_space<vmem>>, %arg7: memref<32x128xf32, #tpu.memory_space<vmem>>) attributes {dimension_semantics = [#tpu.dimension_semantics<parallel>, #tpu.dimension_semantics<arbitrary>], iteration_bounds = array<i64: 1, 1>, scalar_prefetch = 0 : i64, scratch_operands = 1 : i64, tpu.core_type = #tpu.core_type<tc>, window_params = [{transform_indices = @transform_0, window_bounds = array<i64: 32, 288>}, {transform_indices = @transform_1, window_bounds = array<i64: 288, 128>}, {transform_indices = @transform_2, window_bounds = array<i64: 1, 128>}, {transform_indices = @transform_3, window_bounds = array<i64: 1, 128>}, {transform_indices = @transform_4, window_bounds = array<i64: 32, 128>}]} {
    %c0_i32 = arith.constant 0 : i32
    %0 = arith.cmpi eq, %arg1, %c0_i32 : i32
    %1 = arith.extui %0 : i1 to i32
    %c0_i32_0 = arith.constant 0 : i32
    %2 = arith.cmpi ne, %1, %c0_i32_0 : i32
    scf.if %2 {
      %cst_10 = arith.constant 0.000000e+00 : f32
      %12 = vector.broadcast %cst_10 : f32 to vector<32x128xf32>
      %c0_11 = arith.constant 0 : index
      %c0_12 = arith.constant 0 : index
      %13 = vector.load %arg7[%c0_11, %c0_12] : memref<32x128xf32, #tpu.memory_space<vmem>>, vector<32x128xf32>
      tpu.vector_store %arg7[%c0_11, %c0_12], %12 {strides = array<i32>} : memref<32x128xf32, #tpu.memory_space<vmem>>, vector<32x128xf32>,
    } else {
    }
    %c0 = arith.constant 0 : index
    %c0_1 = arith.constant 0 : index
    %3 = vector.load %arg7[%c0, %c0_1] : memref<32x128xf32, #tpu.memory_space<vmem>>, vector<32x128xf32>
    %c0_2 = arith.constant 0 : index
    %c0_3 = arith.constant 0 : index
    %4 = vector.load %arg2[%c0_2, %c0_3] : memref<32x288xbf16, #tpu.memory_space<vmem>>, vector<32x288xbf16>
    %c0_4 = arith.constant 0 : index
    %c0_5 = arith.constant 0 : index
    %5 = vector.load %arg3[%c0_4, %c0_5] : memref<288x128xbf16, #tpu.memory_space<vmem>>, vector<288x128xbf16>
    %cst = arith.constant dense<0.000000e+00> : vector<32x128xf32>
    %6 = tpu.matmul %4, %5, %cst {dimension_numbers = #tpu.dot_dimension_numbers<[1], [0], [0], [1], [0, 0, 1, 1], [], []>} : vector<32x288xbf16>, vector<288x128xbf16>, vector<32x128xf32> -> vector<32x128xf32>
    %7 = arith.addf %3, %6 : vector<32x128xf32>
    %c0_6 = arith.constant 0 : index
    %c0_7 = arith.constant 0 : index
    %8 = vector.load %arg7[%c0_6, %c0_7] : memref<32x128xf32, #tpu.memory_space<vmem>>, vector<32x128xf32>
    tpu.vector_store %arg7[%c0_6, %c0_7], %7 {strides = array<i32>} : memref<32x128xf32, #tpu.memory_space<vmem>>, vector<32x128xf32>,
    %c0_i32_8 = arith.constant 0 : i32
    %9 = arith.cmpi eq, %arg1, %c0_i32_8 : i32
    %10 = arith.extui %9 : i1 to i32
    %c0_i32_9 = arith.constant 0 : i32
    %11 = arith.cmpi ne, %10, %c0_i32_9 : i32
    scf.if %11 {
      %c0_10 = arith.constant 0 : index
      %c0_11 = arith.constant 0 : index
      %12 = vector.load %arg7[%c0_10, %c0_11] : memref<32x128xf32, #tpu.memory_space<vmem>>, vector<32x128xf32>
      %cst_12 = arith.constant dense<0.000000e+00> : vector<128xf32>
      %13 = vector.multi_reduction <add>, %12, %cst_12 [0] : vector<32x128xf32> to vector<128xf32>
      %14 = vector.shape_cast %13 : vector<128xf32> to vector<1x128xf32>
      %cst_13 = arith.constant 3.125000e-02 : f32
      %15 = vector.broadcast %cst_13 : f32 to vector<1x128xf32>
      %16 = arith.mulf %14, %15 : vector<1x128xf32>
      %17 = vector.broadcast %16 : vector<1x128xf32> to vector<32x128xf32>
      %18 = arith.subf %12, %17 : vector<32x128xf32>
      %19 = arith.mulf %18, %18 : vector<32x128xf32>
      %cst_14 = arith.constant dense<0.000000e+00> : vector<128xf32>
      %20 = vector.multi_reduction <add>, %19, %cst_14 [0] : vector<32x128xf32> to vector<128xf32>
      %21 = vector.shape_cast %20 : vector<128xf32> to vector<1x128xf32>
      %cst_15 = arith.constant 3.125000e-02 : f32
      %22 = vector.broadcast %cst_15 : f32 to vector<1x128xf32>
      %23 = arith.mulf %21, %22 : vector<1x128xf32>
      %c0_16 = arith.constant 0 : index
      %c0_17 = arith.constant 0 : index
      %24 = vector.load %arg4[%c0_16, %c0_17] : memref<1x128xf32, #tpu.memory_space<vmem>>, vector<1x128xf32>
      %cst_18 = arith.constant 9.99999974E-6 : f32
      %25 = vector.broadcast %cst_18 : f32 to vector<1x128xf32>
      %26 = arith.addf %23, %25 : vector<1x128xf32>
      %27 = math.rsqrt %26 : vector<1x128xf32>
      %28 = arith.mulf %24, %27 : vector<1x128xf32>
      %c0_19 = arith.constant 0 : index
      %c0_20 = arith.constant 0 : index
      %29 = vector.load %arg5[%c0_19, %c0_20] : memref<1x128xf32, #tpu.memory_space<vmem>>, vector<1x128xf32>
      %30 = arith.mulf %16, %28 : vector<1x128xf32>
      %31 = arith.subf %29, %30 : vector<1x128xf32>
      %32 = vector.broadcast %28 : vector<1x128xf32> to vector<32x128xf32>
      %33 = arith.mulf %12, %32 : vector<32x128xf32>
      %34 = vector.broadcast %31 : vector<1x128xf32> to vector<32x128xf32>
      %35 = arith.addf %33, %34 : vector<32x128xf32>
      %cst_21 = arith.constant 0.000000e+00 : f32
      %36 = vector.broadcast %cst_21 : f32 to vector<32x128xf32>
      %37 = arith.maximumf %35, %36 : vector<32x128xf32>
      %38 = arith.truncf %37 : vector<32x128xf32> to vector<32x128xbf16>
      %c0_22 = arith.constant 0 : index
      %c0_23 = arith.constant 0 : index
      %39 = vector.load %arg6[%c0_22, %c0_23] : memref<32x128xbf16, #tpu.memory_space<vmem>>, vector<32x128xbf16>
      tpu.vector_store %arg6[%c0_22, %c0_23], %38 {strides = array<i32>} : memref<32x128xbf16, #tpu.memory_space<vmem>>, vector<32x128xbf16>,
    } else {
    }
    return
  }
  func.func @transform_0(%arg0: i32, %arg1: i32) -> (i32, i32) {
    %c0_i32 = arith.constant 0 : i32
    %c0_i32_0 = arith.constant 0 : i32
    return %c0_i32, %arg1 : i32, i32
  }
  func.func @transform_1(%arg0: i32, %arg1: i32) -> (i32, i32) {
    %c0_i32 = arith.constant 0 : i32
    return %arg1, %arg0 : i32, i32
  }
  func.func @transform_2(%arg0: i32, %arg1: i32) -> (i32, i32) {
    %c0_i32 = arith.constant 0 : i32
    %c0_i32_0 = arith.constant 0 : i32
    return %c0_i32, %arg0 : i32, i32
  }
  func.func @transform_3(%arg0: i32, %arg1: i32) -> (i32, i32) {
    %c0_i32 = arith.constant 0 : i32
    %c0_i32_0 = arith.constant 0 : i32
    return %c0_i32, %arg0 : i32, i32
  }
  func.func @transform_4(%arg0: i32, %arg1: i32) -> (i32, i32) {
    %c0_i32 = arith.constant 0 : i32
    %c0_i32_0 = arith.constant 0 : i32
    return %c0_i32, %arg0 : i32, i32
  }
}

module attributes {stable_mosaic.version = 11 : i64} {
  func.func @_fc2_reparam_kernel(%arg0: i32, %arg1: memref<8x256xbf16, #tpu.memory_space<vmem>>, %arg2: memref<256x256xbf16, #tpu.memory_space<vmem>>, %arg3: memref<1x256xf32, #tpu.memory_space<vmem>>, %arg4: memref<8x128xf32, #tpu.memory_space<vmem>>, %arg5: memref<8x128xf32, #tpu.memory_space<vmem>>, %arg6: memref<8x128xf32, #tpu.memory_space<vmem>>, %arg7: memref<8x128xf32, #tpu.memory_space<vmem>>) attributes {dimension_semantics = [#tpu.dimension_semantics<parallel>], iteration_bounds = array<i64: 1>, scalar_prefetch = 0 : i64, scratch_operands = 0 : i64, tpu.core_type = #tpu.core_type<tc>, window_params = [{transform_indices = @transform_0, window_bounds = array<i64: 8, 256>}, {pipeline_mode = #tpu.pipeline_mode<synchronous>, transform_indices = @transform_1, window_bounds = array<i64: 256, 256>}, {pipeline_mode = #tpu.pipeline_mode<synchronous>, transform_indices = @transform_2, window_bounds = array<i64: 1, 256>}, {transform_indices = @transform_3, window_bounds = array<i64: 8, 128>}, {transform_indices = @transform_4, window_bounds = array<i64: 8, 128>}, {transform_indices = @transform_5, window_bounds = array<i64: 8, 128>}, {transform_indices = @transform_6, window_bounds = array<i64: 8, 128>}]} {
    %c0 = arith.constant 0 : index
    %c0_0 = arith.constant 0 : index
    %0 = vector.load %arg1[%c0, %c0_0] : memref<8x256xbf16, #tpu.memory_space<vmem>>, vector<8x256xbf16>
    %c0_1 = arith.constant 0 : index
    %c0_2 = arith.constant 0 : index
    %1 = vector.load %arg2[%c0_1, %c0_2] : memref<256x256xbf16, #tpu.memory_space<vmem>>, vector<256x256xbf16>
    %cst = arith.constant dense<0.000000e+00> : vector<8x256xf32>
    %2 = tpu.matmul %0, %1, %cst {dimension_numbers = #tpu.dot_dimension_numbers<[1], [0], [0], [1], [0, 0, 1, 1], [], []>} : vector<8x256xbf16>, vector<256x256xbf16>, vector<8x256xf32> -> vector<8x256xf32>
    %c0_3 = arith.constant 0 : index
    %c0_4 = arith.constant 0 : index
    %3 = vector.load %arg3[%c0_3, %c0_4] : memref<1x256xf32, #tpu.memory_space<vmem>>, vector<1x256xf32>
    %4 = vector.broadcast %3 : vector<1x256xf32> to vector<8x256xf32>
    %5 = arith.addf %2, %4 : vector<8x256xf32>
    %6 = vector.extract_strided_slice %5 {offsets = [0, 0], sizes = [8, 128], strides = [1, 1]} : vector<8x256xf32> to vector<8x128xf32>
    %7 = vector.extract_strided_slice %5 {offsets = [0, 128], sizes = [8, 128], strides = [1, 1]} : vector<8x256xf32> to vector<8x128xf32>
    %c0_5 = arith.constant 0 : index
    %c0_6 = arith.constant 0 : index
    %8 = vector.load %arg5[%c0_5, %c0_6] : memref<8x128xf32, #tpu.memory_space<vmem>>, vector<8x128xf32>
    tpu.vector_store %arg5[%c0_5, %c0_6], %6 {strides = array<i32>} : memref<8x128xf32, #tpu.memory_space<vmem>>, vector<8x128xf32>,
    %c0_7 = arith.constant 0 : index
    %c0_8 = arith.constant 0 : index
    %9 = vector.load %arg6[%c0_7, %c0_8] : memref<8x128xf32, #tpu.memory_space<vmem>>, vector<8x128xf32>
    tpu.vector_store %arg6[%c0_7, %c0_8], %7 {strides = array<i32>} : memref<8x128xf32, #tpu.memory_space<vmem>>, vector<8x128xf32>,
    %c0_9 = arith.constant 0 : index
    %c0_10 = arith.constant 0 : index
    %10 = vector.load %arg4[%c0_9, %c0_10] : memref<8x128xf32, #tpu.memory_space<vmem>>, vector<8x128xf32>
    %cst_11 = arith.constant 5.000000e-01 : f32
    %11 = vector.broadcast %cst_11 : f32 to vector<8x128xf32>
    %12 = arith.mulf %11, %7 : vector<8x128xf32>
    %13 = math.exp %12 : vector<8x128xf32>
    %14 = arith.mulf %10, %13 : vector<8x128xf32>
    %15 = arith.addf %6, %14 : vector<8x128xf32>
    %c0_12 = arith.constant 0 : index
    %c0_13 = arith.constant 0 : index
    %16 = vector.load %arg7[%c0_12, %c0_13] : memref<8x128xf32, #tpu.memory_space<vmem>>, vector<8x128xf32>
    tpu.vector_store %arg7[%c0_12, %c0_13], %15 {strides = array<i32>} : memref<8x128xf32, #tpu.memory_space<vmem>>, vector<8x128xf32>,
    return
  }
  func.func @transform_0(%arg0: i32) -> (i32, i32) {
    %c0_i32 = arith.constant 0 : i32
    %c0_i32_0 = arith.constant 0 : i32
    return %arg0, %c0_i32 : i32, i32
  }
  func.func @transform_1(%arg0: i32) -> (i32, i32) {
    %c0_i32 = arith.constant 0 : i32
    %c0_i32_0 = arith.constant 0 : i32
    %c0_i32_1 = arith.constant 0 : i32
    return %c0_i32, %c0_i32_0 : i32, i32
  }
  func.func @transform_2(%arg0: i32) -> (i32, i32) {
    %c0_i32 = arith.constant 0 : i32
    %c0_i32_0 = arith.constant 0 : i32
    %c0_i32_1 = arith.constant 0 : i32
    return %c0_i32, %c0_i32_0 : i32, i32
  }
  func.func @transform_3(%arg0: i32) -> (i32, i32) {
    %c0_i32 = arith.constant 0 : i32
    %c0_i32_0 = arith.constant 0 : i32
    return %arg0, %c0_i32 : i32, i32
  }
  func.func @transform_4(%arg0: i32) -> (i32, i32) {
    %c0_i32 = arith.constant 0 : i32
    %c0_i32_0 = arith.constant 0 : i32
    return %arg0, %c0_i32 : i32, i32
  }
  func.func @transform_5(%arg0: i32) -> (i32, i32) {
    %c0_i32 = arith.constant 0 : i32
    %c0_i32_0 = arith.constant 0 : i32
    return %arg0, %c0_i32 : i32, i32
  }
  func.func @transform_6(%arg0: i32) -> (i32, i32) {
    %c0_i32 = arith.constant 0 : i32
    %c0_i32_0 = arith.constant 0 : i32
    return %arg0, %c0_i32 : i32, i32
  }
}

module attributes {stable_mosaic.version = 11 : i64} {
  func.func @_mm_bias_act_kernel(%arg0: i32, %arg1: i32, %arg2: i32, %arg3: memref<8x512xbf16, #tpu.memory_space<vmem>>, %arg4: memref<512x256xbf16, #tpu.memory_space<vmem>>, %arg5: memref<1x256xf32, #tpu.memory_space<vmem>>, %arg6: memref<8x256xbf16, #tpu.memory_space<vmem>>, %arg7: memref<8x256xf32, #tpu.memory_space<vmem>>) attributes {dimension_semantics = [#tpu.dimension_semantics<parallel>, #tpu.dimension_semantics<parallel>, #tpu.dimension_semantics<arbitrary>], iteration_bounds = array<i64: 1, 1, 1>, scalar_prefetch = 0 : i64, scratch_operands = 1 : i64, tpu.core_type = #tpu.core_type<tc>, window_params = [{transform_indices = @transform_0, window_bounds = array<i64: 8, 512>}, {transform_indices = @transform_1, window_bounds = array<i64: 512, 256>}, {transform_indices = @transform_2, window_bounds = array<i64: 1, 256>}, {transform_indices = @transform_3, window_bounds = array<i64: 8, 256>}]} {
    %c0_i32 = arith.constant 0 : i32
    %0 = arith.cmpi eq, %arg2, %c0_i32 : i32
    %1 = arith.extui %0 : i1 to i32
    %c0_i32_0 = arith.constant 0 : i32
    %2 = arith.cmpi ne, %1, %c0_i32_0 : i32
    scf.if %2 {
      %cst_10 = arith.constant 0.000000e+00 : f32
      %12 = vector.broadcast %cst_10 : f32 to vector<8x256xf32>
      %c0_11 = arith.constant 0 : index
      %c0_12 = arith.constant 0 : index
      %13 = vector.load %arg7[%c0_11, %c0_12] : memref<8x256xf32, #tpu.memory_space<vmem>>, vector<8x256xf32>
      tpu.vector_store %arg7[%c0_11, %c0_12], %12 {strides = array<i32>} : memref<8x256xf32, #tpu.memory_space<vmem>>, vector<8x256xf32>,
    } else {
    }
    %c0 = arith.constant 0 : index
    %c0_1 = arith.constant 0 : index
    %3 = vector.load %arg7[%c0, %c0_1] : memref<8x256xf32, #tpu.memory_space<vmem>>, vector<8x256xf32>
    %c0_2 = arith.constant 0 : index
    %c0_3 = arith.constant 0 : index
    %4 = vector.load %arg3[%c0_2, %c0_3] : memref<8x512xbf16, #tpu.memory_space<vmem>>, vector<8x512xbf16>
    %c0_4 = arith.constant 0 : index
    %c0_5 = arith.constant 0 : index
    %5 = vector.load %arg4[%c0_4, %c0_5] : memref<512x256xbf16, #tpu.memory_space<vmem>>, vector<512x256xbf16>
    %cst = arith.constant dense<0.000000e+00> : vector<8x256xf32>
    %6 = tpu.matmul %4, %5, %cst {dimension_numbers = #tpu.dot_dimension_numbers<[1], [0], [0], [1], [0, 0, 1, 1], [], []>} : vector<8x512xbf16>, vector<512x256xbf16>, vector<8x256xf32> -> vector<8x256xf32>
    %7 = arith.addf %3, %6 : vector<8x256xf32>
    %c0_6 = arith.constant 0 : index
    %c0_7 = arith.constant 0 : index
    %8 = vector.load %arg7[%c0_6, %c0_7] : memref<8x256xf32, #tpu.memory_space<vmem>>, vector<8x256xf32>
    tpu.vector_store %arg7[%c0_6, %c0_7], %7 {strides = array<i32>} : memref<8x256xf32, #tpu.memory_space<vmem>>, vector<8x256xf32>,
    %c0_i32_8 = arith.constant 0 : i32
    %9 = arith.cmpi eq, %arg2, %c0_i32_8 : i32
    %10 = arith.extui %9 : i1 to i32
    %c0_i32_9 = arith.constant 0 : i32
    %11 = arith.cmpi ne, %10, %c0_i32_9 : i32
    scf.if %11 {
      %c0_10 = arith.constant 0 : index
      %c0_11 = arith.constant 0 : index
      %12 = vector.load %arg7[%c0_10, %c0_11] : memref<8x256xf32, #tpu.memory_space<vmem>>, vector<8x256xf32>
      %c0_12 = arith.constant 0 : index
      %c0_13 = arith.constant 0 : index
      %13 = vector.load %arg5[%c0_12, %c0_13] : memref<1x256xf32, #tpu.memory_space<vmem>>, vector<1x256xf32>
      %14 = vector.broadcast %13 : vector<1x256xf32> to vector<8x256xf32>
      %15 = arith.addf %12, %14 : vector<8x256xf32>
      %cst_14 = arith.constant 0.000000e+00 : f32
      %16 = vector.broadcast %cst_14 : f32 to vector<8x256xf32>
      %17 = arith.maximumf %15, %16 : vector<8x256xf32>
      %18 = arith.truncf %17 : vector<8x256xf32> to vector<8x256xbf16>
      %c0_15 = arith.constant 0 : index
      %c0_16 = arith.constant 0 : index
      %19 = vector.load %arg6[%c0_15, %c0_16] : memref<8x256xbf16, #tpu.memory_space<vmem>>, vector<8x256xbf16>
      tpu.vector_store %arg6[%c0_15, %c0_16], %18 {strides = array<i32>} : memref<8x256xbf16, #tpu.memory_space<vmem>>, vector<8x256xbf16>,
    } else {
    }
    return
  }
  func.func @transform_0(%arg0: i32, %arg1: i32, %arg2: i32) -> (i32, i32) {
    %c0_i32 = arith.constant 0 : i32
    return %arg0, %arg2 : i32, i32
  }
  func.func @transform_1(%arg0: i32, %arg1: i32, %arg2: i32) -> (i32, i32) {
    %c0_i32 = arith.constant 0 : i32
    return %arg2, %arg1 : i32, i32
  }
  func.func @transform_2(%arg0: i32, %arg1: i32, %arg2: i32) -> (i32, i32) {
    %c0_i32 = arith.constant 0 : i32
    %c0_i32_0 = arith.constant 0 : i32
    return %c0_i32, %arg1 : i32, i32
  }
  func.func @transform_3(%arg0: i32, %arg1: i32, %arg2: i32) -> (i32, i32) {
    %c0_i32 = arith.constant 0 : i32
    return %arg0, %arg1 : i32, i32
  }
}

module attributes {stable_mosaic.version = 11 : i64} {
  func.func @_mm_bn_act_kernel(%arg0: i32, %arg1: i32, %arg2: memref<8x576xbf16, #tpu.memory_space<vmem>>, %arg3: memref<576x128xbf16, #tpu.memory_space<vmem>>, %arg4: memref<1x128xf32, #tpu.memory_space<vmem>>, %arg5: memref<1x128xf32, #tpu.memory_space<vmem>>, %arg6: memref<8x128xbf16, #tpu.memory_space<vmem>>, %arg7: memref<8x128xf32, #tpu.memory_space<vmem>>) attributes {dimension_semantics = [#tpu.dimension_semantics<parallel>, #tpu.dimension_semantics<arbitrary>], iteration_bounds = array<i64: 1, 1>, scalar_prefetch = 0 : i64, scratch_operands = 1 : i64, tpu.core_type = #tpu.core_type<tc>, window_params = [{transform_indices = @transform_0, window_bounds = array<i64: 8, 576>}, {transform_indices = @transform_1, window_bounds = array<i64: 576, 128>}, {transform_indices = @transform_2, window_bounds = array<i64: 1, 128>}, {transform_indices = @transform_3, window_bounds = array<i64: 1, 128>}, {transform_indices = @transform_4, window_bounds = array<i64: 8, 128>}]} {
    %c0_i32 = arith.constant 0 : i32
    %0 = arith.cmpi eq, %arg1, %c0_i32 : i32
    %1 = arith.extui %0 : i1 to i32
    %c0_i32_0 = arith.constant 0 : i32
    %2 = arith.cmpi ne, %1, %c0_i32_0 : i32
    scf.if %2 {
      %cst_10 = arith.constant 0.000000e+00 : f32
      %12 = vector.broadcast %cst_10 : f32 to vector<8x128xf32>
      %c0_11 = arith.constant 0 : index
      %c0_12 = arith.constant 0 : index
      %13 = vector.load %arg7[%c0_11, %c0_12] : memref<8x128xf32, #tpu.memory_space<vmem>>, vector<8x128xf32>
      tpu.vector_store %arg7[%c0_11, %c0_12], %12 {strides = array<i32>} : memref<8x128xf32, #tpu.memory_space<vmem>>, vector<8x128xf32>,
    } else {
    }
    %c0 = arith.constant 0 : index
    %c0_1 = arith.constant 0 : index
    %3 = vector.load %arg7[%c0, %c0_1] : memref<8x128xf32, #tpu.memory_space<vmem>>, vector<8x128xf32>
    %c0_2 = arith.constant 0 : index
    %c0_3 = arith.constant 0 : index
    %4 = vector.load %arg2[%c0_2, %c0_3] : memref<8x576xbf16, #tpu.memory_space<vmem>>, vector<8x576xbf16>
    %c0_4 = arith.constant 0 : index
    %c0_5 = arith.constant 0 : index
    %5 = vector.load %arg3[%c0_4, %c0_5] : memref<576x128xbf16, #tpu.memory_space<vmem>>, vector<576x128xbf16>
    %cst = arith.constant dense<0.000000e+00> : vector<8x128xf32>
    %6 = tpu.matmul %4, %5, %cst {dimension_numbers = #tpu.dot_dimension_numbers<[1], [0], [0], [1], [0, 0, 1, 1], [], []>} : vector<8x576xbf16>, vector<576x128xbf16>, vector<8x128xf32> -> vector<8x128xf32>
    %7 = arith.addf %3, %6 : vector<8x128xf32>
    %c0_6 = arith.constant 0 : index
    %c0_7 = arith.constant 0 : index
    %8 = vector.load %arg7[%c0_6, %c0_7] : memref<8x128xf32, #tpu.memory_space<vmem>>, vector<8x128xf32>
    tpu.vector_store %arg7[%c0_6, %c0_7], %7 {strides = array<i32>} : memref<8x128xf32, #tpu.memory_space<vmem>>, vector<8x128xf32>,
    %c0_i32_8 = arith.constant 0 : i32
    %9 = arith.cmpi eq, %arg1, %c0_i32_8 : i32
    %10 = arith.extui %9 : i1 to i32
    %c0_i32_9 = arith.constant 0 : i32
    %11 = arith.cmpi ne, %10, %c0_i32_9 : i32
    scf.if %11 {
      %c0_10 = arith.constant 0 : index
      %c0_11 = arith.constant 0 : index
      %12 = vector.load %arg7[%c0_10, %c0_11] : memref<8x128xf32, #tpu.memory_space<vmem>>, vector<8x128xf32>
      %cst_12 = arith.constant dense<0.000000e+00> : vector<128xf32>
      %13 = vector.multi_reduction <add>, %12, %cst_12 [0] : vector<8x128xf32> to vector<128xf32>
      %14 = vector.shape_cast %13 : vector<128xf32> to vector<1x128xf32>
      %cst_13 = arith.constant 1.250000e-01 : f32
      %15 = vector.broadcast %cst_13 : f32 to vector<1x128xf32>
      %16 = arith.mulf %14, %15 : vector<1x128xf32>
      %17 = vector.broadcast %16 : vector<1x128xf32> to vector<8x128xf32>
      %18 = arith.subf %12, %17 : vector<8x128xf32>
      %19 = arith.mulf %18, %18 : vector<8x128xf32>
      %cst_14 = arith.constant dense<0.000000e+00> : vector<128xf32>
      %20 = vector.multi_reduction <add>, %19, %cst_14 [0] : vector<8x128xf32> to vector<128xf32>
      %21 = vector.shape_cast %20 : vector<128xf32> to vector<1x128xf32>
      %cst_15 = arith.constant 1.250000e-01 : f32
      %22 = vector.broadcast %cst_15 : f32 to vector<1x128xf32>
      %23 = arith.mulf %21, %22 : vector<1x128xf32>
      %c0_16 = arith.constant 0 : index
      %c0_17 = arith.constant 0 : index
      %24 = vector.load %arg4[%c0_16, %c0_17] : memref<1x128xf32, #tpu.memory_space<vmem>>, vector<1x128xf32>
      %cst_18 = arith.constant 9.99999974E-6 : f32
      %25 = vector.broadcast %cst_18 : f32 to vector<1x128xf32>
      %26 = arith.addf %23, %25 : vector<1x128xf32>
      %27 = math.rsqrt %26 : vector<1x128xf32>
      %28 = arith.mulf %24, %27 : vector<1x128xf32>
      %c0_19 = arith.constant 0 : index
      %c0_20 = arith.constant 0 : index
      %29 = vector.load %arg5[%c0_19, %c0_20] : memref<1x128xf32, #tpu.memory_space<vmem>>, vector<1x128xf32>
      %30 = arith.mulf %16, %28 : vector<1x128xf32>
      %31 = arith.subf %29, %30 : vector<1x128xf32>
      %32 = vector.broadcast %28 : vector<1x128xf32> to vector<8x128xf32>
      %33 = arith.mulf %12, %32 : vector<8x128xf32>
      %34 = vector.broadcast %31 : vector<1x128xf32> to vector<8x128xf32>
      %35 = arith.addf %33, %34 : vector<8x128xf32>
      %cst_21 = arith.constant 0.000000e+00 : f32
      %36 = vector.broadcast %cst_21 : f32 to vector<8x128xf32>
      %37 = arith.maximumf %35, %36 : vector<8x128xf32>
      %38 = arith.truncf %37 : vector<8x128xf32> to vector<8x128xbf16>
      %c0_22 = arith.constant 0 : index
      %c0_23 = arith.constant 0 : index
      %39 = vector.load %arg6[%c0_22, %c0_23] : memref<8x128xbf16, #tpu.memory_space<vmem>>, vector<8x128xbf16>
      tpu.vector_store %arg6[%c0_22, %c0_23], %38 {strides = array<i32>} : memref<8x128xbf16, #tpu.memory_space<vmem>>, vector<8x128xbf16>,
    } else {
    }
    return
  }
  func.func @transform_0(%arg0: i32, %arg1: i32) -> (i32, i32) {
    %c0_i32 = arith.constant 0 : i32
    %c0_i32_0 = arith.constant 0 : i32
    return %c0_i32, %arg1 : i32, i32
  }
  func.func @transform_1(%arg0: i32, %arg1: i32) -> (i32, i32) {
    %c0_i32 = arith.constant 0 : i32
    return %arg1, %arg0 : i32, i32
  }
  func.func @transform_2(%arg0: i32, %arg1: i32) -> (i32, i32) {
    %c0_i32 = arith.constant 0 : i32
    %c0_i32_0 = arith.constant 0 : i32
    return %c0_i32, %arg0 : i32, i32
  }
  func.func @transform_3(%arg0: i32, %arg1: i32) -> (i32, i32) {
    %c0_i32 = arith.constant 0 : i32
    %c0_i32_0 = arith.constant 0 : i32
    return %c0_i32, %arg0 : i32, i32
  }
  func.func @transform_4(%arg0: i32, %arg1: i32) -> (i32, i32) {
    %c0_i32 = arith.constant 0 : i32
    %c0_i32_0 = arith.constant 0 : i32
    return %c0_i32, %arg0 : i32, i32
  }
}

module attributes {stable_mosaic.version = 11 : i64} {
  func.func @_mm_bias_act_kernel(%arg0: i32, %arg1: i32, %arg2: i32, %arg3: memref<8x128xbf16, #tpu.memory_space<vmem>>, %arg4: memref<128x256xbf16, #tpu.memory_space<vmem>>, %arg5: memref<1x256xf32, #tpu.memory_space<vmem>>, %arg6: memref<8x256xbf16, #tpu.memory_space<vmem>>, %arg7: memref<8x256xf32, #tpu.memory_space<vmem>>) attributes {dimension_semantics = [#tpu.dimension_semantics<parallel>, #tpu.dimension_semantics<parallel>, #tpu.dimension_semantics<arbitrary>], iteration_bounds = array<i64: 1, 1, 1>, scalar_prefetch = 0 : i64, scratch_operands = 1 : i64, tpu.core_type = #tpu.core_type<tc>, window_params = [{transform_indices = @transform_0, window_bounds = array<i64: 8, 128>}, {transform_indices = @transform_1, window_bounds = array<i64: 128, 256>}, {transform_indices = @transform_2, window_bounds = array<i64: 1, 256>}, {transform_indices = @transform_3, window_bounds = array<i64: 8, 256>}]} {
    %c0_i32 = arith.constant 0 : i32
    %0 = arith.cmpi eq, %arg2, %c0_i32 : i32
    %1 = arith.extui %0 : i1 to i32
    %c0_i32_0 = arith.constant 0 : i32
    %2 = arith.cmpi ne, %1, %c0_i32_0 : i32
    scf.if %2 {
      %cst_10 = arith.constant 0.000000e+00 : f32
      %12 = vector.broadcast %cst_10 : f32 to vector<8x256xf32>
      %c0_11 = arith.constant 0 : index
      %c0_12 = arith.constant 0 : index
      %13 = vector.load %arg7[%c0_11, %c0_12] : memref<8x256xf32, #tpu.memory_space<vmem>>, vector<8x256xf32>
      tpu.vector_store %arg7[%c0_11, %c0_12], %12 {strides = array<i32>} : memref<8x256xf32, #tpu.memory_space<vmem>>, vector<8x256xf32>,
    } else {
    }
    %c0 = arith.constant 0 : index
    %c0_1 = arith.constant 0 : index
    %3 = vector.load %arg7[%c0, %c0_1] : memref<8x256xf32, #tpu.memory_space<vmem>>, vector<8x256xf32>
    %c0_2 = arith.constant 0 : index
    %c0_3 = arith.constant 0 : index
    %4 = vector.load %arg3[%c0_2, %c0_3] : memref<8x128xbf16, #tpu.memory_space<vmem>>, vector<8x128xbf16>
    %c0_4 = arith.constant 0 : index
    %c0_5 = arith.constant 0 : index
    %5 = vector.load %arg4[%c0_4, %c0_5] : memref<128x256xbf16, #tpu.memory_space<vmem>>, vector<128x256xbf16>
    %cst = arith.constant dense<0.000000e+00> : vector<8x256xf32>
    %6 = tpu.matmul %4, %5, %cst {dimension_numbers = #tpu.dot_dimension_numbers<[1], [0], [0], [1], [0, 0, 1, 1], [], []>} : vector<8x128xbf16>, vector<128x256xbf16>, vector<8x256xf32> -> vector<8x256xf32>
    %7 = arith.addf %3, %6 : vector<8x256xf32>
    %c0_6 = arith.constant 0 : index
    %c0_7 = arith.constant 0 : index
    %8 = vector.load %arg7[%c0_6, %c0_7] : memref<8x256xf32, #tpu.memory_space<vmem>>, vector<8x256xf32>
    tpu.vector_store %arg7[%c0_6, %c0_7], %7 {strides = array<i32>} : memref<8x256xf32, #tpu.memory_space<vmem>>, vector<8x256xf32>,
    %c0_i32_8 = arith.constant 0 : i32
    %9 = arith.cmpi eq, %arg2, %c0_i32_8 : i32
    %10 = arith.extui %9 : i1 to i32
    %c0_i32_9 = arith.constant 0 : i32
    %11 = arith.cmpi ne, %10, %c0_i32_9 : i32
    scf.if %11 {
      %c0_10 = arith.constant 0 : index
      %c0_11 = arith.constant 0 : index
      %12 = vector.load %arg7[%c0_10, %c0_11] : memref<8x256xf32, #tpu.memory_space<vmem>>, vector<8x256xf32>
      %c0_12 = arith.constant 0 : index
      %c0_13 = arith.constant 0 : index
      %13 = vector.load %arg5[%c0_12, %c0_13] : memref<1x256xf32, #tpu.memory_space<vmem>>, vector<1x256xf32>
      %14 = vector.broadcast %13 : vector<1x256xf32> to vector<8x256xf32>
      %15 = arith.addf %12, %14 : vector<8x256xf32>
      %cst_14 = arith.constant 0.000000e+00 : f32
      %16 = vector.broadcast %cst_14 : f32 to vector<8x256xf32>
      %17 = arith.maximumf %15, %16 : vector<8x256xf32>
      %18 = arith.truncf %17 : vector<8x256xf32> to vector<8x256xbf16>
      %c0_15 = arith.constant 0 : index
      %c0_16 = arith.constant 0 : index
      %19 = vector.load %arg6[%c0_15, %c0_16] : memref<8x256xbf16, #tpu.memory_space<vmem>>, vector<8x256xbf16>
      tpu.vector_store %arg6[%c0_15, %c0_16], %18 {strides = array<i32>} : memref<8x256xbf16, #tpu.memory_space<vmem>>, vector<8x256xbf16>,
    } else {
    }
    return
  }
  func.func @transform_0(%arg0: i32, %arg1: i32, %arg2: i32) -> (i32, i32) {
    %c0_i32 = arith.constant 0 : i32
    return %arg0, %arg2 : i32, i32
  }
  func.func @transform_1(%arg0: i32, %arg1: i32, %arg2: i32) -> (i32, i32) {
    %c0_i32 = arith.constant 0 : i32
    return %arg2, %arg1 : i32, i32
  }
  func.func @transform_2(%arg0: i32, %arg1: i32, %arg2: i32) -> (i32, i32) {
    %c0_i32 = arith.constant 0 : i32
    %c0_i32_0 = arith.constant 0 : i32
    return %c0_i32, %arg1 : i32, i32
  }
  func.func @transform_3(%arg0: i32, %arg1: i32, %arg2: i32) -> (i32, i32) {
    %c0_i32 = arith.constant 0 : i32
    return %arg0, %arg1 : i32, i32
  }
}

module attributes {stable_mosaic.version = 11 : i64} {
  func.func @_mm_bias_act_kernel(%arg0: i32, %arg1: i32, %arg2: i32, %arg3: memref<8x256xbf16, #tpu.memory_space<vmem>>, %arg4: memref<256x512xbf16, #tpu.memory_space<vmem>>, %arg5: memref<1x512xf32, #tpu.memory_space<vmem>>, %arg6: memref<8x512xbf16, #tpu.memory_space<vmem>>, %arg7: memref<8x512xf32, #tpu.memory_space<vmem>>) attributes {dimension_semantics = [#tpu.dimension_semantics<parallel>, #tpu.dimension_semantics<parallel>, #tpu.dimension_semantics<arbitrary>], iteration_bounds = array<i64: 1, 1, 1>, scalar_prefetch = 0 : i64, scratch_operands = 1 : i64, tpu.core_type = #tpu.core_type<tc>, window_params = [{transform_indices = @transform_0, window_bounds = array<i64: 8, 256>}, {transform_indices = @transform_1, window_bounds = array<i64: 256, 512>}, {transform_indices = @transform_2, window_bounds = array<i64: 1, 512>}, {transform_indices = @transform_3, window_bounds = array<i64: 8, 512>}]} {
    %c0_i32 = arith.constant 0 : i32
    %0 = arith.cmpi eq, %arg2, %c0_i32 : i32
    %1 = arith.extui %0 : i1 to i32
    %c0_i32_0 = arith.constant 0 : i32
    %2 = arith.cmpi ne, %1, %c0_i32_0 : i32
    scf.if %2 {
      %cst_10 = arith.constant 0.000000e+00 : f32
      %12 = vector.broadcast %cst_10 : f32 to vector<8x512xf32>
      %c0_11 = arith.constant 0 : index
      %c0_12 = arith.constant 0 : index
      %13 = vector.load %arg7[%c0_11, %c0_12] : memref<8x512xf32, #tpu.memory_space<vmem>>, vector<8x512xf32>
      tpu.vector_store %arg7[%c0_11, %c0_12], %12 {strides = array<i32>} : memref<8x512xf32, #tpu.memory_space<vmem>>, vector<8x512xf32>,
    } else {
    }
    %c0 = arith.constant 0 : index
    %c0_1 = arith.constant 0 : index
    %3 = vector.load %arg7[%c0, %c0_1] : memref<8x512xf32, #tpu.memory_space<vmem>>, vector<8x512xf32>
    %c0_2 = arith.constant 0 : index
    %c0_3 = arith.constant 0 : index
    %4 = vector.load %arg3[%c0_2, %c0_3] : memref<8x256xbf16, #tpu.memory_space<vmem>>, vector<8x256xbf16>
    %c0_4 = arith.constant 0 : index
    %c0_5 = arith.constant 0 : index
    %5 = vector.load %arg4[%c0_4, %c0_5] : memref<256x512xbf16, #tpu.memory_space<vmem>>, vector<256x512xbf16>
    %cst = arith.constant dense<0.000000e+00> : vector<8x512xf32>
    %6 = tpu.matmul %4, %5, %cst {dimension_numbers = #tpu.dot_dimension_numbers<[1], [0], [0], [1], [0, 0, 1, 1], [], []>} : vector<8x256xbf16>, vector<256x512xbf16>, vector<8x512xf32> -> vector<8x512xf32>
    %7 = arith.addf %3, %6 : vector<8x512xf32>
    %c0_6 = arith.constant 0 : index
    %c0_7 = arith.constant 0 : index
    %8 = vector.load %arg7[%c0_6, %c0_7] : memref<8x512xf32, #tpu.memory_space<vmem>>, vector<8x512xf32>
    tpu.vector_store %arg7[%c0_6, %c0_7], %7 {strides = array<i32>} : memref<8x512xf32, #tpu.memory_space<vmem>>, vector<8x512xf32>,
    %c0_i32_8 = arith.constant 0 : i32
    %9 = arith.cmpi eq, %arg2, %c0_i32_8 : i32
    %10 = arith.extui %9 : i1 to i32
    %c0_i32_9 = arith.constant 0 : i32
    %11 = arith.cmpi ne, %10, %c0_i32_9 : i32
    scf.if %11 {
      %c0_10 = arith.constant 0 : index
      %c0_11 = arith.constant 0 : index
      %12 = vector.load %arg7[%c0_10, %c0_11] : memref<8x512xf32, #tpu.memory_space<vmem>>, vector<8x512xf32>
      %c0_12 = arith.constant 0 : index
      %c0_13 = arith.constant 0 : index
      %13 = vector.load %arg5[%c0_12, %c0_13] : memref<1x512xf32, #tpu.memory_space<vmem>>, vector<1x512xf32>
      %14 = vector.broadcast %13 : vector<1x512xf32> to vector<8x512xf32>
      %15 = arith.addf %12, %14 : vector<8x512xf32>
      %cst_14 = arith.constant 0.000000e+00 : f32
      %16 = vector.broadcast %cst_14 : f32 to vector<8x512xf32>
      %17 = arith.maximumf %15, %16 : vector<8x512xf32>
      %18 = arith.truncf %17 : vector<8x512xf32> to vector<8x512xbf16>
      %c0_15 = arith.constant 0 : index
      %c0_16 = arith.constant 0 : index
      %19 = vector.load %arg6[%c0_15, %c0_16] : memref<8x512xbf16, #tpu.memory_space<vmem>>, vector<8x512xbf16>
      tpu.vector_store %arg6[%c0_15, %c0_16], %18 {strides = array<i32>} : memref<8x512xbf16, #tpu.memory_space<vmem>>, vector<8x512xbf16>,
    } else {
    }
    return
  }
  func.func @transform_0(%arg0: i32, %arg1: i32, %arg2: i32) -> (i32, i32) {
    %c0_i32 = arith.constant 0 : i32
    return %arg0, %arg2 : i32, i32
  }
  func.func @transform_1(%arg0: i32, %arg1: i32, %arg2: i32) -> (i32, i32) {
    %c0_i32 = arith.constant 0 : i32
    return %arg2, %arg1 : i32, i32
  }
  func.func @transform_2(%arg0: i32, %arg1: i32, %arg2: i32) -> (i32, i32) {
    %c0_i32 = arith.constant 0 : i32
    %c0_i32_0 = arith.constant 0 : i32
    return %c0_i32, %arg1 : i32, i32
  }
  func.func @transform_3(%arg0: i32, %arg1: i32, %arg2: i32) -> (i32, i32) {
    %c0_i32 = arith.constant 0 : i32
    return %arg0, %arg1 : i32, i32
  }
}

module attributes {stable_mosaic.version = 11 : i64} {
  func.func @_mm_bn_act_kernel(%arg0: i32, %arg1: i32, %arg2: memref<32x384xbf16, #tpu.memory_space<vmem>>, %arg3: memref<384x128xbf16, #tpu.memory_space<vmem>>, %arg4: memref<1x128xf32, #tpu.memory_space<vmem>>, %arg5: memref<1x128xf32, #tpu.memory_space<vmem>>, %arg6: memref<32x128xbf16, #tpu.memory_space<vmem>>, %arg7: memref<32x128xf32, #tpu.memory_space<vmem>>) attributes {dimension_semantics = [#tpu.dimension_semantics<parallel>, #tpu.dimension_semantics<arbitrary>], iteration_bounds = array<i64: 1, 3>, scalar_prefetch = 0 : i64, scratch_operands = 1 : i64, tpu.core_type = #tpu.core_type<tc>, window_params = [{transform_indices = @transform_0, window_bounds = array<i64: 32, 384>}, {transform_indices = @transform_1, window_bounds = array<i64: 384, 128>}, {transform_indices = @transform_2, window_bounds = array<i64: 1, 128>}, {transform_indices = @transform_3, window_bounds = array<i64: 1, 128>}, {transform_indices = @transform_4, window_bounds = array<i64: 32, 128>}]} {
    %c0_i32 = arith.constant 0 : i32
    %0 = arith.cmpi eq, %arg1, %c0_i32 : i32
    %1 = arith.extui %0 : i1 to i32
    %c0_i32_0 = arith.constant 0 : i32
    %2 = arith.cmpi ne, %1, %c0_i32_0 : i32
    scf.if %2 {
      %cst_9 = arith.constant 0.000000e+00 : f32
      %12 = vector.broadcast %cst_9 : f32 to vector<32x128xf32>
      %c0_10 = arith.constant 0 : index
      %c0_11 = arith.constant 0 : index
      %13 = vector.load %arg7[%c0_10, %c0_11] : memref<32x128xf32, #tpu.memory_space<vmem>>, vector<32x128xf32>
      tpu.vector_store %arg7[%c0_10, %c0_11], %12 {strides = array<i32>} : memref<32x128xf32, #tpu.memory_space<vmem>>, vector<32x128xf32>,
    } else {
    }
    %c0 = arith.constant 0 : index
    %c0_1 = arith.constant 0 : index
    %3 = vector.load %arg7[%c0, %c0_1] : memref<32x128xf32, #tpu.memory_space<vmem>>, vector<32x128xf32>
    %c0_2 = arith.constant 0 : index
    %c0_3 = arith.constant 0 : index
    %4 = vector.load %arg2[%c0_2, %c0_3] : memref<32x384xbf16, #tpu.memory_space<vmem>>, vector<32x384xbf16>
    %c0_4 = arith.constant 0 : index
    %c0_5 = arith.constant 0 : index
    %5 = vector.load %arg3[%c0_4, %c0_5] : memref<384x128xbf16, #tpu.memory_space<vmem>>, vector<384x128xbf16>
    %cst = arith.constant dense<0.000000e+00> : vector<32x128xf32>
    %6 = tpu.matmul %4, %5, %cst {dimension_numbers = #tpu.dot_dimension_numbers<[1], [0], [0], [1], [0, 0, 1, 1], [], []>} : vector<32x384xbf16>, vector<384x128xbf16>, vector<32x128xf32> -> vector<32x128xf32>
    %7 = arith.addf %3, %6 : vector<32x128xf32>
    %c0_6 = arith.constant 0 : index
    %c0_7 = arith.constant 0 : index
    %8 = vector.load %arg7[%c0_6, %c0_7] : memref<32x128xf32, #tpu.memory_space<vmem>>, vector<32x128xf32>
    tpu.vector_store %arg7[%c0_6, %c0_7], %7 {strides = array<i32>} : memref<32x128xf32, #tpu.memory_space<vmem>>, vector<32x128xf32>,
    %c2_i32 = arith.constant 2 : i32
    %9 = arith.cmpi eq, %arg1, %c2_i32 : i32
    %10 = arith.extui %9 : i1 to i32
    %c0_i32_8 = arith.constant 0 : i32
    %11 = arith.cmpi ne, %10, %c0_i32_8 : i32
    scf.if %11 {
      %c0_9 = arith.constant 0 : index
      %c0_10 = arith.constant 0 : index
      %12 = vector.load %arg7[%c0_9, %c0_10] : memref<32x128xf32, #tpu.memory_space<vmem>>, vector<32x128xf32>
      %cst_11 = arith.constant dense<0.000000e+00> : vector<128xf32>
      %13 = vector.multi_reduction <add>, %12, %cst_11 [0] : vector<32x128xf32> to vector<128xf32>
      %14 = vector.shape_cast %13 : vector<128xf32> to vector<1x128xf32>
      %cst_12 = arith.constant 3.125000e-02 : f32
      %15 = vector.broadcast %cst_12 : f32 to vector<1x128xf32>
      %16 = arith.mulf %14, %15 : vector<1x128xf32>
      %17 = vector.broadcast %16 : vector<1x128xf32> to vector<32x128xf32>
      %18 = arith.subf %12, %17 : vector<32x128xf32>
      %19 = arith.mulf %18, %18 : vector<32x128xf32>
      %cst_13 = arith.constant dense<0.000000e+00> : vector<128xf32>
      %20 = vector.multi_reduction <add>, %19, %cst_13 [0] : vector<32x128xf32> to vector<128xf32>
      %21 = vector.shape_cast %20 : vector<128xf32> to vector<1x128xf32>
      %cst_14 = arith.constant 3.125000e-02 : f32
      %22 = vector.broadcast %cst_14 : f32 to vector<1x128xf32>
      %23 = arith.mulf %21, %22 : vector<1x128xf32>
      %c0_15 = arith.constant 0 : index
      %c0_16 = arith.constant 0 : index
      %24 = vector.load %arg4[%c0_15, %c0_16] : memref<1x128xf32, #tpu.memory_space<vmem>>, vector<1x128xf32>
      %cst_17 = arith.constant 9.99999974E-6 : f32
      %25 = vector.broadcast %cst_17 : f32 to vector<1x128xf32>
      %26 = arith.addf %23, %25 : vector<1x128xf32>
      %27 = math.rsqrt %26 : vector<1x128xf32>
      %28 = arith.mulf %24, %27 : vector<1x128xf32>
      %c0_18 = arith.constant 0 : index
      %c0_19 = arith.constant 0 : index
      %29 = vector.load %arg5[%c0_18, %c0_19] : memref<1x128xf32, #tpu.memory_space<vmem>>, vector<1x128xf32>
      %30 = arith.mulf %16, %28 : vector<1x128xf32>
      %31 = arith.subf %29, %30 : vector<1x128xf32>
      %32 = vector.broadcast %28 : vector<1x128xf32> to vector<32x128xf32>
      %33 = arith.mulf %12, %32 : vector<32x128xf32>
      %34 = vector.broadcast %31 : vector<1x128xf32> to vector<32x128xf32>
      %35 = arith.addf %33, %34 : vector<32x128xf32>
      %cst_20 = arith.constant 0.000000e+00 : f32
      %36 = vector.broadcast %cst_20 : f32 to vector<32x128xf32>
      %37 = arith.maximumf %35, %36 : vector<32x128xf32>
      %38 = arith.truncf %37 : vector<32x128xf32> to vector<32x128xbf16>
      %c0_21 = arith.constant 0 : index
      %c0_22 = arith.constant 0 : index
      %39 = vector.load %arg6[%c0_21, %c0_22] : memref<32x128xbf16, #tpu.memory_space<vmem>>, vector<32x128xbf16>
      tpu.vector_store %arg6[%c0_21, %c0_22], %38 {strides = array<i32>} : memref<32x128xbf16, #tpu.memory_space<vmem>>, vector<32x128xbf16>,
    } else {
    }
    return
  }
  func.func @transform_0(%arg0: i32, %arg1: i32) -> (i32, i32) {
    %c0_i32 = arith.constant 0 : i32
    %c0_i32_0 = arith.constant 0 : i32
    return %c0_i32, %arg1 : i32, i32
  }
  func.func @transform_1(%arg0: i32, %arg1: i32) -> (i32, i32) {
    %c0_i32 = arith.constant 0 : i32
    return %arg1, %arg0 : i32, i32
  }
  func.func @transform_2(%arg0: i32, %arg1: i32) -> (i32, i32) {
    %c0_i32 = arith.constant 0 : i32
    %c0_i32_0 = arith.constant 0 : i32
    return %c0_i32, %arg0 : i32, i32
  }
  func.func @transform_3(%arg0: i32, %arg1: i32) -> (i32, i32) {
    %c0_i32 = arith.constant 0 : i32
    %c0_i32_0 = arith.constant 0 : i32
    return %c0_i32, %arg0 : i32, i32
  }
  func.func @transform_4(%arg0: i32, %arg1: i32) -> (i32, i32) {
    %c0_i32 = arith.constant 0 : i32
    %c0_i32_0 = arith.constant 0 : i32
    return %c0_i32, %arg0 : i32, i32
  }
}

module attributes {stable_mosaic.version = 11 : i64} {
  func.func @_mm_bn_act_kernel(%arg0: i32, %arg1: i32, %arg2: memref<128x576xbf16, #tpu.memory_space<vmem>>, %arg3: memref<576x128xbf16, #tpu.memory_space<vmem>>, %arg4: memref<1x128xf32, #tpu.memory_space<vmem>>, %arg5: memref<1x128xf32, #tpu.memory_space<vmem>>, %arg6: memref<128x128xbf16, #tpu.memory_space<vmem>>, %arg7: memref<128x128xf32, #tpu.memory_space<vmem>>) attributes {dimension_semantics = [#tpu.dimension_semantics<parallel>, #tpu.dimension_semantics<arbitrary>], iteration_bounds = array<i64: 1, 1>, scalar_prefetch = 0 : i64, scratch_operands = 1 : i64, tpu.core_type = #tpu.core_type<tc>, window_params = [{transform_indices = @transform_0, window_bounds = array<i64: 128, 576>}, {transform_indices = @transform_1, window_bounds = array<i64: 576, 128>}, {transform_indices = @transform_2, window_bounds = array<i64: 1, 128>}, {transform_indices = @transform_3, window_bounds = array<i64: 1, 128>}, {transform_indices = @transform_4, window_bounds = array<i64: 128, 128>}]} {
    %c0_i32 = arith.constant 0 : i32
    %0 = arith.cmpi eq, %arg1, %c0_i32 : i32
    %1 = arith.extui %0 : i1 to i32
    %c0_i32_0 = arith.constant 0 : i32
    %2 = arith.cmpi ne, %1, %c0_i32_0 : i32
    scf.if %2 {
      %cst_10 = arith.constant 0.000000e+00 : f32
      %12 = vector.broadcast %cst_10 : f32 to vector<128x128xf32>
      %c0_11 = arith.constant 0 : index
      %c0_12 = arith.constant 0 : index
      %13 = vector.load %arg7[%c0_11, %c0_12] : memref<128x128xf32, #tpu.memory_space<vmem>>, vector<128x128xf32>
      tpu.vector_store %arg7[%c0_11, %c0_12], %12 {strides = array<i32>} : memref<128x128xf32, #tpu.memory_space<vmem>>, vector<128x128xf32>,
    } else {
    }
    %c0 = arith.constant 0 : index
    %c0_1 = arith.constant 0 : index
    %3 = vector.load %arg7[%c0, %c0_1] : memref<128x128xf32, #tpu.memory_space<vmem>>, vector<128x128xf32>
    %c0_2 = arith.constant 0 : index
    %c0_3 = arith.constant 0 : index
    %4 = vector.load %arg2[%c0_2, %c0_3] : memref<128x576xbf16, #tpu.memory_space<vmem>>, vector<128x576xbf16>
    %c0_4 = arith.constant 0 : index
    %c0_5 = arith.constant 0 : index
    %5 = vector.load %arg3[%c0_4, %c0_5] : memref<576x128xbf16, #tpu.memory_space<vmem>>, vector<576x128xbf16>
    %cst = arith.constant dense<0.000000e+00> : vector<128x128xf32>
    %6 = tpu.matmul %4, %5, %cst {dimension_numbers = #tpu.dot_dimension_numbers<[1], [0], [0], [1], [0, 0, 1, 1], [], []>} : vector<128x576xbf16>, vector<576x128xbf16>, vector<128x128xf32> -> vector<128x128xf32>
    %7 = arith.addf %3, %6 : vector<128x128xf32>
    %c0_6 = arith.constant 0 : index
    %c0_7 = arith.constant 0 : index
    %8 = vector.load %arg7[%c0_6, %c0_7] : memref<128x128xf32, #tpu.memory_space<vmem>>, vector<128x128xf32>
    tpu.vector_store %arg7[%c0_6, %c0_7], %7 {strides = array<i32>} : memref<128x128xf32, #tpu.memory_space<vmem>>, vector<128x128xf32>,
    %c0_i32_8 = arith.constant 0 : i32
    %9 = arith.cmpi eq, %arg1, %c0_i32_8 : i32
    %10 = arith.extui %9 : i1 to i32
    %c0_i32_9 = arith.constant 0 : i32
    %11 = arith.cmpi ne, %10, %c0_i32_9 : i32
    scf.if %11 {
      %c0_10 = arith.constant 0 : index
      %c0_11 = arith.constant 0 : index
      %12 = vector.load %arg7[%c0_10, %c0_11] : memref<128x128xf32, #tpu.memory_space<vmem>>, vector<128x128xf32>
      %cst_12 = arith.constant dense<0.000000e+00> : vector<128xf32>
      %13 = vector.multi_reduction <add>, %12, %cst_12 [0] : vector<128x128xf32> to vector<128xf32>
      %14 = vector.shape_cast %13 : vector<128xf32> to vector<1x128xf32>
      %cst_13 = arith.constant 7.812500e-03 : f32
      %15 = vector.broadcast %cst_13 : f32 to vector<1x128xf32>
      %16 = arith.mulf %14, %15 : vector<1x128xf32>
      %17 = vector.broadcast %16 : vector<1x128xf32> to vector<128x128xf32>
      %18 = arith.subf %12, %17 : vector<128x128xf32>
      %19 = arith.mulf %18, %18 : vector<128x128xf32>
      %cst_14 = arith.constant dense<0.000000e+00> : vector<128xf32>
      %20 = vector.multi_reduction <add>, %19, %cst_14 [0] : vector<128x128xf32> to vector<128xf32>
      %21 = vector.shape_cast %20 : vector<128xf32> to vector<1x128xf32>
      %cst_15 = arith.constant 7.812500e-03 : f32
      %22 = vector.broadcast %cst_15 : f32 to vector<1x128xf32>
      %23 = arith.mulf %21, %22 : vector<1x128xf32>
      %c0_16 = arith.constant 0 : index
      %c0_17 = arith.constant 0 : index
      %24 = vector.load %arg4[%c0_16, %c0_17] : memref<1x128xf32, #tpu.memory_space<vmem>>, vector<1x128xf32>
      %cst_18 = arith.constant 9.99999974E-6 : f32
      %25 = vector.broadcast %cst_18 : f32 to vector<1x128xf32>
      %26 = arith.addf %23, %25 : vector<1x128xf32>
      %27 = math.rsqrt %26 : vector<1x128xf32>
      %28 = arith.mulf %24, %27 : vector<1x128xf32>
      %c0_19 = arith.constant 0 : index
      %c0_20 = arith.constant 0 : index
      %29 = vector.load %arg5[%c0_19, %c0_20] : memref<1x128xf32, #tpu.memory_space<vmem>>, vector<1x128xf32>
      %30 = arith.mulf %16, %28 : vector<1x128xf32>
      %31 = arith.subf %29, %30 : vector<1x128xf32>
      %32 = vector.broadcast %28 : vector<1x128xf32> to vector<128x128xf32>
      %33 = arith.mulf %12, %32 : vector<128x128xf32>
      %34 = vector.broadcast %31 : vector<1x128xf32> to vector<128x128xf32>
      %35 = arith.addf %33, %34 : vector<128x128xf32>
      %cst_21 = arith.constant 0.000000e+00 : f32
      %36 = vector.broadcast %cst_21 : f32 to vector<128x128xf32>
      %37 = arith.maximumf %35, %36 : vector<128x128xf32>
      %38 = arith.truncf %37 : vector<128x128xf32> to vector<128x128xbf16>
      %c0_22 = arith.constant 0 : index
      %c0_23 = arith.constant 0 : index
      %39 = vector.load %arg6[%c0_22, %c0_23] : memref<128x128xbf16, #tpu.memory_space<vmem>>, vector<128x128xbf16>
      tpu.vector_store %arg6[%c0_22, %c0_23], %38 {strides = array<i32>} : memref<128x128xbf16, #tpu.memory_space<vmem>>, vector<128x128xbf16>,
    } else {
    }
    return
  }
  func.func @transform_0(%arg0: i32, %arg1: i32) -> (i32, i32) {
    %c0_i32 = arith.constant 0 : i32
    %c0_i32_0 = arith.constant 0 : i32
    return %c0_i32, %arg1 : i32, i32
  }
  func.func @transform_1(%arg0: i32, %arg1: i32) -> (i32, i32) {
    %c0_i32 = arith.constant 0 : i32
    return %arg1, %arg0 : i32, i32
  }
  func.func @transform_2(%arg0: i32, %arg1: i32) -> (i32, i32) {
    %c0_i32 = arith.constant 0 : i32
    %c0_i32_0 = arith.constant 0 : i32
    return %c0_i32, %arg0 : i32, i32
  }
  func.func @transform_3(%arg0: i32, %arg1: i32) -> (i32, i32) {
    %c0_i32 = arith.constant 0 : i32
    %c0_i32_0 = arith.constant 0 : i32
    return %c0_i32, %arg0 : i32, i32
  }
  func.func @transform_4(%arg0: i32, %arg1: i32) -> (i32, i32) {
    %c0_i32 = arith.constant 0 : i32
    %c0_i32_0 = arith.constant 0 : i32
    return %c0_i32, %arg0 : i32, i32
  }
}

module attributes {stable_mosaic.version = 11 : i64} {
  func.func @_mm_bias_act_kernel(%arg0: i32, %arg1: i32, %arg2: i32, %arg3: memref<256x288xbf16, #tpu.memory_space<vmem>>, %arg4: memref<288x128xbf16, #tpu.memory_space<vmem>>, %arg5: memref<1x128xf32, #tpu.memory_space<vmem>>, %arg6: memref<256x128xf32, #tpu.memory_space<vmem>>, %arg7: memref<256x128xf32, #tpu.memory_space<vmem>>) attributes {dimension_semantics = [#tpu.dimension_semantics<parallel>, #tpu.dimension_semantics<parallel>, #tpu.dimension_semantics<arbitrary>], iteration_bounds = array<i64: 2, 1, 1>, scalar_prefetch = 0 : i64, scratch_operands = 1 : i64, tpu.core_type = #tpu.core_type<tc>, window_params = [{transform_indices = @transform_0, window_bounds = array<i64: 256, 288>}, {transform_indices = @transform_1, window_bounds = array<i64: 288, 128>}, {transform_indices = @transform_2, window_bounds = array<i64: 1, 128>}, {transform_indices = @transform_3, window_bounds = array<i64: 256, 128>}]} {
    %c0_i32 = arith.constant 0 : i32
    %0 = arith.cmpi eq, %arg2, %c0_i32 : i32
    %1 = arith.extui %0 : i1 to i32
    %c0_i32_0 = arith.constant 0 : i32
    %2 = arith.cmpi ne, %1, %c0_i32_0 : i32
    scf.if %2 {
      %cst_10 = arith.constant 0.000000e+00 : f32
      %12 = vector.broadcast %cst_10 : f32 to vector<256x128xf32>
      %c0_11 = arith.constant 0 : index
      %c0_12 = arith.constant 0 : index
      %13 = vector.load %arg7[%c0_11, %c0_12] : memref<256x128xf32, #tpu.memory_space<vmem>>, vector<256x128xf32>
      tpu.vector_store %arg7[%c0_11, %c0_12], %12 {strides = array<i32>} : memref<256x128xf32, #tpu.memory_space<vmem>>, vector<256x128xf32>,
    } else {
    }
    %c0 = arith.constant 0 : index
    %c0_1 = arith.constant 0 : index
    %3 = vector.load %arg7[%c0, %c0_1] : memref<256x128xf32, #tpu.memory_space<vmem>>, vector<256x128xf32>
    %c0_2 = arith.constant 0 : index
    %c0_3 = arith.constant 0 : index
    %4 = vector.load %arg3[%c0_2, %c0_3] : memref<256x288xbf16, #tpu.memory_space<vmem>>, vector<256x288xbf16>
    %c0_4 = arith.constant 0 : index
    %c0_5 = arith.constant 0 : index
    %5 = vector.load %arg4[%c0_4, %c0_5] : memref<288x128xbf16, #tpu.memory_space<vmem>>, vector<288x128xbf16>
    %cst = arith.constant dense<0.000000e+00> : vector<256x128xf32>
    %6 = tpu.matmul %4, %5, %cst {dimension_numbers = #tpu.dot_dimension_numbers<[1], [0], [0], [1], [0, 0, 1, 1], [], []>} : vector<256x288xbf16>, vector<288x128xbf16>, vector<256x128xf32> -> vector<256x128xf32>
    %7 = arith.addf %3, %6 : vector<256x128xf32>
    %c0_6 = arith.constant 0 : index
    %c0_7 = arith.constant 0 : index
    %8 = vector.load %arg7[%c0_6, %c0_7] : memref<256x128xf32, #tpu.memory_space<vmem>>, vector<256x128xf32>
    tpu.vector_store %arg7[%c0_6, %c0_7], %7 {strides = array<i32>} : memref<256x128xf32, #tpu.memory_space<vmem>>, vector<256x128xf32>,
    %c0_i32_8 = arith.constant 0 : i32
    %9 = arith.cmpi eq, %arg2, %c0_i32_8 : i32
    %10 = arith.extui %9 : i1 to i32
    %c0_i32_9 = arith.constant 0 : i32
    %11 = arith.cmpi ne, %10, %c0_i32_9 : i32
    scf.if %11 {
      %c0_10 = arith.constant 0 : index
      %c0_11 = arith.constant 0 : index
      %12 = vector.load %arg7[%c0_10, %c0_11] : memref<256x128xf32, #tpu.memory_space<vmem>>, vector<256x128xf32>
      %c0_12 = arith.constant 0 : index
      %c0_13 = arith.constant 0 : index
      %13 = vector.load %arg5[%c0_12, %c0_13] : memref<1x128xf32, #tpu.memory_space<vmem>>, vector<1x128xf32>
      %14 = vector.broadcast %13 : vector<1x128xf32> to vector<256x128xf32>
      %15 = arith.addf %12, %14 : vector<256x128xf32>
      %16 = math.tanh %15 : vector<256x128xf32>
      %c0_14 = arith.constant 0 : index
      %c0_15 = arith.constant 0 : index
      %17 = vector.load %arg6[%c0_14, %c0_15] : memref<256x128xf32, #tpu.memory_space<vmem>>, vector<256x128xf32>
      tpu.vector_store %arg6[%c0_14, %c0_15], %16 {strides = array<i32>} : memref<256x128xf32, #tpu.memory_space<vmem>>, vector<256x128xf32>,
    } else {
    }
    return
  }
  func.func @transform_0(%arg0: i32, %arg1: i32, %arg2: i32) -> (i32, i32) {
    %c0_i32 = arith.constant 0 : i32
    return %arg0, %arg2 : i32, i32
  }
  func.func @transform_1(%arg0: i32, %arg1: i32, %arg2: i32) -> (i32, i32) {
    %c0_i32 = arith.constant 0 : i32
    return %arg2, %arg1 : i32, i32
  }
  func.func @transform_2(%arg0: i32, %arg1: i32, %arg2: i32) -> (i32, i32) {
    %c0_i32 = arith.constant 0 : i32
    %c0_i32_0 = arith.constant 0 : i32
    return %c0_i32, %arg1 : i32, i32
  }
  func.func @transform_3(%arg0: i32, %arg1: i32, %arg2: i32) -> (i32, i32) {
    %c0_i32 = arith.constant 0 : i32
    return %arg0, %arg1 : i32, i32
  }
}

</mosaic_0001>

<bundles_post_ra>
// kernel: vade_forward.10
= control target key start
LH: loop header
LB: loop body
LE: loop exit
PB: predicated region body
PF: predicated region fallthrough
CT: control target
= control target key end

     0   :  { %vm130_vm0 = vcmask 293888   ;;  %vm155_vm1 = vcmask 1041408   ;;  %s881_s1 = inlined_call_operand.vmem [shape: bf16[36,128], index: 1, kind: input, shape index: {}]   ;;  %s882_s0 = inlined_call_operand.vmem [shape: bf16[128,36], index: 0, kind: input, shape index: {}]   ;;  %s883_s2 = inlined_call_operand.vmem [shape: f32[1,128], index: 2, kind: input, shape index: {}]   ;;  %s884_s3 = inlined_call_operand.vmem [shape: f32[1,128], index: 3, kind: input, shape index: {}]   ;;  %s885_s4 = inlined_call_operand.vmem [shape: bf16[128,128], index: 4, kind: output, shape index: {}]  }
   0x1   :  { %v673_v0 = vld [vmem:[%s881_s1] sm:$0xff]   ;;  %v674_v1 = vld [vmem:[%s881_s1 + $0x8] sm:$0xff]   ;;  %v675_v2 = vld [vmem:[%s881_s1 + $0x10] ss:$0 sps:$4 sm:$0x33]  }
   0x2   :  { %643 = vmatprep.subr.bf16.mxu0 %v673_v0  ;;  %v676_v3 = vld [vmem:[%s882_s0] sm:$0xff]   ;;  %665 = vmatprep.subr.bf16.mxu1 %v673_v0  ;;  %v157_v5 = vsel %vm155_vm1, %v675_v2, 0  ;;  %v677_v6 = vld [vmem:[%s882_s0 + $0x8] sm:$0xff]   ;;  %v678_v8 = vld [vmem:[%s882_s0 + $0x10] sm:$0xff]  }
   0x3   :  { %644 = vmatpush3.bf16.msra.mxu0 %v673_v0  ;;  %668 = vmatpush3.bf16.msra.mxu1 %v673_v0  ;;  %v680_v4 = vld [vmem:[%s882_s0 + $0x20] sm:$0xff]   ;;  %v681_v7 = vld [vmem:[%s882_s0 + $0x28] sm:$0xff]   ;;  %v682_v9 = vld [vmem:[%s882_s0 + $0x30] sm:$0xff]  }
   0x4   :  { %645 = vmatprep.subr.bf16.mxu0 %v674_v1  ;;  %649 = vmatprep.mubr.msk.bf16.mxu0 %vm130_vm0, %v676_v3  ;;  %v679_v10 = vld [vmem:[%s882_s0 + $0x18] sm:$0xff]  }
   0x5   :  { %666 = vmatprep.subr.bf16.mxu1 %v674_v1  ;;  %657 = vmatprep.mubr.msk.bf16.mxu1 %vm130_vm0, %v680_v4  ;;  %v683_v11 = vld [vmem:[%s882_s0 + $0x38] sm:$0xff]  }
   0x7   :  { %646 = vmatpush3.bf16.msra.mxu0 %v674_v1  ;;  %669 = vmatpush3.bf16.msra.mxu1 %v674_v1 }
   0x8   :  { %671 = vmatprep.subr.msk.bf16.mxu0 %vm155_vm1, %v675_v2  ;;  %672 = vmatprep.subr.msk.bf16.mxu1 %vm155_vm1, %v675_v2 }
   0xb   :  { %648 = vmatpush3.bf16.msra.mxu0 %v157_v5  ;;  %670 = vmatpush3.bf16.msra.mxu1 %v157_v5 }
   0xe   :  { %650 = vmatmul.mubr.msk.bf16.vlgmr.msra.gmra.mrb[0].mxu0 %vm130_vm0, %v677_v6  ;;  %658 = vmatmul.mubr.msk.bf16.vlgmr.msra.gmra.mrb[0].mxu1 %vm130_vm0, %v681_v7 }
   0xf   :  { %653 = vmatprep.mubr.msk.bf16.mxu0 %vm130_vm0, %v678_v8  ;;  %661 = vmatprep.mubr.msk.bf16.mxu1 %vm130_vm0, %v682_v9 }
  0x16   :  { %654 = vmatmul.mubr.msk.bf16.gmra.mrb[4].mxu0 %vm130_vm0, %v679_v10  ;;  %662 = vmatmul.mubr.msk.bf16.gmra.mrb[4].mxu1 %vm130_vm0, %v683_v11 }
  0xe1   :  { %v752_v12 = vpop.f32.mrb[0].mxu0  ;;  %v754_v13 = vpop.f32.mrb[0].mxu1 }
  0xe2   :  { %v756_v14 = vpop.f32.mrb[1].mxu0  ;;  %v758_v15 = vpop.f32.mrb[1].mxu1 }
  0xe3   :  { %v760_v16 = vpop.f32.mrb[2].mxu0  ;;  %v762_v17 = vpop.f32.mrb[2].mxu1 }
  0xe4   :  { %v764_v18 = vpop.f32.mrb[3].mxu0  ;;  %v766_v19 = vpop.f32.mrb[3].mxu1 }
  0xe5   :  { %v307_v20 = vadd.f32 %v764_v18, %v756_v14 }
  0xe7   :  { %v308_v21 = vadd.f32 %v752_v12, %v307_v20 }
  0xe9   :  { %v771_v22 = vpop.f32.mrb[4].mxu0  ;;  %v309_v23 = vadd.f32 %v760_v16, %v308_v21  ;;  %v774_v24 = vpop.f32.mrb[4].mxu1 }
  0xea   :  { %v776_v25 = vpop.f32.mrb[5].mxu0  ;;  %v778_v26 = vpop.f32.mrb[5].mxu1 }
  0xeb   :  { %v310_v27 = vadd.f32 %v309_v23, %v776_v25  ;;  %v781_v28 = vpop.f32.mrb[6].mxu0  ;;  %v783_v29 = vpop.f32.mrb[6].mxu1 }
  0xec   :  { %v785_v30 = vpop.f32.mrb[7].mxu0  ;;  %v787_v31 = vpop.f32.mrb[7].mxu1 }
  0xed   :  { %v311_v32 = vadd.f32 %v310_v27, %v785_v30 }
  0xef   :  { %v312_v33 = vadd.f32 %v771_v22, %v311_v32 }
  0xf1   :  { %v313_v34 = vadd.f32 %v781_v28, %v312_v33 }
  0xf3   :  { %v314_v35 = vadd.f32 %v313_v34, %v758_v15 }
  0xf5   :  { %v315_v36 = vadd.f32 %v314_v35, %v766_v19 }
  0xf7   :  { %v316_v37 = vadd.f32 %v754_v13, %v315_v36 }
  0xf9   :  { %v317_v38 = vadd.f32 %v762_v17, %v316_v37 }
  0xfb   :  { %v318_v39 = vadd.f32 %v317_v38, %v778_v26 }
  0xfd   :  { %v319_v40 = vadd.f32 %v318_v39, %v787_v31 }
  0xff   :  { %v320_v41 = vadd.f32 %v774_v24, %v319_v40 }
 0x101   :  { %v321_v42 = vadd.f32 %v783_v29, %v320_v41 }
 0x103   :  { %v322_v43 = vrot.slane %v321_v42, 4 }
 0x105   :  { %v323_v44 = vadd.f32 %v322_v43, %v321_v42 }
 0x107   :  { %v324_v45 = vrot.slane %v323_v44, 2 }
 0x109   :  { %v325_v46 = vadd.f32 %v324_v45, %v323_v44 }
 0x10b   :  { %v326_v47 = vrot.slane %v325_v46, 1 }
 0x10d   :  { %v327_v48 = vadd.f32 %v326_v47, %v325_v46 }
 0x10f   :  { %v800_v49 = vmul.f32 0.0078125, %v327_v48 }
 0x111   :  { %v329_v50 = vsub.f32 %v756_v14, %v800_v49  ;;  %v330_v51 = vsub.f32 %v764_v18, %v800_v49  ;;  %v331_v52 = vsub.f32 %v752_v12, %v800_v49  ;;  %v332_v53 = vsub.f32 %v760_v16, %v800_v49 }
 0x112   :  { %v333_v54 = vsub.f32 %v776_v25, %v800_v49  ;;  %v334_v55 = vsub.f32 %v785_v30, %v800_v49  ;;  %v335_v56 = vsub.f32 %v771_v22, %v800_v49  ;;  %v336_v57 = vsub.f32 %v781_v28, %v800_v49 }
 0x113   :  { %v337_v58 = vsub.f32 %v758_v15, %v800_v49  ;;  %v338_v59 = vsub.f32 %v766_v19, %v800_v49  ;;  %v339_v60 = vsub.f32 %v754_v13, %v800_v49  ;;  %v340_v61 = vsub.f32 %v762_v17, %v800_v49 }
 0x114   :  { %v341_v62 = vsub.f32 %v778_v26, %v800_v49  ;;  %v342_v63 = vsub.f32 %v787_v31, %v800_v49  ;;  %v343_v0 = vsub.f32 %v774_v24, %v800_v49  ;;  %v344_v1 = vsub.f32 %v783_v29, %v800_v49 }
 0x115   :  { %v345_v2 = vmul.f32 %v329_v50, %v329_v50  ;;  %v346_v3 = vmul.f32 %v330_v51, %v330_v51  ;;  %v347_v4 = vmul.f32 %v331_v52, %v331_v52  ;;  %v348_v6 = vmul.f32 %v332_v53, %v332_v53 }
 0x116   :  { %v349_v8 = vmul.f32 %v333_v54, %v333_v54  ;;  %v350_v10 = vmul.f32 %v334_v55, %v334_v55  ;;  %v351_v20 = vmul.f32 %v335_v56, %v335_v56  ;;  %v352_v23 = vmul.f32 %v336_v57, %v336_v57 }
 0x117   :  { %v361_v5 = vadd.f32 %v346_v3, %v345_v2  ;;  %v353_v32 = vmul.f32 %v337_v58, %v337_v58  ;;  %v354_v34 = vmul.f32 %v338_v59, %v338_v59  ;;  %v355_v36 = vmul.f32 %v339_v60, %v339_v60  ;;  %v383_v60 = vld [vmem:[%s883_s2] sm:$0x1] }
 0x118   :  { %v356_v38 = vmul.f32 %v340_v61, %v340_v61  ;;  %v357_v40 = vmul.f32 %v341_v62, %v341_v62  ;;  %v358_v42 = vmul.f32 %v342_v63, %v342_v63  ;;  %v359_v44 = vmul.f32 %v343_v0, %v343_v0  ;;  %v387_v0 = vld [vmem:[%s884_s3] sm:$0x1] }
 0x119   :  { %v362_v7 = vadd.f32 %v361_v5, %v347_v4  ;;  %v360_v46 = vmul.f32 %v344_v1, %v344_v1  ;;  %v391_v58 = vlaneseq }
 0x11b   :  { %v363_v9 = vadd.f32 %v362_v7, %v348_v6  ;;  %v392_v59 = vshrl.u32 %v391_v58, 7 }
 0x11d   :  { %v364_v11 = vadd.f32 %v363_v9, %v349_v8  ;;  %v393_v61 = vsub.s32 0, %v392_v59 }
 0x11f   :  { %v365_v21 = vadd.f32 %v364_v11, %v350_v10 }
 0x121   :  { %v366_v27 = vadd.f32 %v365_v21, %v351_v20 }
 0x123   :  { %v367_v33 = vadd.f32 %v366_v27, %v352_v23 }
 0x125   :  { %v368_v35 = vadd.f32 %v367_v33, %v353_v32 }
 0x127   :  { %v369_v37 = vadd.f32 %v368_v35, %v354_v34 }
 0x129   :  { %v370_v39 = vadd.f32 %v369_v37, %v355_v36 }
 0x12b   :  { %v371_v41 = vadd.f32 %v370_v39, %v356_v38 }
 0x12d   :  { %v372_v43 = vadd.f32 %v371_v41, %v357_v40 }
 0x12f   :  { %v373_v45 = vadd.f32 %v372_v43, %v358_v42 }
 0x131   :  { %v374_v47 = vadd.f32 %v373_v45, %v359_v44 }
 0x133   :  { %v375_v48 = vadd.f32 %v374_v47, %v360_v46 }
 0x135   :  { %v376_v50 = vrot.slane %v375_v48, 4 }
 0x137   :  { %v377_v51 = vadd.f32 %v376_v50, %v375_v48 }
 0x139   :  { %v378_v52 = vrot.slane %v377_v51, 2 }
 0x13b   :  { %v379_v53 = vadd.f32 %v378_v52, %v377_v51 }
 0x13d   :  { %v380_v54 = vrot.slane %v379_v53, 1 }
 0x13f   :  { %v381_v55 = vadd.f32 %v380_v54, %v379_v53 }
 0x141   :  { %v382_v56 = vmul.f32 0.0078125, %v381_v55 }
 0x143   :  { %v384_v57 = vadd.f32 1e-05, %v382_v56 }
 0x145   :  { %684 = vrsqrt.f32 %v384_v57 }
 0x14f   :  { %v685_v62 = vpop.eup %684 }
 0x150   :  { %v386_v63 = vmul.f32 %v685_v62, %v383_v60 }
 0x152   :  { %v388_v1 = vmul.f32 %v386_v63, %v800_v49  ;;  %v394_v2 = vrot.slane %v386_v63, %v393_v61 }
 0x154   :  { %v389_v3 = vsub.f32 %v387_v0, %v388_v1  ;;  %v396_v4 = vmul.f32 %v394_v2, %v756_v14  ;;  %v397_v5 = vmul.f32 %v394_v2, %v764_v18  ;;  %v398_v6 = vmul.f32 %v752_v12, %v394_v2 }
 0x155   :  { %v399_v7 = vmul.f32 %v760_v16, %v394_v2  ;;  %v400_v8 = vmul.f32 %v394_v2, %v776_v25  ;;  %v401_v9 = vmul.f32 %v394_v2, %v785_v30  ;;  %v402_v10 = vmul.f32 %v771_v22, %v394_v2 }
 0x156   :  { %v403_v11 = vmul.f32 %v781_v28, %v394_v2  ;;  %v404_v49 = vmul.f32 %v394_v2, %v758_v15  ;;  %v405_v20 = vmul.f32 %v394_v2, %v766_v19  ;;  %v406_v14 = vmul.f32 %v754_v13, %v394_v2 }
 0x157   :  { %v407_v18 = vmul.f32 %v762_v17, %v394_v2  ;;  %v408_v12 = vmul.f32 %v394_v2, %v778_v26  ;;  %v409_v16 = vmul.f32 %v394_v2, %v787_v31  ;;  %v410_v25 = vmul.f32 %v774_v24, %v394_v2 }
 0x158   :  { %v411_v30 = vmul.f32 %v783_v29, %v394_v2  ;;  %v416_v21 = vrot.slane %v389_v3, %v393_v61 }
 0x15a   :  { %v418_v22 = vadd.f32 %v416_v21, %v396_v4  ;;  %v419_v23 = vadd.f32 %v416_v21, %v397_v5  ;;  %v420_v28 = vadd.f32 %v416_v21, %v398_v6  ;;  %v421_v27 = vadd.f32 %v416_v21, %v399_v7 }
 0x15b   :  { %v422_v15 = vadd.f32 %v416_v21, %v400_v8  ;;  %v423_v32 = vadd.f32 %v416_v21, %v401_v9  ;;  %v424_v19 = vadd.f32 %v416_v21, %v402_v10  ;;  %v425_v33 = vadd.f32 %v416_v21, %v403_v11 }
 0x15c   :  { %v426_v13 = vadd.f32 %v416_v21, %v404_v49  ;;  %v427_v34 = vadd.f32 %v416_v21, %v405_v20  ;;  %v428_v17 = vadd.f32 %v416_v21, %v406_v14  ;;  %v429_v35 = vadd.f32 %v416_v21, %v407_v18 }
 0x15d   :  { %v430_v26 = vadd.f32 %v416_v21, %v408_v12  ;;  %v431_v36 = vadd.f32 %v416_v21, %v409_v16  ;;  %v432_v31 = vadd.f32 %v416_v21, %v410_v25  ;;  %v433_v37 = vadd.f32 %v416_v21, %v411_v30 }
 0x15e   :  { %v434_v24 = vmax.f32 %v418_v22, 0.0  ;;  %v435_v38 = vmax.f32 %v419_v23, 0.0  ;;  %v436_v29 = vmax.f32 %v420_v28, 0.0  ;;  %v437_v39 = vmax.f32 %v421_v27, 0.0 }
 0x15f   :  { %v438_v40 = vmax.f32 %v422_v15, 0.0  ;;  %v439_v41 = vmax.f32 %v423_v32, 0.0  ;;  %v440_v42 = vmax.f32 %v424_v19, 0.0  ;;  %v441_v43 = vmax.f32 %v425_v33, 0.0 }
 0x160   :  { %v442_v44 = vmax.f32 %v426_v13, 0.0  ;;  %v443_v45 = vmax.f32 %v427_v34, 0.0  ;;  %v444_v46 = vmax.f32 %v428_v17, 0.0  ;;  %v445_v47 = vmax.f32 %v429_v35, 0.0 }
 0x161   :  { %v446_v48 = vmax.f32 %v430_v26, 0.0  ;;  %v447_v50 = vmax.f32 %v431_v36, 0.0  ;;  %v448_v51 = vmax.f32 %v432_v31, 0.0  ;;  %v449_v52 = vmax.f32 %v433_v37, 0.0 }
 0x162   :  { %v588_v53 = vpack.c.bf16 %v435_v38, %v434_v24  ;;  %v593_v54 = vpack.c.bf16 %v437_v39, %v436_v29  ;;  %v598_v55 = vpack.c.bf16 %v439_v41, %v438_v40  ;;  %v603_v56 = vpack.c.bf16 %v441_v43, %v440_v42 }
 0x163   :  { %v608_v57 = vpack.c.bf16 %v443_v45, %v442_v44  ;;  %v613_v58 = vpack.c.bf16 %v445_v47, %v444_v46  ;;  %v618_v59 = vpack.c.bf16 %v447_v50, %v446_v48  ;;  %v623_v60 = vpack.c.bf16 %v449_v52, %v448_v51 }
 0x164   :  { %589 = vst [vmem:[%s885_s4] sm:$0xff] %v588_v53   ;;  %625 = vst [vmem:[%s885_s4 + $0x8] sm:$0xff] %v593_v54  }
 0x165   :  { %626 = vst [vmem:[%s885_s4 + $0x10] sm:$0xff] %v598_v55   ;;  %627 = vst [vmem:[%s885_s4 + $0x18] sm:$0xff] %v603_v56  }
 0x166   :  { %628 = vst [vmem:[%s885_s4 + $0x20] sm:$0xff] %v608_v57   ;;  %629 = vst [vmem:[%s885_s4 + $0x28] sm:$0xff] %v613_v58  }
 0x167   :  { %630 = vst [vmem:[%s885_s4 + $0x30] sm:$0xff] %v618_v59   ;;  %631 = vst [vmem:[%s885_s4 + $0x38] sm:$0xff] %v623_v60  }

// kernel: vade_forward.11
= control target key start
LH: loop header
LB: loop body
LE: loop exit
PB: predicated region body
PF: predicated region fallthrough
CT: control target
= control target key end

     0   :  { %vm212_vm0 = vcmask 261120   ;;  %s637_s1 = inlined_call_operand.vmem [shape: bf16[288,128], index: 1, kind: input, shape index: {}]   ;;  %s638_s0 = inlined_call_operand.vmem [shape: bf16[32,288], index: 0, kind: input, shape index: {}]   ;;  %s639_s2 = inlined_call_operand.vmem [shape: f32[1,128], index: 2, kind: input, shape index: {}]   ;;  %s640_s3 = inlined_call_operand.vmem [shape: f32[1,128], index: 3, kind: input, shape index: {}]   ;;  %s641_s4 = inlined_call_operand.vmem [shape: bf16[32,128], index: 4, kind: output, shape index: {}]  }
   0x1   :  { %v500_v0 = vld [vmem:[%s637_s1 + $0x40] sm:$0xff]   ;;  %v502_v2 = vld [vmem:[%s637_s1 + $0x48] sm:$0xff]   ;;  %v504_v4 = vld [vmem:[%s637_s1 + $0x50] sm:$0xff]  }
   0x2   :  { %v501_v1 = vld [vmem:[%s637_s1] sm:$0xff]   ;;  %460 = vmatprep.subr.bf16.mxu0 %v500_v0  ;;  %v503_v3 = vld [vmem:[%s637_s1 + $0x8] sm:$0xff]   ;;  %v505_v5 = vld [vmem:[%s637_s1 + $0x10] sm:$0xff]  }
   0x3   :  { %461 = vmatpush3.bf16.msra.mxu0 %v501_v1  ;;  %v506_v6 = vld [vmem:[%s637_s1 + $0x58] sm:$0xff]   ;;  %v508_v8 = vld [vmem:[%s637_s1 + $0x60] sm:$0xff]   ;;  %v510_v11 = vld [vmem:[%s637_s1 + $0x68] sm:$0xff]  }
   0x4   :  { %462 = vmatprep.subr.bf16.mxu0 %v502_v2  ;;  %v507_v7 = vld [vmem:[%s637_s1 + $0x18] sm:$0xff]   ;;  %v514_v9 = vld [vmem:[%s637_s1 + $0x80] sm:$0xff]   ;;  %v511_v12 = vld [vmem:[%s637_s1 + $0x28] sm:$0xff]  }
   0x5   :  { %v509_v10 = vld [vmem:[%s637_s1 + $0x20] sm:$0xff]   ;;  %492 = vmatprep.subr.bf16.mxu1 %v514_v9  ;;  %v517_v13 = vld [vmem:[%s637_s1 + $0x88] sm:$0xff]   ;;  %v512_v14 = vld [vmem:[%s637_s1 + $0x70] sm:$0xff]  }
   0x6   :  { %493 = vmatpush3.bf16.msra.mxu1 %v514_v9  ;;  %v520_v15 = vld [vmem:[%s638_s0 + $0x4] ss:$12 sps:$4 sm:$0xff]   ;;  %v521_v16 = vld [vmem:[%s638_s0 + $0x8] ss:$12 sps:$4 sm:$0xff]   ;;  %v522_v17 = vld [vmem:[%s638_s0 + $0x20] ss:$12 sps:$4 sm:$0xff]   ;;  %v368_v9 = vlaneseq }
   0x7   :  { %463 = vmatpush3.bf16.msra.mxu0 %v503_v3  ;;  %494 = vmatprep.subr.bf16.mxu1 %v517_v13  ;;  %v513_v18 = vld [vmem:[%s637_s1 + $0x30] sm:$0xff]   ;;  %v515_v19 = vld [vmem:[%s637_s1 + $0x78] sm:$0xff]   ;;  %v518_v21 = vld [vmem:[%s638_s0] ss:$12 sps:$4 sm:$0xff]  }
   0x8   :  { %464 = vmatprep.subr.bf16.mxu0 %v504_v4  ;;  %251 = vmatprep.mubr.bf16.mxu0 %v520_v15  ;;  %v516_v20 = vld [vmem:[%s637_s1 + $0x38] sm:$0xff]   ;;  %v364_v15 = vld [vmem:[%s640_s3] sm:$0x1] }
   0x9   :  { %496 = vmatprep.mubr.msk.bf16.mxu1 %vm212_vm0, %v521_v16  ;;  %v523_v22 = vld [vmem:[%s638_s0 + $0x1c] ss:$12 sps:$4 sm:$0xff]   ;;  %v525_v23 = vld [vmem:[%s638_s0 + $0x18] ss:$12 sps:$4 sm:$0xff]  }
   0xa   :  { %495 = vmatpush3.bf16.msra.mxu1 %v517_v13 }
   0xb   :  { %465 = vmatpush3.bf16.msra.mxu0 %v505_v5 }
   0xc   :  { %466 = vmatprep.subr.bf16.mxu0 %v506_v6 }
   0xd   :  { %497 = vmatmul.mubr.msk.bf16.vlgmr.msra.gmra.mrb[0].mxu1 %vm212_vm0, %v522_v17 }
   0xf   :  { %467 = vmatpush3.bf16.msra.mxu0 %v507_v7 }
  0x10   :  { %468 = vmatprep.subr.bf16.mxu0 %v508_v8 }
  0x13   :  { %469 = vmatpush3.bf16.msra.mxu0 %v509_v10  ;;  %v369_v10 = vshrl.u32 %v368_v9, 7 }
  0x14   :  { %470 = vmatprep.subr.bf16.mxu0 %v510_v11  ;;  %v360_v11 = vld [vmem:[%s639_s2] sm:$0x1] }
  0x17   :  { %471 = vmatpush3.bf16.msra.mxu0 %v511_v12  ;;  %v370_v12 = vsub.s32 0, %v369_v10 }
  0x18   :  { %472 = vmatprep.subr.bf16.mxu0 %v512_v14 }
  0x1b   :  { %473 = vmatpush3.bf16.msra.mxu0 %v513_v18 }
  0x1c   :  { %474 = vmatprep.subr.bf16.mxu0 %v515_v19 }
  0x1f   :  { %475 = vmatpush3.bf16.msra.mxu0 %v516_v20 }
  0x22   :  { %252 = vmatmul.mubr.bf16.vlgmr.msra.gmra.mrb[0].mxu0 %v518_v21 }
  0x23   :  { %259 = vmatprep.mubr.bf16.mxu0 %v523_v22 }
  0x2a   :  { %260 = vmatmul.mubr.bf16.gmra.mrb[4].mxu0 %v525_v23 }
  0xe0   :  { %v498_v24 = vpop.f32.mrb[0].mxu1 }
  0xe1   :  { %v302_v25 = vpop.f32.mrb[1].mxu1 }
  0xe2   :  { %v499_v26 = vpop.f32.mrb[2].mxu1 }
  0xe3   :  { %v305_v27 = vpop.f32.mrb[3].mxu1 }
  0xf5   :  { %v476_v28 = vpop.f32.mrb[0].mxu0 }
  0xf6   :  { %v477_v29 = vpop.f32.mrb[1].mxu0 }
  0xf7   :  { %v478_v30 = vadd.f32 %v477_v29, %v476_v28  ;;  %v479_v31 = vpop.f32.mrb[2].mxu0 }
  0xf8   :  { %v480_v32 = vpop.f32.mrb[3].mxu0 }
  0xf9   :  { %v481_v33 = vadd.f32 %v480_v32, %v479_v31  ;;  %v303_v34 = vadd.f32 %v478_v30, %v302_v25 }
  0xfb   :  { %v306_v35 = vadd.f32 %v481_v33, %v305_v27 }
  0xfd   :  { %v332_v36 = vadd.f32 %v306_v35, %v303_v34  ;;  %v482_v37 = vpop.f32.mrb[4].mxu0 }
  0xfe   :  { %v483_v38 = vpop.f32.mrb[5].mxu0 }
  0xff   :  { %v484_v39 = vadd.f32 %v483_v38, %v482_v37  ;;  %v485_v40 = vpop.f32.mrb[6].mxu0 }
 0x100   :  { %v486_v41 = vpop.f32.mrb[7].mxu0 }
 0x101   :  { %v311_v42 = vadd.f32 %v498_v24, %v484_v39  ;;  %v487_v43 = vadd.f32 %v486_v41, %v485_v40 }
 0x103   :  { %v333_v44 = vadd.f32 %v332_v36, %v311_v42  ;;  %v314_v45 = vadd.f32 %v499_v26, %v487_v43 }
 0x105   :  { %v334_v46 = vadd.f32 %v333_v44, %v314_v45 }
 0x107   :  { %v335_v47 = vrot.slane %v334_v46, 4 }
 0x109   :  { %v336_v48 = vadd.f32 %v335_v47, %v334_v46 }
 0x10b   :  { %v337_v49 = vrot.slane %v336_v48, 2 }
 0x10d   :  { %v338_v50 = vadd.f32 %v337_v49, %v336_v48 }
 0x10f   :  { %v339_v51 = vrot.slane %v338_v50, 1 }
 0x111   :  { %v340_v52 = vadd.f32 %v339_v51, %v338_v50 }
 0x113   :  { %v341_v53 = vmul.f32 0.03125, %v340_v52 }
 0x115   :  { %v342_v54 = vsub.f32 %v303_v34, %v341_v53  ;;  %v343_v55 = vsub.f32 %v306_v35, %v341_v53  ;;  %v344_v56 = vsub.f32 %v311_v42, %v341_v53  ;;  %v345_v57 = vsub.f32 %v314_v45, %v341_v53 }
 0x117   :  { %v346_v58 = vmul.f32 %v342_v54, %v342_v54  ;;  %v347_v59 = vmul.f32 %v343_v55, %v343_v55  ;;  %v348_v60 = vmul.f32 %v344_v56, %v344_v56  ;;  %v349_v62 = vmul.f32 %v345_v57, %v345_v57 }
 0x119   :  { %v350_v61 = vadd.f32 %v347_v59, %v346_v58 }
 0x11b   :  { %v351_v63 = vadd.f32 %v350_v61, %v348_v60 }
 0x11d   :  { %v352_v0 = vadd.f32 %v351_v63, %v349_v62 }
 0x11f   :  { %v353_v1 = vrot.slane %v352_v0, 4 }
 0x121   :  { %v354_v2 = vadd.f32 %v353_v1, %v352_v0 }
 0x123   :  { %v355_v3 = vrot.slane %v354_v2, 2 }
 0x125   :  { %v356_v4 = vadd.f32 %v355_v3, %v354_v2 }
 0x127   :  { %v357_v5 = vrot.slane %v356_v4, 1 }
 0x129   :  { %v358_v6 = vadd.f32 %v357_v5, %v356_v4 }
 0x12b   :  { %v359_v7 = vmul.f32 0.03125, %v358_v6 }
 0x12d   :  { %v361_v8 = vadd.f32 1e-05, %v359_v7 }
 0x12f   :  { %526 = vrsqrt.f32 %v361_v8 }
 0x139   :  { %v527_v13 = vpop.eup %526 }
 0x13a   :  { %v363_v14 = vmul.f32 %v527_v13, %v360_v11 }
 0x13c   :  { %v365_v16 = vmul.f32 %v363_v14, %v341_v53  ;;  %v371_v17 = vrot.slane %v363_v14, %v370_v12 }
 0x13e   :  { %v366_v18 = vsub.f32 %v364_v15, %v365_v16  ;;  %v373_v19 = vmul.f32 %v371_v17, %v303_v34  ;;  %v374_v20 = vmul.f32 %v371_v17, %v306_v35  ;;  %v375_v21 = vmul.f32 %v371_v17, %v311_v42 }
 0x13f   :  { %v376_v22 = vmul.f32 %v371_v17, %v314_v45 }
 0x140   :  { %v381_v23 = vrot.slane %v366_v18, %v370_v12 }
 0x142   :  { %v383_v24 = vadd.f32 %v381_v23, %v373_v19  ;;  %v384_v25 = vadd.f32 %v381_v23, %v374_v20  ;;  %v385_v26 = vadd.f32 %v381_v23, %v375_v21  ;;  %v386_v27 = vadd.f32 %v381_v23, %v376_v22 }
 0x144   :  { %v387_v28 = vmax.f32 %v383_v24, 0.0  ;;  %v388_v29 = vmax.f32 %v384_v25, 0.0  ;;  %v389_v30 = vmax.f32 %v385_v26, 0.0  ;;  %v390_v31 = vmax.f32 %v386_v27, 0.0 }
 0x146   :  { %v452_v32 = vpack.c.bf16 %v388_v29, %v387_v28  ;;  %v457_v33 = vpack.c.bf16 %v390_v31, %v389_v30 }
 0x148   :  { %453 = vst [vmem:[%s641_s4] sm:$0xff] %v452_v32   ;;  %459 = vst [vmem:[%s641_s4 + $0x8] sm:$0xff] %v457_v33  }

// kernel: vade_forward.14
= control target key start
LH: loop header
LB: loop body
LE: loop exit
PB: predicated region body
PF: predicated region fallthrough
CT: control target
= control target key end

     0   :  { %v55_v35 = vlaneseq  ;;  %s529_s1 = inlined_call_operand.vmem [shape: bf16[256,256], index: 1, kind: input, shape index: {}]   ;;  %s530_s0 = inlined_call_operand.vmem [shape: bf16[8,256], index: 0, kind: input, shape index: {}]   ;;  %s531_s2 = inlined_call_operand.vmem [shape: f32[1,256], index: 2, kind: input, shape index: {}]   ;;  %s532_s4 = inlined_call_operand.vmem [shape: f32[8,128], index: 4, kind: output, shape index: {0}]   ;;  %s533_s5 = inlined_call_operand.vmem [shape: f32[8,128], index: 5, kind: output, shape index: {1}]   ;;  %s534_s3 = inlined_call_operand.vmem [shape: f32[8,128], index: 3, kind: input, shape index: {}]   ;;  %s535_s6 = inlined_call_operand.vmem [shape: f32[8,128], index: 6, kind: output, shape index: {2}]  }
   0x1   :  { %v328_v0 = vld [vmem:[%s529_s1 + $0x4] ss:$8 sps:$4 sm:$0xff]   ;;  %v330_v1 = vld [vmem:[%s529_s1] ss:$8 sps:$4 sm:$0xff]   ;;  %v331_v2 = vld [vmem:[%s529_s1 + $0x14] ss:$8 sps:$4 sm:$0xff]  }
   0x2   :  { %232 = vmatprep.subr.bf16.mxu0 %v328_v0  ;;  %v333_v3 = vld [vmem:[%s529_s1 + $0x10] ss:$8 sps:$4 sm:$0xff]   ;;  %v334_v4 = vld [vmem:[%s529_s1 + $0x24] ss:$8 sps:$4 sm:$0xff]   ;;  %v336_v5 = vld [vmem:[%s529_s1 + $0x20] ss:$8 sps:$4 sm:$0xff]  }
   0x3   :  { %233 = vmatpush1.bf16.msra.mxu0 %v330_v1  ;;  %v337_v6 = vld [vmem:[%s529_s1 + $0x34] ss:$8 sps:$4 sm:$0xff]   ;;  %v339_v7 = vld [vmem:[%s529_s1 + $0x30] ss:$8 sps:$4 sm:$0xff]   ;;  %v340_v8 = vld [vmem:[%s529_s1 + $0x44] ss:$8 sps:$4 sm:$0xff]  }
   0x4   :  { %234 = vmatprep.subr.bf16.mxu0 %v331_v2  ;;  %v342_v9 = vld [vmem:[%s529_s1 + $0x40] ss:$8 sps:$4 sm:$0xff]   ;;  %v343_v10 = vld [vmem:[%s529_s1 + $0x54] ss:$8 sps:$4 sm:$0xff]   ;;  %v345_v11 = vld [vmem:[%s529_s1 + $0x50] ss:$8 sps:$4 sm:$0xff]  }
   0x5   :  { %v346_v12 = vld [vmem:[%s529_s1 + $0x64] ss:$8 sps:$4 sm:$0xff]   ;;  %v348_v15 = vld [vmem:[%s529_s1 + $0x60] ss:$8 sps:$4 sm:$0xff]   ;;  %v349_v16 = vld [vmem:[%s529_s1 + $0x74] ss:$8 sps:$4 sm:$0xff]  }
   0x6   :  { %v20_v13 = vld [vmem:[%s530_s0] sm:$0xff]  ;;  %v351_v17 = vld [vmem:[%s529_s1 + $0x70] ss:$8 sps:$4 sm:$0xff]   ;;  %v355_v20 = vld [vmem:[%s529_s1 + $0x94] ss:$8 sps:$4 sm:$0xff]   ;;  %v56_v36 = vshrl.u32 %v55_v35, 7 }
   0x7   :  { %235 = vmatpush1.bf16.msra.mxu0 %v333_v3  ;;  %v295_v14 = vcombine.high %v20_v13, %v20_v13  ;;  %v352_v18 = vld [vmem:[%s529_s1 + $0x84] ss:$8 sps:$4 sm:$0xff]   ;;  %v354_v19 = vld [vmem:[%s529_s1 + $0x80] ss:$8 sps:$4 sm:$0xff]   ;;  %v357_v21 = vld [vmem:[%s529_s1 + $0x90] ss:$8 sps:$4 sm:$0xff]   ;;  %v294_v34 = vcombine.low %v20_v13, %v20_v13 }
   0x8   :  { %236 = vmatprep.subr.bf16.mxu0 %v334_v4  ;;  %v358_v22 = vld [vmem:[%s529_s1 + $0xa4] ss:$8 sps:$4 sm:$0xff]   ;;  %v360_v23 = vld [vmem:[%s529_s1 + $0xa0] ss:$8 sps:$4 sm:$0xff]   ;;  %v361_v24 = vld [vmem:[%s529_s1 + $0xb4] ss:$8 sps:$4 sm:$0xff]  }
   0x9   :  { %264 = vmatprep.mubr.bf16.mxu0 %v295_v14  ;;  %v363_v25 = vld [vmem:[%s529_s1 + $0xb0] ss:$8 sps:$4 sm:$0xff]   ;;  %v364_v26 = vld [vmem:[%s529_s1 + $0xc4] ss:$8 sps:$4 sm:$0xff]   ;;  %v366_v27 = vld [vmem:[%s529_s1 + $0xc0] ss:$8 sps:$4 sm:$0xff]  }
   0xa   :  { %v367_v28 = vld [vmem:[%s529_s1 + $0xd4] ss:$8 sps:$4 sm:$0xff]   ;;  %v369_v29 = vld [vmem:[%s529_s1 + $0xd0] ss:$8 sps:$4 sm:$0xff]   ;;  %v370_v30 = vld [vmem:[%s529_s1 + $0xe4] ss:$8 sps:$4 sm:$0xff]  }
   0xb   :  { %237 = vmatpush1.bf16.msra.mxu0 %v336_v5  ;;  %v372_v31 = vld [vmem:[%s529_s1 + $0xe0] ss:$8 sps:$4 sm:$0xff]   ;;  %v373_v32 = vld [vmem:[%s529_s1 + $0xf4] ss:$8 sps:$4 sm:$0xff]   ;;  %v375_v33 = vld [vmem:[%s529_s1 + $0xf0] ss:$8 sps:$4 sm:$0xff]  }
   0xc   :  { %238 = vmatprep.subr.bf16.mxu0 %v337_v6  ;;  %v57_v37 = vsub.s32 0, %v56_v36  ;;  %v53_v38 = vld [vmem:[%s531_s2] sm:$0x3]  ;;  %v61_v39 = vsub.s32 1, %v56_v36 }
   0xd   :  { %v275_v50 = vld [vmem:[%s534_s3] sm:$0xff] }
   0xe   :  { %v58_v40 = vrot.slane %v53_v38, %v57_v37  ;;  %v62_v41 = vrot.slane %v53_v38, %v61_v39 }
   0xf   :  { %239 = vmatpush1.bf16.msra.mxu0 %v339_v7 }
  0x10   :  { %240 = vmatprep.subr.bf16.mxu0 %v340_v8 }
  0x13   :  { %241 = vmatpush1.bf16.msra.mxu0 %v342_v9 }
  0x14   :  { %242 = vmatprep.subr.bf16.mxu0 %v343_v10 }
  0x17   :  { %243 = vmatpush1.bf16.msra.mxu0 %v345_v11 }
  0x18   :  { %244 = vmatprep.subr.bf16.mxu0 %v346_v12 }
  0x1b   :  { %245 = vmatpush1.bf16.msra.mxu0 %v348_v15 }
  0x1c   :  { %246 = vmatprep.subr.bf16.mxu0 %v349_v16 }
  0x1f   :  { %247 = vmatpush1.bf16.msra.mxu0 %v351_v17 }
  0x20   :  { %248 = vmatprep.subr.bf16.mxu0 %v352_v18 }
  0x23   :  { %249 = vmatpush1.bf16.msra.mxu0 %v354_v19 }
  0x24   :  { %250 = vmatprep.subr.bf16.mxu0 %v355_v20 }
  0x27   :  { %251 = vmatpush1.bf16.msra.mxu0 %v357_v21 }
  0x28   :  { %252 = vmatprep.subr.bf16.mxu0 %v358_v22 }
  0x2b   :  { %253 = vmatpush1.bf16.msra.mxu0 %v360_v23 }
  0x2c   :  { %254 = vmatprep.subr.bf16.mxu0 %v361_v24 }
  0x2f   :  { %255 = vmatpush1.bf16.msra.mxu0 %v363_v25 }
  0x30   :  { %256 = vmatprep.subr.bf16.mxu0 %v364_v26 }
  0x33   :  { %257 = vmatpush1.bf16.msra.mxu0 %v366_v27 }
  0x34   :  { %258 = vmatprep.subr.bf16.mxu0 %v367_v28 }
  0x37   :  { %259 = vmatpush1.bf16.msra.mxu0 %v369_v29 }
  0x38   :  { %260 = vmatprep.subr.bf16.mxu0 %v370_v30 }
  0x3b   :  { %261 = vmatpush1.bf16.msra.mxu0 %v372_v31 }
  0x3c   :  { %262 = vmatprep.subr.bf16.mxu0 %v373_v32 }
  0x3f   :  { %263 = vmatpush1.bf16.msra.mxu0 %v375_v33 }
  0x42   :  { %265 = vmatmul.mubr.bf16.vlgmr.msra.gmra.mrb[0].mxu0 %v294_v34 }
 0x115   :  { %v266_v42 = vpop.f32.mrb[0].mxu0 }
 0x116   :  { %v267_v43 = vadd.f32 %v266_v42, %v58_v40  ;;  %v268_v44 = vpop.f32.mrb[1].mxu0 }
 0x117   :  { %v269_v45 = vadd.f32 %v268_v44, %v62_v41  ;;  %v270_v46 = vpop.f32.mrb[2].mxu0 }
 0x118   :  { %273 = vst [vmem:[%s532_s4] sm:$0xff] %v267_v43  ;;  %v271_v47 = vpop.f32.mrb[3].mxu0 }
 0x119   :  { %274 = vst [vmem:[%s533_s5] sm:$0xff] %v269_v45  ;;  %v276_v48 = vmul.f32 0.5, %v269_v45 }
 0x11b   :  { %v277_v49 = vmul.f32 1.442695, %v276_v48 }
 0x11d   :  { %378 = vpow2.f32 %v277_v49 }
 0x127   :  { %v379_v51 = vpop.eup %378 }
 0x128   :  { %v279_v52 = vmul.f32 %v379_v51, %v275_v50 }
 0x12a   :  { %v280_v53 = vadd.f32 %v279_v52, %v267_v43 }
 0x12c   :  { %281 = vst [vmem:[%s535_s6] sm:$0xff] %v280_v53 }

// kernel: vade_forward.13
= control target key start
LH: loop header
LB: loop body
LE: loop exit
PB: predicated region body
PF: predicated region fallthrough
CT: control target
= control target key end

     0   :  { %s936_s1 = inlined_call_operand.vmem [shape: bf16[512,256], index: 1, kind: input, shape index: {}]   ;;  %s937_s0 = inlined_call_operand.vmem [shape: bf16[8,512], index: 0, kind: input, shape index: {}]   ;;  %s938_s2 = inlined_call_operand.vmem [shape: f32[1,256], index: 2, kind: input, shape index: {}]   ;;  %s939_s3 = inlined_call_operand.vmem [shape: bf16[8,256], index: 3, kind: output, shape index: {}]  }
   0x1   :  { %v612_v0 = vld [vmem:[%s936_s1 + $0x4] ss:$8 sps:$4 sm:$0xff]   ;;  %v616_v2 = vld [vmem:[%s936_s1] ss:$8 sps:$4 sm:$0xff]   ;;  %v618_v4 = vld [vmem:[%s936_s1 + $0x14] ss:$8 sps:$4 sm:$0xff]  }
   0x2   :  { %v614_v1 = vld [vmem:[%s936_s1 + $0x104] ss:$8 sps:$4 sm:$0xff]   ;;  %422 = vmatprep.subr.bf16.mxu0 %v612_v0  ;;  %v617_v3 = vld [vmem:[%s936_s1 + $0x100] ss:$8 sps:$4 sm:$0xff]   ;;  %v620_v5 = vld [vmem:[%s936_s1 + $0x114] ss:$8 sps:$4 sm:$0xff]  }
   0x3   :  { %463 = vmatprep.subr.bf16.mxu1 %v614_v1  ;;  %423 = vmatpush1.bf16.msra.mxu0 %v616_v2  ;;  %v622_v6 = vld [vmem:[%s936_s1 + $0x10] ss:$8 sps:$4 sm:$0xff]   ;;  %v624_v8 = vld [vmem:[%s936_s1 + $0x24] ss:$8 sps:$4 sm:$0xff]   ;;  %v628_v10 = vld [vmem:[%s936_s1 + $0x20] ss:$8 sps:$4 sm:$0xff]  }
   0x4   :  { %464 = vmatpush1.bf16.msra.mxu1 %v617_v3  ;;  %424 = vmatprep.subr.bf16.mxu0 %v618_v4  ;;  %v623_v7 = vld [vmem:[%s936_s1 + $0x110] ss:$8 sps:$4 sm:$0xff]   ;;  %v626_v9 = vld [vmem:[%s936_s1 + $0x124] ss:$8 sps:$4 sm:$0xff]   ;;  %v629_v11 = vld [vmem:[%s936_s1 + $0x120] ss:$8 sps:$4 sm:$0xff]  }
   0x5   :  { %465 = vmatprep.subr.bf16.mxu1 %v620_v5  ;;  %v630_v12 = vld [vmem:[%s936_s1 + $0x34] ss:$8 sps:$4 sm:$0xff]   ;;  %v634_v14 = vld [vmem:[%s936_s1 + $0x30] ss:$8 sps:$4 sm:$0xff]   ;;  %v636_v16 = vld [vmem:[%s936_s1 + $0x44] ss:$8 sps:$4 sm:$0xff]  }
   0x6   :  { %v632_v13 = vld [vmem:[%s936_s1 + $0x134] ss:$8 sps:$4 sm:$0xff]   ;;  %v635_v15 = vld [vmem:[%s936_s1 + $0x130] ss:$8 sps:$4 sm:$0xff]   ;;  %v638_v17 = vld [vmem:[%s936_s1 + $0x144] ss:$8 sps:$4 sm:$0xff]  }
   0x7   :  { %425 = vmatpush1.bf16.msra.mxu0 %v622_v6  ;;  %v640_v18 = vld [vmem:[%s936_s1 + $0x40] ss:$8 sps:$4 sm:$0xff]   ;;  %v642_v20 = vld [vmem:[%s936_s1 + $0x54] ss:$8 sps:$4 sm:$0xff]   ;;  %v646_v22 = vld [vmem:[%s936_s1 + $0x50] ss:$8 sps:$4 sm:$0xff]   ;;  %v515_v6 = vlaneseq }
   0x8   :  { %466 = vmatpush1.bf16.msra.mxu1 %v623_v7  ;;  %426 = vmatprep.subr.bf16.mxu0 %v624_v8  ;;  %v641_v19 = vld [vmem:[%s936_s1 + $0x140] ss:$8 sps:$4 sm:$0xff]   ;;  %v644_v21 = vld [vmem:[%s936_s1 + $0x154] ss:$8 sps:$4 sm:$0xff]   ;;  %v647_v23 = vld [vmem:[%s936_s1 + $0x150] ss:$8 sps:$4 sm:$0xff]  }
   0x9   :  { %467 = vmatprep.subr.bf16.mxu1 %v626_v9  ;;  %v648_v24 = vld [vmem:[%s936_s1 + $0x64] ss:$8 sps:$4 sm:$0xff]   ;;  %v652_v26 = vld [vmem:[%s936_s1 + $0x60] ss:$8 sps:$4 sm:$0xff]   ;;  %v654_v28 = vld [vmem:[%s936_s1 + $0x74] ss:$8 sps:$4 sm:$0xff]  }
   0xa   :  { %v650_v25 = vld [vmem:[%s936_s1 + $0x164] ss:$8 sps:$4 sm:$0xff]   ;;  %v653_v27 = vld [vmem:[%s936_s1 + $0x160] ss:$8 sps:$4 sm:$0xff]   ;;  %v656_v29 = vld [vmem:[%s936_s1 + $0x174] ss:$8 sps:$4 sm:$0xff]  }
   0xb   :  { %427 = vmatpush1.bf16.msra.mxu0 %v628_v10  ;;  %v658_v30 = vld [vmem:[%s936_s1 + $0x70] ss:$8 sps:$4 sm:$0xff]   ;;  %v660_v32 = vld [vmem:[%s936_s1 + $0x84] ss:$8 sps:$4 sm:$0xff]   ;;  %v664_v34 = vld [vmem:[%s936_s1 + $0x80] ss:$8 sps:$4 sm:$0xff]  }
   0xc   :  { %468 = vmatpush1.bf16.msra.mxu1 %v629_v11  ;;  %428 = vmatprep.subr.bf16.mxu0 %v630_v12  ;;  %v659_v31 = vld [vmem:[%s936_s1 + $0x170] ss:$8 sps:$4 sm:$0xff]   ;;  %v662_v33 = vld [vmem:[%s936_s1 + $0x184] ss:$8 sps:$4 sm:$0xff]   ;;  %v665_v35 = vld [vmem:[%s936_s1 + $0x180] ss:$8 sps:$4 sm:$0xff]  }
   0xd   :  { %469 = vmatprep.subr.bf16.mxu1 %v632_v13  ;;  %v666_v36 = vld [vmem:[%s936_s1 + $0x94] ss:$8 sps:$4 sm:$0xff]   ;;  %v670_v38 = vld [vmem:[%s936_s1 + $0x90] ss:$8 sps:$4 sm:$0xff]   ;;  %v672_v40 = vld [vmem:[%s936_s1 + $0xa4] ss:$8 sps:$4 sm:$0xff]  }
   0xe   :  { %v668_v37 = vld [vmem:[%s936_s1 + $0x194] ss:$8 sps:$4 sm:$0xff]   ;;  %v671_v39 = vld [vmem:[%s936_s1 + $0x190] ss:$8 sps:$4 sm:$0xff]   ;;  %v674_v41 = vld [vmem:[%s936_s1 + $0x1a4] ss:$8 sps:$4 sm:$0xff]  }
   0xf   :  { %429 = vmatpush1.bf16.msra.mxu0 %v634_v14  ;;  %v676_v42 = vld [vmem:[%s936_s1 + $0xa0] ss:$8 sps:$4 sm:$0xff]   ;;  %v678_v44 = vld [vmem:[%s936_s1 + $0xb4] ss:$8 sps:$4 sm:$0xff]   ;;  %v682_v49 = vld [vmem:[%s936_s1 + $0xb0] ss:$8 sps:$4 sm:$0xff]  }
  0x10   :  { %470 = vmatpush1.bf16.msra.mxu1 %v635_v15  ;;  %430 = vmatprep.subr.bf16.mxu0 %v636_v16  ;;  %v677_v43 = vld [vmem:[%s936_s1 + $0x1a0] ss:$8 sps:$4 sm:$0xff]   ;;  %v680_v45 = vld [vmem:[%s936_s1 + $0x1b4] ss:$8 sps:$4 sm:$0xff]   ;;  %v683_v50 = vld [vmem:[%s936_s1 + $0x1b0] ss:$8 sps:$4 sm:$0xff]  }
  0x11   :  { %471 = vmatprep.subr.bf16.mxu1 %v638_v17  ;;  %v22_v46 = vld [vmem:[%s937_s0] sm:$0xff]  ;;  %v23_v48 = vld [vmem:[%s937_s0 + $0x8] sm:$0xff]  ;;  %v690_v56 = vld [vmem:[%s936_s1 + $0xd4] ss:$8 sps:$4 sm:$0xff]   ;;  %v516_v7 = vshrl.u32 %v515_v6, 7 }
  0x12   :  { %v543_v47 = vcombine.high %v22_v46, %v22_v46  ;;  %v545_v51 = vcombine.high %v23_v48, %v23_v48  ;;  %v684_v52 = vld [vmem:[%s936_s1 + $0xc4] ss:$8 sps:$4 sm:$0xff]   ;;  %v688_v54 = vld [vmem:[%s936_s1 + $0xc0] ss:$8 sps:$4 sm:$0xff]   ;;  %v692_v57 = vld [vmem:[%s936_s1 + $0x1d4] ss:$8 sps:$4 sm:$0xff]   ;;  %v542_v4 = vcombine.low %v22_v46, %v22_v46  ;;  %v544_v5 = vcombine.low %v23_v48, %v23_v48 }
  0x13   :  { %431 = vmatpush1.bf16.msra.mxu0 %v640_v18  ;;  %v686_v53 = vld [vmem:[%s936_s1 + $0x1c4] ss:$8 sps:$4 sm:$0xff]   ;;  %v689_v55 = vld [vmem:[%s936_s1 + $0x1c0] ss:$8 sps:$4 sm:$0xff]   ;;  %v694_v58 = vld [vmem:[%s936_s1 + $0xd0] ss:$8 sps:$4 sm:$0xff]  }
  0x14   :  { %472 = vmatpush1.bf16.msra.mxu1 %v641_v19  ;;  %432 = vmatprep.subr.bf16.mxu0 %v642_v20  ;;  %v695_v59 = vld [vmem:[%s936_s1 + $0x1d0] ss:$8 sps:$4 sm:$0xff]   ;;  %v696_v60 = vld [vmem:[%s936_s1 + $0xe4] ss:$8 sps:$4 sm:$0xff]   ;;  %v700_v62 = vld [vmem:[%s936_s1 + $0xe0] ss:$8 sps:$4 sm:$0xff]  }
  0x15   :  { %473 = vmatprep.subr.bf16.mxu1 %v644_v21  ;;  %454 = vmatprep.mubr.bf16.mxu0 %v543_v47  ;;  %v698_v61 = vld [vmem:[%s936_s1 + $0x1e4] ss:$8 sps:$4 sm:$0xff]   ;;  %v701_v63 = vld [vmem:[%s936_s1 + $0x1e0] ss:$8 sps:$4 sm:$0xff]   ;;  %v702_v0 = vld [vmem:[%s936_s1 + $0xf4] ss:$8 sps:$4 sm:$0xff]  }
  0x16   :  { %495 = vmatprep.mubr.bf16.mxu1 %v545_v51  ;;  %v704_v1 = vld [vmem:[%s936_s1 + $0x1f4] ss:$8 sps:$4 sm:$0xff]   ;;  %v706_v2 = vld [vmem:[%s936_s1 + $0xf0] ss:$8 sps:$4 sm:$0xff]   ;;  %v517_v8 = vsub.s32 0, %v516_v7  ;;  %v521_v10 = vsub.s32 1, %v516_v7 }
  0x17   :  { %433 = vmatpush1.bf16.msra.mxu0 %v646_v22  ;;  %v707_v3 = vld [vmem:[%s936_s1 + $0x1f0] ss:$8 sps:$4 sm:$0xff]   ;;  %v513_v9 = vld [vmem:[%s938_s2] sm:$0x3] }
  0x18   :  { %474 = vmatpush1.bf16.msra.mxu1 %v647_v23  ;;  %434 = vmatprep.subr.bf16.mxu0 %v648_v24  ;;  %v518_v11 = vrot.slane %v513_v9, %v517_v8  ;;  %v522_v14 = vrot.slane %v513_v9, %v521_v10 }
  0x19   :  { %475 = vmatprep.subr.bf16.mxu1 %v650_v25 }
  0x1b   :  { %435 = vmatpush1.bf16.msra.mxu0 %v652_v26 }
  0x1c   :  { %476 = vmatpush1.bf16.msra.mxu1 %v653_v27  ;;  %436 = vmatprep.subr.bf16.mxu0 %v654_v28 }
  0x1d   :  { %477 = vmatprep.subr.bf16.mxu1 %v656_v29 }
  0x1f   :  { %437 = vmatpush1.bf16.msra.mxu0 %v658_v30 }
  0x20   :  { %478 = vmatpush1.bf16.msra.mxu1 %v659_v31  ;;  %438 = vmatprep.subr.bf16.mxu0 %v660_v32 }
  0x21   :  { %479 = vmatprep.subr.bf16.mxu1 %v662_v33 }
  0x23   :  { %439 = vmatpush1.bf16.msra.mxu0 %v664_v34 }
  0x24   :  { %480 = vmatpush1.bf16.msra.mxu1 %v665_v35  ;;  %440 = vmatprep.subr.bf16.mxu0 %v666_v36 }
  0x25   :  { %481 = vmatprep.subr.bf16.mxu1 %v668_v37 }
  0x27   :  { %441 = vmatpush1.bf16.msra.mxu0 %v670_v38 }
  0x28   :  { %482 = vmatpush1.bf16.msra.mxu1 %v671_v39  ;;  %442 = vmatprep.subr.bf16.mxu0 %v672_v40 }
  0x29   :  { %483 = vmatprep.subr.bf16.mxu1 %v674_v41 }
  0x2b   :  { %443 = vmatpush1.bf16.msra.mxu0 %v676_v42 }
  0x2c   :  { %484 = vmatpush1.bf16.msra.mxu1 %v677_v43  ;;  %444 = vmatprep.subr.bf16.mxu0 %v678_v44 }
  0x2d   :  { %485 = vmatprep.subr.bf16.mxu1 %v680_v45 }
  0x2f   :  { %445 = vmatpush1.bf16.msra.mxu0 %v682_v49 }
  0x30   :  { %486 = vmatpush1.bf16.msra.mxu1 %v683_v50  ;;  %446 = vmatprep.subr.bf16.mxu0 %v684_v52 }
  0x31   :  { %487 = vmatprep.subr.bf16.mxu1 %v686_v53 }
  0x33   :  { %447 = vmatpush1.bf16.msra.mxu0 %v688_v54 }
  0x34   :  { %488 = vmatpush1.bf16.msra.mxu1 %v689_v55  ;;  %448 = vmatprep.subr.bf16.mxu0 %v690_v56 }
  0x35   :  { %489 = vmatprep.subr.bf16.mxu1 %v692_v57 }
  0x37   :  { %449 = vmatpush1.bf16.msra.mxu0 %v694_v58 }
  0x38   :  { %490 = vmatpush1.bf16.msra.mxu1 %v695_v59  ;;  %450 = vmatprep.subr.bf16.mxu0 %v696_v60 }
  0x39   :  { %491 = vmatprep.subr.bf16.mxu1 %v698_v61 }
  0x3b   :  { %451 = vmatpush1.bf16.msra.mxu0 %v700_v62 }
  0x3c   :  { %492 = vmatpush1.bf16.msra.mxu1 %v701_v63  ;;  %452 = vmatprep.subr.bf16.mxu0 %v702_v0 }
  0x3d   :  { %493 = vmatprep.subr.bf16.mxu1 %v704_v1 }
  0x3f   :  { %453 = vmatpush1.bf16.msra.mxu0 %v706_v2 }
  0x40   :  { %494 = vmatpush1.bf16.msra.mxu1 %v707_v3 }
  0x42   :  { %455 = vmatmul.mubr.bf16.vlgmr.msra.gmra.mrb[0].mxu0 %v542_v4 }
  0x43   :  { %496 = vmatmul.mubr.bf16.vlgmr.msra.gmra.mrb[0].mxu1 %v544_v5 }
 0x115   :  { %v456_v12 = vpop.f32.mrb[0].mxu0 }
 0x116   :  { %v497_v13 = vpop.f32.mrb[0].mxu1  ;;  %v458_v16 = vpop.f32.mrb[1].mxu0 }
 0x117   :  { %v498_v15 = vadd.f32 %v497_v13, %v456_v12  ;;  %v499_v17 = vpop.f32.mrb[1].mxu1  ;;  %v460_v19 = vpop.f32.mrb[2].mxu0 }
 0x118   :  { %v500_v18 = vadd.f32 %v499_v17, %v458_v16  ;;  %v501_v20 = vpop.f32.mrb[2].mxu1  ;;  %v461_v22 = vpop.f32.mrb[3].mxu0 }
 0x119   :  { %v525_v21 = vadd.f32 %v518_v11, %v498_v15  ;;  %v502_v23 = vpop.f32.mrb[3].mxu1 }
 0x11a   :  { %v526_v24 = vadd.f32 %v522_v14, %v500_v18 }
 0x11b   :  { %v527_v25 = vmax.f32 %v525_v21, 0.0 }
 0x11c   :  { %v528_v26 = vmax.f32 %v526_v24, 0.0 }
 0x11e   :  { %v611_v27 = vpack.c.bf16 %v528_v26, %v527_v25 }
 0x120   :  { %537 = vst [vmem:[%s939_s3] sm:$0xff] %v611_v27 }

// kernel: vade_forward.12
= control target key start
LH: loop header
LB: loop body
LE: loop exit
PB: predicated region body
PF: predicated region fallthrough
CT: control target
= control target key end

     0   :  { %v654_v36 = vmov 0.0   ;;  %vm655_vm0 = vmmov 0   ;;  %vm332_vm1 = vcmask 523264   ;;  %s807_s1 = inlined_call_operand.vmem [shape: bf16[576,128], index: 1, kind: input, shape index: {}]   ;;  %s808_s0 = inlined_call_operand.vmem [shape: bf16[8,576], index: 0, kind: input, shape index: {}]   ;;  %s809_s2 = inlined_call_operand.vmem [shape: f32[1,128], index: 2, kind: input, shape index: {}]   ;;  %s810_s3 = inlined_call_operand.vmem [shape: f32[1,128], index: 3, kind: input, shape index: {}]   ;;  %s811_s4 = inlined_call_operand.vmem [shape: bf16[8,128], index: 4, kind: output, shape index: {}]  }
   0x1   :  { %v611_v0 = vld [vmem:[%s807_s1 + $0x40] sm:$0xff]   ;;  %v615_v4 = vld [vmem:[%s807_s1 + $0x48] sm:$0xff]   ;;  %v619_v8 = vld [vmem:[%s807_s1 + $0x50] sm:$0xff]  }
   0x2   :  { %v612_v1 = vld [vmem:[%s807_s1 + $0xc0] sm:$0xff]   ;;  %548 = vmatprep.subr.bf16.mxu0 %v611_v0  ;;  %v616_v5 = vld [vmem:[%s807_s1 + $0xc8] sm:$0xff]   ;;  %v620_v9 = vld [vmem:[%s807_s1 + $0xd0] sm:$0xff]  }
   0x3   :  { %v613_v2 = vld [vmem:[%s807_s1] sm:$0xff]   ;;  %570 = vmatprep.subr.bf16.mxu1 %v612_v1  ;;  %v617_v6 = vld [vmem:[%s807_s1 + $0x8] sm:$0xff]   ;;  %v621_v10 = vld [vmem:[%s807_s1 + $0x10] sm:$0xff]  }
   0x4   :  { %v614_v3 = vld [vmem:[%s807_s1 + $0x80] sm:$0xff]   ;;  %549 = vmatpush3.bf16.msra.mxu0 %v613_v2  ;;  %v618_v7 = vld [vmem:[%s807_s1 + $0x88] sm:$0xff]   ;;  %v622_v11 = vld [vmem:[%s807_s1 + $0x90] sm:$0xff]  }
   0x5   :  { %571 = vmatpush3.bf16.msra.mxu1 %v614_v3  ;;  %550 = vmatprep.subr.bf16.mxu0 %v615_v4  ;;  %v623_v12 = vld [vmem:[%s807_s1 + $0x58] sm:$0xff]   ;;  %v627_v16 = vld [vmem:[%s807_s1 + $0x60] sm:$0xff]   ;;  %v631_v20 = vld [vmem:[%s807_s1 + $0x68] sm:$0xff]  }
   0x6   :  { %572 = vmatprep.subr.bf16.mxu1 %v616_v5  ;;  %v624_v13 = vld [vmem:[%s807_s1 + $0xd8] sm:$0xff]   ;;  %v628_v17 = vld [vmem:[%s807_s1 + $0xe0] sm:$0xff]   ;;  %v632_v21 = vld [vmem:[%s807_s1 + $0xe8] sm:$0xff]  }
   0x7   :  { %v625_v14 = vld [vmem:[%s807_s1 + $0x18] sm:$0xff]   ;;  %v629_v18 = vld [vmem:[%s807_s1 + $0x20] sm:$0xff]   ;;  %v633_v22 = vld [vmem:[%s807_s1 + $0x28] sm:$0xff]  }
   0x8   :  { %551 = vmatpush3.bf16.msra.mxu0 %v617_v6  ;;  %v626_v15 = vld [vmem:[%s807_s1 + $0x98] sm:$0xff]   ;;  %v630_v19 = vld [vmem:[%s807_s1 + $0xa0] sm:$0xff]   ;;  %v634_v23 = vld [vmem:[%s807_s1 + $0xa8] sm:$0xff]  }
   0x9   :  { %573 = vmatpush3.bf16.msra.mxu1 %v618_v7  ;;  %552 = vmatprep.subr.bf16.mxu0 %v619_v8  ;;  %v635_v24 = vld [vmem:[%s807_s1 + $0x70] sm:$0xff]   ;;  %v639_v28 = vld [vmem:[%s807_s1 + $0x78] sm:$0xff]   ;;  %v24_v32 = vld [vmem:[%s808_s0] sm:$0xff] }
   0xa   :  { %574 = vmatprep.subr.bf16.mxu1 %v620_v9  ;;  %v636_v25 = vld [vmem:[%s807_s1 + $0xf0] sm:$0xff]   ;;  %v640_v29 = vld [vmem:[%s807_s1 + $0xf8] sm:$0xff]   ;;  %v506_v33 = vcombine.low %v24_v32, %v24_v32  ;;  %v507_v34 = vcombine.high %v24_v32, %v24_v32  ;;  %v25_v35 = vld [vmem:[%s808_s0 + $0x8] sm:$0xff] }
   0xb   :  { %v637_v26 = vld [vmem:[%s807_s1 + $0x30] sm:$0xff]   ;;  %v641_v30 = vld [vmem:[%s807_s1 + $0x38] sm:$0xff]   ;;  %v508_v37 = vcombine.low %v25_v35, %v25_v35  ;;  %v509_v38 = vcombine.high %v25_v35, %v25_v35  ;;  %v648_v39 = vld [vmem:[%s807_s1 + $0x100] sm:$0xff]  }
   0xc   :  { %553 = vmatpush3.bf16.msra.mxu0 %v621_v10  ;;  %v638_v27 = vld [vmem:[%s807_s1 + $0xb0] sm:$0xff]   ;;  %v642_v31 = vld [vmem:[%s807_s1 + $0xb8] sm:$0xff]   ;;  %368 = vmatprep.mubr.bf16.mxu0 %v507_v34  ;;  %v649_v40 = vld [vmem:[%s807_s1 + $0x108] sm:$0xff]  }
   0xd   :  { %575 = vmatpush3.bf16.msra.mxu1 %v622_v11  ;;  %554 = vmatprep.subr.bf16.mxu0 %v623_v12  ;;  %v650_v41 = vld [vmem:[%s807_s1 + $0x110] sm:$0xff]   ;;  %v651_v42 = vld [vmem:[%s807_s1 + $0x118] sm:$0xff]  }
   0xe   :  { %576 = vmatprep.subr.bf16.mxu1 %v624_v13  ;;  %408 = vmatprep.mubr.bf16.mxu1 %v509_v38  ;;  %v645_v43 = vld [vmem:[%s808_s0 + $0x10] ss:$0 sps:$4 sm:$0xff]   ;;  %v486_v13 = vlaneseq }
  0x10   :  { %555 = vmatpush3.bf16.msra.mxu0 %v625_v14  ;;  %v487_v14 = vshrl.u32 %v486_v13, 7 }
  0x11   :  { %577 = vmatpush3.bf16.msra.mxu1 %v626_v15  ;;  %556 = vmatprep.subr.bf16.mxu0 %v627_v16  ;;  %v478_v15 = vld [vmem:[%s809_s2] sm:$0x1] }
  0x12   :  { %578 = vmatprep.subr.bf16.mxu1 %v628_v17  ;;  %v488_v16 = vsub.s32 0, %v487_v14 }
  0x14   :  { %557 = vmatpush3.bf16.msra.mxu0 %v629_v18 }
  0x15   :  { %579 = vmatpush3.bf16.msra.mxu1 %v630_v19  ;;  %558 = vmatprep.subr.bf16.mxu0 %v631_v20  ;;  %v482_v19 = vld [vmem:[%s810_s3] sm:$0x1] }
  0x16   :  { %580 = vmatprep.subr.bf16.mxu1 %v632_v21 }
  0x18   :  { %559 = vmatpush3.bf16.msra.mxu0 %v633_v22 }
  0x19   :  { %581 = vmatpush3.bf16.msra.mxu1 %v634_v23  ;;  %560 = vmatprep.subr.bf16.mxu0 %v635_v24 }
  0x1a   :  { %582 = vmatprep.subr.bf16.mxu1 %v636_v25 }
  0x1c   :  { %561 = vmatpush3.bf16.msra.mxu0 %v637_v26 }
  0x1d   :  { %583 = vmatpush3.bf16.msra.mxu1 %v638_v27  ;;  %562 = vmatprep.subr.bf16.mxu0 %v639_v28 }
  0x1e   :  { %584 = vmatprep.subr.bf16.mxu1 %v640_v29 }
  0x20   :  { %563 = vmatpush3.bf16.msra.mxu0 %v641_v30 }
  0x21   :  { %585 = vmatpush3.bf16.msra.mxu1 %v642_v31  ;;  %597 = vmatprep.subr.bf16.mxu0 %v654_v36 }
  0x23   :  { %369 = vmatmul.mubr.bf16.vlgmr.msra.gmra.mrb[0].mxu0 %v506_v33 }
  0x24   :  { %409 = vmatmul.mubr.bf16.vlgmr.msra.gmra.mrb[0].mxu1 %v508_v37  ;;  %598 = vmatpush3.bf16.msra.mxu0 %v648_v39 }
  0x25   :  { %599 = vmatprep.subr.bf16.mxu0 %v654_v36  ;;  %605 = vmatprep.mubr.msk.bf16.mxu0 %vm655_vm0, %v654_v36 }
  0x28   :  { %600 = vmatpush3.bf16.msra.mxu0 %v649_v40 }
  0x29   :  { %601 = vmatprep.subr.bf16.mxu0 %v654_v36 }
  0x2c   :  { %602 = vmatpush3.bf16.msra.mxu0 %v650_v41 }
  0x2d   :  { %603 = vmatprep.subr.bf16.mxu0 %v654_v36 }
  0x30   :  { %604 = vmatpush3.bf16.msra.mxu0 %v651_v42 }
  0x33   :  { %606 = vmatmul.mubr.msk.bf16.vlgmr.msra.gmra.mrb[4].mxu0 %vm332_vm1, %v645_v43 }
  0xf6   :  { %v564_v44 = vpop.f32.mrb[0].mxu0 }
  0xf7   :  { %v586_v45 = vpop.f32.mrb[0].mxu1  ;;  %v565_v46 = vpop.f32.mrb[1].mxu0 }
  0xf8   :  { %v566_v47 = vadd.f32 %v565_v46, %v564_v44  ;;  %v587_v48 = vpop.f32.mrb[1].mxu1  ;;  %v567_v49 = vpop.f32.mrb[2].mxu0 }
  0xf9   :  { %v588_v50 = vadd.f32 %v587_v48, %v586_v45  ;;  %v568_v51 = vpop.f32.mrb[3].mxu0  ;;  %v589_v52 = vpop.f32.mrb[2].mxu1 }
  0xfa   :  { %v590_v53 = vpop.f32.mrb[3].mxu1 }
  0xfb   :  { %v411_v54 = vadd.f32 %v588_v50, %v566_v47 }
 0x106   :  { %v450_v55 = vpop.f32.mrb[4].mxu0 }
 0x107   :  { %v451_v56 = vadd.f32 %v450_v55, %v411_v54  ;;  %v607_v57 = vpop.f32.mrb[5].mxu0 }
 0x108   :  { %v453_v58 = vpop.f32.mrb[6].mxu0 }
 0x109   :  { %v462_v59 = vrot.slane %v451_v56, 4  ;;  %v608_v60 = vpop.f32.mrb[7].mxu0 }
 0x10b   :  { %v463_v61 = vadd.f32 %v462_v59, %v451_v56 }
 0x10d   :  { %v464_v62 = vrot.slane %v463_v61, 2 }
 0x10f   :  { %v465_v63 = vadd.f32 %v464_v62, %v463_v61 }
 0x111   :  { %v466_v0 = vrot.slane %v465_v63, 1 }
 0x113   :  { %v467_v1 = vadd.f32 %v466_v0, %v465_v63 }
 0x115   :  { %v468_v2 = vmul.f32 0.125, %v467_v1 }
 0x117   :  { %v469_v3 = vsub.f32 %v451_v56, %v468_v2 }
 0x119   :  { %v470_v4 = vmul.f32 %v469_v3, %v469_v3 }
 0x11b   :  { %v471_v5 = vrot.slane %v470_v4, 4 }
 0x11d   :  { %v472_v6 = vadd.f32 %v471_v5, %v470_v4 }
 0x11f   :  { %v473_v7 = vrot.slane %v472_v6, 2 }
 0x121   :  { %v474_v8 = vadd.f32 %v473_v7, %v472_v6 }
 0x123   :  { %v475_v9 = vrot.slane %v474_v8, 1 }
 0x125   :  { %v476_v10 = vadd.f32 %v475_v9, %v474_v8 }
 0x127   :  { %v477_v11 = vmul.f32 0.125, %v476_v10 }
 0x129   :  { %v479_v12 = vadd.f32 1e-05, %v477_v11 }
 0x12b   :  { %652 = vrsqrt.f32 %v479_v12 }
 0x135   :  { %v653_v17 = vpop.eup %652 }
 0x136   :  { %v481_v18 = vmul.f32 %v653_v17, %v478_v15 }
 0x138   :  { %v483_v20 = vmul.f32 %v481_v18, %v468_v2  ;;  %v489_v21 = vrot.slane %v481_v18, %v488_v16 }
 0x13a   :  { %v484_v22 = vsub.f32 %v482_v19, %v483_v20  ;;  %v491_v23 = vmul.f32 %v489_v21, %v451_v56 }
 0x13c   :  { %v496_v24 = vrot.slane %v484_v22, %v488_v16 }
 0x13e   :  { %v498_v25 = vadd.f32 %v496_v24, %v491_v23 }
 0x140   :  { %v499_v26 = vmax.f32 %v498_v25, 0.0 }
 0x142   :  { %v500_v27 = vpack.c.bf16 %v499_v26, %v499_v26 }
 0x144   :  { %501 = vst [vmem:[%s811_s4] sm:$0xf] %v500_v27 }

// kernel: vade_forward.15
= control target key start
LH: loop header
LB: loop body
LE: loop exit
PB: predicated region body
PF: predicated region fallthrough
CT: control target
= control target key end

     0   :  { %v242_v1 = vmov 0   ;;  %v172_v18 = vlaneseq  ;;  %s320_s1 = inlined_call_operand.vmem [shape: bf16[128,256], index: 1, kind: input, shape index: {}]   ;;  %s321_s0 = inlined_call_operand.vmem [shape: bf16[8,128], index: 0, kind: input, shape index: {}]   ;;  %s322_s2 = inlined_call_operand.vmem [shape: f32[1,256], index: 2, kind: input, shape index: {}]   ;;  %s323_s3 = inlined_call_operand.vmem [shape: bf16[8,256], index: 3, kind: output, shape index: {}]  }
   0x1   :  { %v218_v0 = vld [vmem:[%s320_s1 + $0x4] ss:$8 sps:$4 sm:$0xff]   ;;  %152 = vmatprep.mubr.bf16.mxu0 %v242_v1  ;;  %v220_v2 = vld [vmem:[%s320_s1] ss:$8 sps:$4 sm:$0xff]   ;;  %v221_v3 = vld [vmem:[%s320_s1 + $0x14] ss:$8 sps:$4 sm:$0xff]  }
   0x2   :  { %120 = vmatprep.subr.bf16.mxu0 %v218_v0  ;;  %v223_v4 = vld [vmem:[%s320_s1 + $0x10] ss:$8 sps:$4 sm:$0xff]   ;;  %v224_v5 = vld [vmem:[%s320_s1 + $0x24] ss:$8 sps:$4 sm:$0xff]   ;;  %v226_v6 = vld [vmem:[%s320_s1 + $0x20] ss:$8 sps:$4 sm:$0xff]  }
   0x3   :  { %121 = vmatpush1.bf16.msra.mxu0 %v220_v2  ;;  %v227_v7 = vld [vmem:[%s320_s1 + $0x34] ss:$8 sps:$4 sm:$0xff]   ;;  %v229_v8 = vld [vmem:[%s320_s1 + $0x30] ss:$8 sps:$4 sm:$0xff]   ;;  %v230_v9 = vld [vmem:[%s320_s1 + $0x44] ss:$8 sps:$4 sm:$0xff]  }
   0x4   :  { %122 = vmatprep.subr.bf16.mxu0 %v221_v3  ;;  %v232_v10 = vld [vmem:[%s320_s1 + $0x40] ss:$8 sps:$4 sm:$0xff]   ;;  %v233_v11 = vld [vmem:[%s320_s1 + $0x54] ss:$8 sps:$4 sm:$0xff]   ;;  %v235_v12 = vld [vmem:[%s320_s1 + $0x50] ss:$8 sps:$4 sm:$0xff]  }
   0x5   :  { %v236_v13 = vld [vmem:[%s320_s1 + $0x64] ss:$8 sps:$4 sm:$0xff]   ;;  %v238_v14 = vld [vmem:[%s320_s1 + $0x60] ss:$8 sps:$4 sm:$0xff]   ;;  %v239_v15 = vld [vmem:[%s320_s1 + $0x74] ss:$8 sps:$4 sm:$0xff]  }
   0x6   :  { %v241_v16 = vld [vmem:[%s320_s1 + $0x70] ss:$8 sps:$4 sm:$0xff]   ;;  %v23_v17 = vld [vmem:[%s321_s0] sm:$0xf]  ;;  %v173_v19 = vshrl.u32 %v172_v18, 7 }
   0x7   :  { %123 = vmatpush1.bf16.msra.mxu0 %v223_v4  ;;  %v170_v21 = vld [vmem:[%s322_s2] sm:$0x3] }
   0x8   :  { %124 = vmatprep.subr.bf16.mxu0 %v224_v5  ;;  %v174_v20 = vsub.s32 0, %v173_v19  ;;  %v178_v22 = vsub.s32 1, %v173_v19 }
   0xa   :  { %v175_v23 = vrot.slane %v170_v21, %v174_v20  ;;  %v179_v24 = vrot.slane %v170_v21, %v178_v22 }
   0xb   :  { %125 = vmatpush1.bf16.msra.mxu0 %v226_v6 }
   0xc   :  { %126 = vmatprep.subr.bf16.mxu0 %v227_v7 }
   0xf   :  { %127 = vmatpush1.bf16.msra.mxu0 %v229_v8 }
  0x10   :  { %128 = vmatprep.subr.bf16.mxu0 %v230_v9 }
  0x13   :  { %129 = vmatpush1.bf16.msra.mxu0 %v232_v10 }
  0x14   :  { %130 = vmatprep.subr.bf16.mxu0 %v233_v11 }
  0x17   :  { %131 = vmatpush1.bf16.msra.mxu0 %v235_v12 }
  0x18   :  { %132 = vmatprep.subr.bf16.mxu0 %v236_v13 }
  0x1b   :  { %133 = vmatpush1.bf16.msra.mxu0 %v238_v14 }
  0x1c   :  { %134 = vmatprep.subr.bf16.mxu0 %v239_v15 }
  0x1f   :  { %135 = vmatpush1.bf16.msra.mxu0 %v241_v16 }
  0x22   :  { %153 = vmatmul.mubr.bf16.vlgmr.msra.gmra.mrb[0].mxu0 %v23_v17 }
  0xf5   :  { %v154_v25 = vpop.f32.mrb[0].mxu0 }
  0xf6   :  { %v182_v26 = vadd.f32 %v175_v23, %v154_v25  ;;  %v156_v27 = vpop.f32.mrb[1].mxu0 }
  0xf7   :  { %v183_v28 = vadd.f32 %v179_v24, %v156_v27  ;;  %v158_v29 = vpop.f32.mrb[2].mxu0 }
  0xf8   :  { %v184_v30 = vmax.f32 %v182_v26, 0.0  ;;  %v159_v31 = vpop.f32.mrb[3].mxu0 }
  0xf9   :  { %v185_v32 = vmax.f32 %v183_v28, 0.0 }
  0xfb   :  { %v216_v33 = vpack.c.bf16 %v185_v32, %v184_v30 }
  0xfd   :  { %194 = vst [vmem:[%s323_s3] sm:$0xff] %v216_v33 }

// kernel: vade_forward.16
= control target key start
LH: loop header
LB: loop body
LE: loop exit
PB: predicated region body
PF: predicated region fallthrough
CT: control target
= control target key end

     0   :  { %s959_s1 = inlined_call_operand.vmem [shape: bf16[256,512], index: 1, kind: input, shape index: {}]   ;;  %s960_s0 = inlined_call_operand.vmem [shape: bf16[8,256], index: 0, kind: input, shape index: {}]   ;;  %s961_s2 = inlined_call_operand.vmem [shape: f32[1,512], index: 2, kind: input, shape index: {}]   ;;  %s962_s3 = inlined_call_operand.vmem [shape: bf16[8,512], index: 3, kind: output, shape index: {}]  }
   0x1   :  { %v637_v0 = vld [vmem:[%s959_s1 + $0x4] ss:$16 sps:$4 sm:$0xff]   ;;  %v639_v1 = vld [vmem:[%s959_s1 + $0xc] ss:$16 sps:$4 sm:$0xff]   ;;  %v641_v2 = vld [vmem:[%s959_s1] ss:$16 sps:$4 sm:$0xff]  }
   0x2   :  { %418 = vmatprep.subr.bf16.mxu0 %v637_v0  ;;  %v642_v3 = vld [vmem:[%s959_s1 + $0x8] ss:$16 sps:$4 sm:$0xff]   ;;  %459 = vmatprep.subr.bf16.mxu1 %v639_v1  ;;  %v643_v4 = vld [vmem:[%s959_s1 + $0x24] ss:$16 sps:$4 sm:$0xff]   ;;  %v645_v5 = vld [vmem:[%s959_s1 + $0x2c] ss:$16 sps:$4 sm:$0xff]  }
   0x3   :  { %419 = vmatpush1.bf16.msra.mxu0 %v641_v2  ;;  %460 = vmatpush1.bf16.msra.mxu1 %v642_v3  ;;  %v647_v6 = vld [vmem:[%s959_s1 + $0x20] ss:$16 sps:$4 sm:$0xff]   ;;  %v648_v7 = vld [vmem:[%s959_s1 + $0x28] ss:$16 sps:$4 sm:$0xff]   ;;  %v649_v8 = vld [vmem:[%s959_s1 + $0x44] ss:$16 sps:$4 sm:$0xff]   ;;  %v517_v3 = vlaneseq }
   0x4   :  { %420 = vmatprep.subr.bf16.mxu0 %v643_v4  ;;  %461 = vmatprep.subr.bf16.mxu1 %v645_v5  ;;  %v651_v9 = vld [vmem:[%s959_s1 + $0x4c] ss:$16 sps:$4 sm:$0xff]   ;;  %v653_v10 = vld [vmem:[%s959_s1 + $0x40] ss:$16 sps:$4 sm:$0xff]   ;;  %v654_v11 = vld [vmem:[%s959_s1 + $0x48] ss:$16 sps:$4 sm:$0xff]  }
   0x5   :  { %v655_v12 = vld [vmem:[%s959_s1 + $0x64] ss:$16 sps:$4 sm:$0xff]   ;;  %v657_v13 = vld [vmem:[%s959_s1 + $0x6c] ss:$16 sps:$4 sm:$0xff]   ;;  %v659_v14 = vld [vmem:[%s959_s1 + $0x60] ss:$16 sps:$4 sm:$0xff]  }
   0x6   :  { %v660_v15 = vld [vmem:[%s959_s1 + $0x68] ss:$16 sps:$4 sm:$0xff]   ;;  %v661_v16 = vld [vmem:[%s959_s1 + $0x84] ss:$16 sps:$4 sm:$0xff]   ;;  %v663_v17 = vld [vmem:[%s959_s1 + $0x8c] ss:$16 sps:$4 sm:$0xff]  }
   0x7   :  { %421 = vmatpush1.bf16.msra.mxu0 %v647_v6  ;;  %462 = vmatpush1.bf16.msra.mxu1 %v648_v7  ;;  %v665_v18 = vld [vmem:[%s959_s1 + $0x80] ss:$16 sps:$4 sm:$0xff]   ;;  %v666_v19 = vld [vmem:[%s959_s1 + $0x88] ss:$16 sps:$4 sm:$0xff]   ;;  %v667_v20 = vld [vmem:[%s959_s1 + $0xa4] ss:$16 sps:$4 sm:$0xff]  }
   0x8   :  { %422 = vmatprep.subr.bf16.mxu0 %v649_v8  ;;  %463 = vmatprep.subr.bf16.mxu1 %v651_v9  ;;  %v669_v21 = vld [vmem:[%s959_s1 + $0xac] ss:$16 sps:$4 sm:$0xff]   ;;  %v671_v22 = vld [vmem:[%s959_s1 + $0xa0] ss:$16 sps:$4 sm:$0xff]   ;;  %v672_v23 = vld [vmem:[%s959_s1 + $0xa8] ss:$16 sps:$4 sm:$0xff]  }
   0x9   :  { %v673_v24 = vld [vmem:[%s959_s1 + $0xc4] ss:$16 sps:$4 sm:$0xff]   ;;  %v675_v25 = vld [vmem:[%s959_s1 + $0xcc] ss:$16 sps:$4 sm:$0xff]   ;;  %v677_v26 = vld [vmem:[%s959_s1 + $0xc0] ss:$16 sps:$4 sm:$0xff]  }
   0xa   :  { %v678_v27 = vld [vmem:[%s959_s1 + $0xc8] ss:$16 sps:$4 sm:$0xff]   ;;  %v679_v28 = vld [vmem:[%s959_s1 + $0xe4] ss:$16 sps:$4 sm:$0xff]   ;;  %v681_v29 = vld [vmem:[%s959_s1 + $0xec] ss:$16 sps:$4 sm:$0xff]  }
   0xb   :  { %423 = vmatpush1.bf16.msra.mxu0 %v653_v10  ;;  %464 = vmatpush1.bf16.msra.mxu1 %v654_v11  ;;  %v683_v30 = vld [vmem:[%s959_s1 + $0xe0] ss:$16 sps:$4 sm:$0xff]   ;;  %v684_v31 = vld [vmem:[%s959_s1 + $0xe8] ss:$16 sps:$4 sm:$0xff]   ;;  %v685_v32 = vld [vmem:[%s959_s1 + $0x104] ss:$16 sps:$4 sm:$0xff]  }
   0xc   :  { %424 = vmatprep.subr.bf16.mxu0 %v655_v12  ;;  %465 = vmatprep.subr.bf16.mxu1 %v657_v13  ;;  %v687_v33 = vld [vmem:[%s959_s1 + $0x10c] ss:$16 sps:$4 sm:$0xff]   ;;  %v689_v34 = vld [vmem:[%s959_s1 + $0x100] ss:$16 sps:$4 sm:$0xff]   ;;  %v690_v35 = vld [vmem:[%s959_s1 + $0x108] ss:$16 sps:$4 sm:$0xff]  }
   0xd   :  { %v691_v36 = vld [vmem:[%s959_s1 + $0x124] ss:$16 sps:$4 sm:$0xff]   ;;  %v693_v37 = vld [vmem:[%s959_s1 + $0x12c] ss:$16 sps:$4 sm:$0xff]   ;;  %v695_v38 = vld [vmem:[%s959_s1 + $0x120] ss:$16 sps:$4 sm:$0xff]  }
   0xe   :  { %v696_v39 = vld [vmem:[%s959_s1 + $0x128] ss:$16 sps:$4 sm:$0xff]   ;;  %v697_v40 = vld [vmem:[%s959_s1 + $0x144] ss:$16 sps:$4 sm:$0xff]   ;;  %v699_v41 = vld [vmem:[%s959_s1 + $0x14c] ss:$16 sps:$4 sm:$0xff]  }
   0xf   :  { %425 = vmatpush1.bf16.msra.mxu0 %v659_v14  ;;  %466 = vmatpush1.bf16.msra.mxu1 %v660_v15  ;;  %v701_v42 = vld [vmem:[%s959_s1 + $0x140] ss:$16 sps:$4 sm:$0xff]   ;;  %v702_v43 = vld [vmem:[%s959_s1 + $0x148] ss:$16 sps:$4 sm:$0xff]   ;;  %v703_v44 = vld [vmem:[%s959_s1 + $0x164] ss:$16 sps:$4 sm:$0xff]  }
  0x10   :  { %426 = vmatprep.subr.bf16.mxu0 %v661_v16  ;;  %467 = vmatprep.subr.bf16.mxu1 %v663_v17  ;;  %v705_v45 = vld [vmem:[%s959_s1 + $0x16c] ss:$16 sps:$4 sm:$0xff]   ;;  %v26_v46 = vld [vmem:[%s960_s0] sm:$0xff]  ;;  %v708_v49 = vld [vmem:[%s959_s1 + $0x168] ss:$16 sps:$4 sm:$0xff]   ;;  %v518_v4 = vshrl.u32 %v517_v3, 7 }
  0x11   :  { %v568_v47 = vcombine.high %v26_v46, %v26_v46  ;;  %v707_v48 = vld [vmem:[%s959_s1 + $0x160] ss:$16 sps:$4 sm:$0xff]   ;;  %v709_v50 = vld [vmem:[%s959_s1 + $0x184] ss:$16 sps:$4 sm:$0xff]   ;;  %v711_v51 = vld [vmem:[%s959_s1 + $0x18c] ss:$16 sps:$4 sm:$0xff]   ;;  %v567_v2 = vcombine.low %v26_v46, %v26_v46 }
  0x12   :  { %v713_v52 = vld [vmem:[%s959_s1 + $0x180] ss:$16 sps:$4 sm:$0xff]   ;;  %v714_v53 = vld [vmem:[%s959_s1 + $0x188] ss:$16 sps:$4 sm:$0xff]   ;;  %v715_v54 = vld [vmem:[%s959_s1 + $0x1a4] ss:$16 sps:$4 sm:$0xff]  }
  0x13   :  { %427 = vmatpush1.bf16.msra.mxu0 %v665_v18  ;;  %468 = vmatpush1.bf16.msra.mxu1 %v666_v19  ;;  %v717_v55 = vld [vmem:[%s959_s1 + $0x1ac] ss:$16 sps:$4 sm:$0xff]   ;;  %v719_v56 = vld [vmem:[%s959_s1 + $0x1a0] ss:$16 sps:$4 sm:$0xff]   ;;  %v720_v57 = vld [vmem:[%s959_s1 + $0x1a8] ss:$16 sps:$4 sm:$0xff]  }
  0x14   :  { %428 = vmatprep.subr.bf16.mxu0 %v667_v20  ;;  %469 = vmatprep.subr.bf16.mxu1 %v669_v21  ;;  %v721_v58 = vld [vmem:[%s959_s1 + $0x1c4] ss:$16 sps:$4 sm:$0xff]   ;;  %v723_v59 = vld [vmem:[%s959_s1 + $0x1cc] ss:$16 sps:$4 sm:$0xff]   ;;  %v725_v60 = vld [vmem:[%s959_s1 + $0x1c0] ss:$16 sps:$4 sm:$0xff]  }
  0x15   :  { %450 = vmatprep.mubr.bf16.mxu0 %v568_v47  ;;  %491 = vmatprep.mubr.bf16.mxu1 %v568_v47  ;;  %v726_v61 = vld [vmem:[%s959_s1 + $0x1c8] ss:$16 sps:$4 sm:$0xff]   ;;  %v727_v62 = vld [vmem:[%s959_s1 + $0x1e4] ss:$16 sps:$4 sm:$0xff]   ;;  %v729_v63 = vld [vmem:[%s959_s1 + $0x1ec] ss:$16 sps:$4 sm:$0xff]  }
  0x16   :  { %v731_v0 = vld [vmem:[%s959_s1 + $0x1e0] ss:$16 sps:$4 sm:$0xff]   ;;  %v732_v1 = vld [vmem:[%s959_s1 + $0x1e8] ss:$16 sps:$4 sm:$0xff]   ;;  %v519_v5 = vsub.s32 0, %v518_v4  ;;  %v527_v6 = vsub.s32 2, %v518_v4 }
  0x17   :  { %429 = vmatpush1.bf16.msra.mxu0 %v671_v22  ;;  %470 = vmatpush1.bf16.msra.mxu1 %v672_v23  ;;  %v515_v7 = vld [vmem:[%s961_s2] sm:$0xf]  ;;  %v523_v8 = vsub.s32 1, %v518_v4  ;;  %v531_v9 = vsub.s32 3, %v518_v4 }
  0x18   :  { %430 = vmatprep.subr.bf16.mxu0 %v673_v24  ;;  %471 = vmatprep.subr.bf16.mxu1 %v675_v25  ;;  %v520_v10 = vrot.slane %v515_v7, %v519_v5  ;;  %v528_v11 = vrot.slane %v515_v7, %v527_v6 }
  0x19   :  { %v524_v12 = vrot.slane %v515_v7, %v523_v8  ;;  %v532_v13 = vrot.slane %v515_v7, %v531_v9 }
  0x1b   :  { %431 = vmatpush1.bf16.msra.mxu0 %v677_v26  ;;  %472 = vmatpush1.bf16.msra.mxu1 %v678_v27 }
  0x1c   :  { %432 = vmatprep.subr.bf16.mxu0 %v679_v28  ;;  %473 = vmatprep.subr.bf16.mxu1 %v681_v29 }
  0x1f   :  { %433 = vmatpush1.bf16.msra.mxu0 %v683_v30  ;;  %474 = vmatpush1.bf16.msra.mxu1 %v684_v31 }
  0x20   :  { %434 = vmatprep.subr.bf16.mxu0 %v685_v32  ;;  %475 = vmatprep.subr.bf16.mxu1 %v687_v33 }
  0x23   :  { %435 = vmatpush1.bf16.msra.mxu0 %v689_v34  ;;  %476 = vmatpush1.bf16.msra.mxu1 %v690_v35 }
  0x24   :  { %436 = vmatprep.subr.bf16.mxu0 %v691_v36  ;;  %477 = vmatprep.subr.bf16.mxu1 %v693_v37 }
  0x27   :  { %437 = vmatpush1.bf16.msra.mxu0 %v695_v38  ;;  %478 = vmatpush1.bf16.msra.mxu1 %v696_v39 }
  0x28   :  { %438 = vmatprep.subr.bf16.mxu0 %v697_v40  ;;  %479 = vmatprep.subr.bf16.mxu1 %v699_v41 }
  0x2b   :  { %439 = vmatpush1.bf16.msra.mxu0 %v701_v42  ;;  %480 = vmatpush1.bf16.msra.mxu1 %v702_v43 }
  0x2c   :  { %440 = vmatprep.subr.bf16.mxu0 %v703_v44  ;;  %481 = vmatprep.subr.bf16.mxu1 %v705_v45 }
  0x2f   :  { %441 = vmatpush1.bf16.msra.mxu0 %v707_v48  ;;  %482 = vmatpush1.bf16.msra.mxu1 %v708_v49 }
  0x30   :  { %442 = vmatprep.subr.bf16.mxu0 %v709_v50  ;;  %483 = vmatprep.subr.bf16.mxu1 %v711_v51 }
  0x33   :  { %443 = vmatpush1.bf16.msra.mxu0 %v713_v52  ;;  %484 = vmatpush1.bf16.msra.mxu1 %v714_v53 }
  0x34   :  { %444 = vmatprep.subr.bf16.mxu0 %v715_v54  ;;  %485 = vmatprep.subr.bf16.mxu1 %v717_v55 }
  0x37   :  { %445 = vmatpush1.bf16.msra.mxu0 %v719_v56  ;;  %486 = vmatpush1.bf16.msra.mxu1 %v720_v57 }
  0x38   :  { %446 = vmatprep.subr.bf16.mxu0 %v721_v58  ;;  %487 = vmatprep.subr.bf16.mxu1 %v723_v59 }
  0x3b   :  { %447 = vmatpush1.bf16.msra.mxu0 %v725_v60  ;;  %488 = vmatpush1.bf16.msra.mxu1 %v726_v61 }
  0x3c   :  { %448 = vmatprep.subr.bf16.mxu0 %v727_v62  ;;  %489 = vmatprep.subr.bf16.mxu1 %v729_v63 }
  0x3f   :  { %449 = vmatpush1.bf16.msra.mxu0 %v731_v0  ;;  %490 = vmatpush1.bf16.msra.mxu1 %v732_v1 }
  0x42   :  { %451 = vmatmul.mubr.bf16.vlgmr.msra.gmra.mrb[0].mxu0 %v567_v2  ;;  %492 = vmatmul.mubr.bf16.vlgmr.msra.gmra.mrb[0].mxu1 %v567_v2 }
 0x115   :  { %v452_v14 = vpop.f32.mrb[0].mxu0  ;;  %v493_v15 = vpop.f32.mrb[0].mxu1 }
 0x116   :  { %v537_v16 = vadd.f32 %v520_v10, %v452_v14  ;;  %v539_v17 = vadd.f32 %v528_v11, %v493_v15  ;;  %v454_v18 = vpop.f32.mrb[1].mxu0  ;;  %v495_v19 = vpop.f32.mrb[1].mxu1 }
 0x117   :  { %v538_v20 = vadd.f32 %v524_v12, %v454_v18  ;;  %v540_v21 = vadd.f32 %v532_v13, %v495_v19  ;;  %v456_v22 = vpop.f32.mrb[2].mxu0  ;;  %v497_v23 = vpop.f32.mrb[2].mxu1 }
 0x118   :  { %v541_v24 = vmax.f32 %v537_v16, 0.0  ;;  %v543_v25 = vmax.f32 %v539_v17, 0.0  ;;  %v457_v26 = vpop.f32.mrb[3].mxu0  ;;  %v498_v27 = vpop.f32.mrb[3].mxu1 }
 0x119   :  { %v542_v28 = vmax.f32 %v538_v20, 0.0  ;;  %v544_v29 = vmax.f32 %v540_v21, 0.0 }
 0x11b   :  { %v635_v30 = vpack.c.bf16 %v542_v28, %v541_v24  ;;  %v636_v31 = vpack.c.bf16 %v544_v29, %v543_v25 }
 0x11d   :  { %561 = vst [vmem:[%s962_s3] sm:$0xff] %v635_v30  ;;  %562 = vst [vmem:[%s962_s3 + $0x8] sm:$0xff] %v636_v31 }

// kernel: vade_forward.17
= control target key start
LH: loop header
LB: loop body
LE: loop exit
PB: predicated region body
PF: predicated region fallthrough
CT: control target
= control target key end

     0   :  { %s1131_s15 = smov 0   ;;  %s1133_s16 = smov 0   ;;  %s1244_s0 = inlined_call_operand.vmem [shape: bf16[32,1152], index: 0, kind: input, shape index: {}]   ;;  %s1245_s1 = inlined_call_operand.vmem [shape: bf16[1152,128], index: 1, kind: input, shape index: {}]   ;;  %s1246_s2 = inlined_call_operand.vmem [shape: f32[1,128], index: 2, kind: input, shape index: {}]   ;;  %s1247_s3 = inlined_call_operand.vmem [shape: f32[1,128], index: 3, kind: input, shape index: {}]   ;;  %s1248_s4 = inlined_call_operand.vmem [shape: bf16[32,128], index: 4, kind: output, shape index: {}]  }
   0x1   :  { %s1135_s17 = smov 0   ;;  %s1137_s18 = smov 0  }
   0x2   :  { %s1139_s19 = smov 0  }
   0x3 LB: > { %s23_s20 = sadd.s32 1, %s1099_s18  ;;  %p40_p1 = scmp.ne.s32.totalorder %s1091_s16, %s1087_s15  ;;  %s1103_s19 = sphi %s1139_s19, %s14_s19   ;;  %s1099_s18 = sphi %s1137_s18, %s1252_s18   ;;  %s1095_s17 = sphi %s1135_s17, %s1251_s17   ;;  %s1091_s16 = sphi %s1133_s16, %s1250_s16   ;;  %s1087_s15 = sphi %s1131_s15, %s1249_s15  }
   0x4   : > { %p24_p0 = scmp.ge.s32.totalorder %s23_s20, 3  ;;  %p41_p2 = scmp.eq.s32.totalorder %s1103_s19, 0 }
   0x5   : > { %s33_s22 = sadd.s32 1, %s1091_s16  ;;  %p863_p5 = scmp.ge.s32.totalorder %s1103_s19, 3 }
   0x6   : > { %s1254_s20 = smov (%p24_p0, %s23_s20), 0  ;;  %p42_p3 = por %p41_p2, %p40_p1 }
   0x7   : > { %s30_s21 = ssub.s32 %s1099_s18, %s1254_s20  ;;  %184 = sbr.rel (%p863_p5) target bundleno = 23 (0x17), region = 24 }
   0x8   : > { %p31_p4 = scmp.eq.s32.totalorder %s30_s21, 0 }
   0xa   : > { %s1166_s23 = scalar_select %p31_p4, %s1091_s16, %s33_s22  }
   0xe   : > { %187 = sbr.rel (!%p42_p3) target bundleno = 23 (0x17), region = 28  ;;  %s189_s24 = sand.u32 (%p42_p3), 1, %s1091_s16  }
   0xf   : > { %s914_s25 = smul.u32 (%p42_p3), 12, %s1099_s18 }
  0x10   : > { %s988_s26 = smul.u32 (%p42_p3), 48, %s189_s24 }
  0x11   : > { %s194_s29 = scalar_lea.vmem (%p42_p3), %s1244_s0, %s914_s25 }
  0x12   : > { %v209_v0 = vld [vmem:[%s194_s29] sm:$0xff] (%p42_p3)  ;;  %v213_v2 = vld [vmem:[%s194_s29 + $0x48] sm:$0xff] (%p42_p3)  ;;  %s191_s30 = scalar_lea.vmem (%p42_p3), [#allocation3], %s988_s26  ;;  %v869_v6 = vld [vmem:[%s194_s29 + $0x50] sm:$0xf] (%p42_p3) }
  0x13   : > { %v211_v1 = vld [vmem:[%s194_s29 + $0x24] sm:$0xff] (%p42_p3)  ;;  %210 = vst [vmem:[%s191_s30] sm:$0xff] (%p42_p3), %v209_v0  ;;  %214 = vst [vmem:[%s191_s30 + $0x18] sm:$0xff] (%p42_p3), %v213_v2  ;;  %v215_v3 = vld [vmem:[%s194_s29 + $0x6c] sm:$0xff] (%p42_p3) }
  0x14   : > { %212 = vst [vmem:[%s191_s30 + $0xc] sm:$0xff] (%p42_p3), %v211_v1  ;;  %v865_v4 = vld [vmem:[%s194_s29 + $0x8] sm:$0xf] (%p42_p3)  ;;  %v867_v5 = vld [vmem:[%s194_s29 + $0x2c] sm:$0xf] (%p42_p3)  ;;  %216 = vst [vmem:[%s191_s30 + $0x24] sm:$0xff] (%p42_p3), %v215_v3 }
  0x15   : > { %866 = vst [vmem:[%s191_s30 + $0x8] sm:$0xf] %v865_v4  ;;  %868 = vst [vmem:[%s191_s30 + $0x14] sm:$0xf] %v867_v5  ;;  %v871_v7 = vld [vmem:[%s194_s29 + $0x74] sm:$0xf] }
  0x16   : > { %870 = vst [vmem:[%s191_s30 + $0x20] sm:$0xf] %v869_v6  ;;  %872 = vst [vmem:[%s191_s30 + $0x2c] sm:$0xf] %v871_v7 }
  0x17 PF: > { %p873_p6 = scmp.ge.s32.totalorder %s1103_s19, 1  ;;  %p248_p7 = scmp.lt.s32.totalorder %s1103_s19, 4 }
  0x19   : > { %p249_p8 = pnand %p873_p6, %p248_p7 }
  0x1a   : > { %s255_s5 = sand.u32 (!%p249_p8), 1, %s1087_s15   ;;  %s294_s6 = smul.u32 (!%p249_p8), 48, %s1095_s17 }
  0x1b   : > { %252 = sbr.rel (%p249_p8) target bundleno = 379 (0x17b), region = 58  ;;  %p875_p10 = scmp.ne.s32.totalorder (!%p249_p8), %s1095_s17, 0 }
  0x1c   : > { %s989_s7 = smul.u32 (!%p249_p8), 48, %s255_s5  ;;  %p295_p9 = scmp.lt.s32.totalorder (!%p249_p8), %s294_s6, 143 }
  0x1e   : > { %s1183_s12 = scalar_lea.vmem (!%p249_p8), [#allocation3], %s989_s7 }
  0x22   : > { %s1256_s6 = smov (!%p295_p9, %s294_s6), 143  ;;  %317 = sbr.rel (%p875_p10) target bundleno = 41 (0x29), region = 66 }
  0x23   : > { %s874_s8 = sshll.u32 %s1256_s6, 2  ;;  %v1105_v8 = vmov (!%p875_p10), 0.0  }
  0x24   : > { %s1181_s11 = scalar_lea.vmem %s1245_s1, %s874_s8  ;;  %318 = vst [vmem:[#allocation2] sm:$0xff] (!%p875_p10), %v1105_v8  ;;  %319 = vst [vmem:[#allocation2 + $0x8] sm:$0xff] (!%p875_p10), %v1105_v8 }
  0x25   : > { %320 = vst [vmem:[#allocation2 + $0x10] sm:$0xff] (!%p875_p10), %v1105_v8  ;;  %321 = vst [vmem:[#allocation2 + $0x18] sm:$0xff] (!%p875_p10), %v1105_v8 }
  0x29 PF: > { %v1031_v9 = vld [vmem:[%s1181_s11 + $0x40] sm:$0xff]   ;;  %v1034_v12 = vld [vmem:[%s1181_s11 + $0x48] sm:$0xff]   ;;  %v1037_v15 = vld [vmem:[%s1181_s11 + $0x50] sm:$0xff]   ;;  %p906_p11 = scmp.ne.s32.totalorder %s1095_s17, 2 }
  0x2a   : > { %v1032_v10 = vld [vmem:[%s1181_s11] sm:$0xff]   ;;  %930 = vmatprep.subr.bf16.mxu0 %v1031_v9  ;;  %v1035_v13 = vld [vmem:[%s1181_s11 + $0x8] sm:$0xff]   ;;  %v1038_v16 = vld [vmem:[%s1181_s11 + $0x10] sm:$0xff]  }
  0x2b   : > { %v1033_v11 = vld [vmem:[%s1181_s11 + $0x80] sm:$0xff]   ;;  %931 = vmatpush3.bf16.msra.mxu0 %v1032_v10  ;;  %v1036_v14 = vld [vmem:[%s1181_s11 + $0x88] sm:$0xff]   ;;  %v1039_v17 = vld [vmem:[%s1181_s11 + $0x90] sm:$0xff]  }
  0x2c   : > { %968 = vmatprep.subr.bf16.mxu1 %v1033_v11  ;;  %932 = vmatprep.subr.bf16.mxu0 %v1034_v12  ;;  %v1040_v18 = vld [vmem:[%s1181_s11 + $0x58] sm:$0xff]   ;;  %v1043_v21 = vld [vmem:[%s1181_s11 + $0x60] sm:$0xff]   ;;  %v1046_v24 = vld [vmem:[%s1181_s11 + $0x68] sm:$0xff]  }
  0x2d   : > { %969 = vmatpush3.bf16.msra.mxu1 %v1033_v11  ;;  %v1041_v19 = vld [vmem:[%s1181_s11 + $0x18] sm:$0xff]   ;;  %v1045_v22 = vld [vmem:[%s1181_s11 + $0xa0] sm:$0xff]   ;;  %v1048_v25 = vld [vmem:[%s1181_s11 + $0xa8] sm:$0xff]  }
  0x2e   : > { %970 = vmatprep.subr.bf16.mxu1 %v1036_v14  ;;  %v1042_v20 = vld [vmem:[%s1181_s11 + $0x98] sm:$0xff]   ;;  %v1044_v23 = vld [vmem:[%s1181_s11 + $0x20] sm:$0xff]   ;;  %v1047_v26 = vld [vmem:[%s1181_s11 + $0x28] sm:$0xff]  }
  0x2f   : > { %933 = vmatpush3.bf16.msra.mxu0 %v1035_v13  ;;  %v1049_v27 = vld [vmem:[%s1181_s11 + $0x70] sm:$0xff]   ;;  %v1052_v30 = vld [vmem:[%s1181_s11 + $0x78] sm:$0xff]   ;;  %v322_v45 = vld [vmem:[#allocation2] sm:$0xff] }
  0x30   : > { %934 = vmatprep.subr.bf16.mxu0 %v1037_v15  ;;  %v1050_v28 = vld [vmem:[%s1181_s11 + $0x30] sm:$0xff]   ;;  %v1054_v31 = vld [vmem:[%s1181_s11 + $0xb8] sm:$0xff]   ;;  %v323_v50 = vld [vmem:[#allocation2 + $0x8] sm:$0xff] }
  0x31   : > { %971 = vmatpush3.bf16.msra.mxu1 %v1036_v14  ;;  %v1051_v29 = vld [vmem:[%s1181_s11 + $0xb0] sm:$0xff]   ;;  %v1053_v34 = vld [vmem:[%s1181_s11 + $0x38] sm:$0xff]  }
  0x32   : > { %972 = vmatprep.subr.bf16.mxu1 %v1039_v17  ;;  %v1057_v32 = vld [vmem:[%s1183_s12 + $0x4] ss:$12 sps:$4 sm:$0xff]   ;;  %v1058_v33 = vld [vmem:[%s1183_s12 + $0x8] ss:$12 sps:$4 sm:$0xff]   ;;  %v1055_v35 = vld [vmem:[%s1183_s12] ss:$12 sps:$4 sm:$0xff]  }
  0x33   : > { %935 = vmatpush3.bf16.msra.mxu0 %v1038_v16  ;;  %590 = vmatprep.mubr.bf16.mxu0 %v1057_v32  ;;  %v1060_v36 = vld [vmem:[%s1183_s12 + $0x1c] ss:$12 sps:$4 sm:$0xff]   ;;  %v1059_v37 = vld [vmem:[%s1183_s12 + $0x20] ss:$12 sps:$4 sm:$0xff]   ;;  %v1062_v38 = vld [vmem:[%s1183_s12 + $0x18] ss:$12 sps:$4 sm:$0xff]  }
  0x34   : > { %936 = vmatprep.subr.bf16.mxu0 %v1040_v18  ;;  %984 = vmatprep.mubr.bf16.mxu1 %v1058_v33  ;;  %v324_v59 = vld [vmem:[#allocation2 + $0x10] sm:$0xff]  ;;  %v325_v63 = vld [vmem:[#allocation2 + $0x18] sm:$0xff] }
  0x35   : > { %973 = vmatpush3.bf16.msra.mxu1 %v1039_v17 }
  0x36   : > { %974 = vmatprep.subr.bf16.mxu1 %v1042_v20 }
  0x37   : > { %937 = vmatpush3.bf16.msra.mxu0 %v1041_v19 }
  0x38   : > { %938 = vmatprep.subr.bf16.mxu0 %v1043_v21 }
  0x39   : > { %975 = vmatpush3.bf16.msra.mxu1 %v1042_v20 }
  0x3a   : > { %976 = vmatprep.subr.bf16.mxu1 %v1045_v22 }
  0x3b   : > { %939 = vmatpush3.bf16.msra.mxu0 %v1044_v23 }
  0x3c   : > { %940 = vmatprep.subr.bf16.mxu0 %v1046_v24 }
  0x3d   : > { %977 = vmatpush3.bf16.msra.mxu1 %v1045_v22 }
  0x3e   : > { %978 = vmatprep.subr.bf16.mxu1 %v1048_v25 }
  0x3f   : > { %941 = vmatpush3.bf16.msra.mxu0 %v1047_v26 }
  0x40   : > { %942 = vmatprep.subr.bf16.mxu0 %v1049_v27 }
  0x41   : > { %979 = vmatpush3.bf16.msra.mxu1 %v1048_v25 }
  0x42   : > { %980 = vmatprep.subr.bf16.mxu1 %v1051_v29 }
  0x43   : > { %943 = vmatpush3.bf16.msra.mxu0 %v1050_v28 }
  0x44   : > { %944 = vmatprep.subr.bf16.mxu0 %v1052_v30 }
  0x45   : > { %981 = vmatpush3.bf16.msra.mxu1 %v1051_v29 }
  0x46   : > { %982 = vmatprep.subr.bf16.mxu1 %v1054_v31 }
  0x47   : > { %945 = vmatpush3.bf16.msra.mxu0 %v1053_v34 }
  0x49   : > { %983 = vmatpush3.bf16.msra.mxu1 %v1054_v31 }
  0x4a   : > { %591 = vmatmul.mubr.bf16.vlgmr.msra.gmra.mrb[0].mxu0 %v1055_v35 }
  0x4b   : > { %598 = vmatprep.mubr.bf16.mxu0 %v1060_v36  ;;  %v708_v36 = vlaneseq (!%p906_p11) }
  0x4c   : > { %985 = vmatmul.mubr.bf16.vlgmr.msra.gmra.mrb[0].mxu1 %v1059_v37 }
  0x4d   : > { %v709_v37 = vshrl.u32 (!%p906_p11), %v708_v36, 7 }
  0x52   : > { %599 = vmatmul.mubr.bf16.gmra.mrb[4].mxu0 %v1062_v38  ;;  %v700_v38 = vld [vmem:[%s1246_s2] sm:$0x1] (!%p906_p11) }
 0x11d   : > { %v946_v39 = vpop.f32.mrb[0].mxu0 }
 0x11e   : > { %v947_v40 = vpop.f32.mrb[1].mxu0 }
 0x11f   : > { %v948_v41 = vadd.f32 %v947_v40, %v946_v39  ;;  %v949_v42 = vpop.f32.mrb[2].mxu0  ;;  %v986_v43 = vpop.f32.mrb[0].mxu1  ;;  %v710_v39 = vsub.s32 (!%p906_p11), 0, %v709_v37 }
 0x120   : > { %v950_v44 = vpop.f32.mrb[3].mxu0  ;;  %v641_v46 = vpop.f32.mrb[1].mxu1 }
 0x121   : > { %v951_v47 = vadd.f32 %v950_v44, %v949_v42  ;;  %v642_v48 = vadd.f32 %v948_v41, %v641_v46  ;;  %v987_v49 = vpop.f32.mrb[2].mxu1  ;;  %v704_v42 = vld [vmem:[%s1247_s3] sm:$0x1] (!%p906_p11) }
 0x122   : > { %v644_v51 = vpop.f32.mrb[3].mxu1 }
 0x123   : > { %v656_v52 = vadd.f32 %v642_v48, %v322_v45  ;;  %v645_v53 = vadd.f32 %v951_v47, %v644_v51 }
 0x125   : > { %660 = vst [vmem:[#allocation2] sm:$0xff] %v656_v52  ;;  %v657_v54 = vadd.f32 %v645_v53, %v323_v50  ;;  %v952_v55 = vpop.f32.mrb[4].mxu0 }
 0x126   : > { %v953_v56 = vpop.f32.mrb[5].mxu0 }
 0x127   : > { %661 = vst [vmem:[#allocation2 + $0x8] sm:$0xff] %v657_v54  ;;  %v954_v57 = vadd.f32 %v953_v56, %v952_v55  ;;  %v955_v58 = vpop.f32.mrb[6].mxu0 }
 0x128   : > { %v956_v60 = vpop.f32.mrb[7].mxu0 }
 0x129   : > { %v650_v61 = vadd.f32 %v986_v43, %v954_v57  ;;  %v957_v62 = vadd.f32 %v956_v60, %v955_v58  ;;  %667 = sbr.rel (%p906_p11) target bundleno = 379 (0x17b), region = 70 }
 0x12b   : > { %v658_v0 = vadd.f32 %v650_v61, %v324_v59  ;;  %v653_v1 = vadd.f32 %v987_v49, %v957_v62 }
 0x12c   : > { %v668_v3 = vld [vmem:[#allocation2] sm:$0xff] (!%p906_p11) }
 0x12d   : > { %662 = vst [vmem:[#allocation2 + $0x10] sm:$0xff] %v658_v0  ;;  %v659_v2 = vadd.f32 %v653_v1, %v325_v63 }
 0x12e   : > { %v669_v4 = vld [vmem:[#allocation2 + $0x8] sm:$0xff] (!%p906_p11) }
 0x12f   : > { %663 = vst [vmem:[#allocation2 + $0x18] sm:$0xff] %v659_v2  ;;  %v672_v6 = vadd.f32 (!%p906_p11), %v669_v4, %v668_v3 }
 0x134   : > { %v670_v5 = vld [vmem:[#allocation2 + $0x10] sm:$0xff] }
 0x135   : > { %v673_v8 = vadd.f32 %v672_v6, %v670_v5 }
 0x136   : > { %v671_v7 = vld [vmem:[#allocation2 + $0x18] sm:$0xff] }
 0x137   : > { %v674_v9 = vadd.f32 %v673_v8, %v671_v7 }
 0x139   : > { %v675_v10 = vrot.slane %v674_v9, 4 }
 0x13b   : > { %v676_v11 = vadd.f32 %v675_v10, %v674_v9 }
 0x13d   : > { %v677_v12 = vrot.slane %v676_v11, 2 }
 0x13f   : > { %v678_v13 = vadd.f32 %v677_v12, %v676_v11 }
 0x141   : > { %v679_v14 = vrot.slane %v678_v13, 1 }
 0x143   : > { %v680_v15 = vadd.f32 %v679_v14, %v678_v13 }
 0x145   : > { %v681_v16 = vmul.f32 0.03125, %v680_v15 }
 0x147   : > { %v682_v17 = vsub.f32 %v668_v3, %v681_v16  ;;  %v683_v18 = vsub.f32 %v669_v4, %v681_v16  ;;  %v684_v19 = vsub.f32 %v670_v5, %v681_v16  ;;  %v685_v20 = vsub.f32 %v671_v7, %v681_v16 }
 0x149   : > { %v686_v21 = vmul.f32 %v682_v17, %v682_v17  ;;  %v687_v22 = vmul.f32 %v683_v18, %v683_v18  ;;  %v688_v23 = vmul.f32 %v684_v19, %v684_v19  ;;  %v689_v24 = vmul.f32 %v685_v20, %v685_v20 }
 0x14b   : > { %v690_v25 = vadd.f32 %v687_v22, %v686_v21 }
 0x14d   : > { %v691_v26 = vadd.f32 %v690_v25, %v688_v23 }
 0x14f   : > { %v692_v27 = vadd.f32 %v691_v26, %v689_v24 }
 0x151   : > { %v693_v28 = vrot.slane %v692_v27, 4 }
 0x153   : > { %v694_v29 = vadd.f32 %v693_v28, %v692_v27 }
 0x155   : > { %v695_v30 = vrot.slane %v694_v29, 2 }
 0x157   : > { %v696_v31 = vadd.f32 %v695_v30, %v694_v29 }
 0x159   : > { %v697_v32 = vrot.slane %v696_v31, 1 }
 0x15b   : > { %v698_v33 = vadd.f32 %v697_v32, %v696_v31 }
 0x15d   : > { %v699_v34 = vmul.f32 0.03125, %v698_v33 }
 0x15f   : > { %v701_v35 = vadd.f32 1e-05, %v699_v34 }
 0x161   : > { %1063 = vrsqrt.f32 %v701_v35 }
 0x16b   : > { %v1064_v40 = vpop.eup %1063 }
 0x16c   : > { %v703_v41 = vmul.f32 %v1064_v40, %v700_v38 }
 0x16e   : > { %v705_v43 = vmul.f32 %v703_v41, %v681_v16  ;;  %v711_v44 = vrot.slane %v703_v41, %v710_v39 }
 0x170   : > { %v706_v45 = vsub.f32 %v704_v42, %v705_v43  ;;  %v713_v46 = vmul.f32 %v711_v44, %v668_v3  ;;  %v714_v47 = vmul.f32 %v711_v44, %v669_v4  ;;  %v715_v48 = vmul.f32 %v711_v44, %v670_v5 }
 0x171   : > { %v716_v49 = vmul.f32 %v711_v44, %v671_v7 }
 0x172   : > { %v721_v50 = vrot.slane %v706_v45, %v710_v39 }
 0x174   : > { %v723_v51 = vadd.f32 %v721_v50, %v713_v46  ;;  %v724_v52 = vadd.f32 %v721_v50, %v714_v47  ;;  %v725_v53 = vadd.f32 %v721_v50, %v715_v48  ;;  %v726_v54 = vadd.f32 %v721_v50, %v716_v49 }
 0x176   : > { %v727_v55 = vmax.f32 %v723_v51, 0.0  ;;  %v728_v56 = vmax.f32 %v724_v52, 0.0  ;;  %v729_v57 = vmax.f32 %v725_v53, 0.0  ;;  %v730_v58 = vmax.f32 %v726_v54, 0.0 }
 0x178   : > { %v922_v59 = vpack.c.bf16 %v728_v56, %v727_v55  ;;  %v927_v60 = vpack.c.bf16 %v730_v58, %v729_v57 }
 0x17a   : > { %923 = vst [vmem:[%s1248_s4] sm:$0xff] %v922_v59   ;;  %929 = vst [vmem:[%s1248_s4 + $0x8] sm:$0xff] %v927_v60  }
 0x17b PF: > { %s14_s19 = sadd.s32 1, %s1103_s19   ;;  %s1249_s15 = smov %s1091_s16 }
 0x17c   : > { %p11_p12 = scmp.ge.s32.totalorder %s14_s19, 5   ;;  %s1250_s16 = smov %s1166_s23 }
 0x17d   : > { %s1251_s17 = smov %s1099_s18  ;;  %s1252_s18 = smov %s1254_s20 }
 0x17e   :  { %13 = sbr.rel (!%p11_p12) target bundleno = 3 (0x3), region = 120 }

// kernel: vade_forward.18
= control target key start
LH: loop header
LB: loop body
LE: loop exit
PB: predicated region body
PF: predicated region fallthrough
CT: control target
= control target key end

     0   :  { %vm590_vm0 = vcmask 523264   ;;  %s2027_s1 = inlined_call_operand.vmem [shape: bf16[576,128], index: 1, kind: input, shape index: {}]   ;;  %s2028_s0 = inlined_call_operand.vmem [shape: bf16[128,576], index: 0, kind: input, shape index: {}]   ;;  %s2029_s2 = inlined_call_operand.vmem [shape: f32[1,128], index: 2, kind: input, shape index: {}]   ;;  %s2030_s3 = inlined_call_operand.vmem [shape: f32[1,128], index: 3, kind: input, shape index: {}]   ;;  %s2031_s4 = inlined_call_operand.vmem [shape: bf16[128,128], index: 4, kind: output, shape index: {}]  }
   0x1   :  { %v1519_v0 = vld [vmem:[%s2027_s1 + $0x40] sm:$0xff]   ;;  %v1523_v4 = vld [vmem:[%s2027_s1 + $0x48] sm:$0xff]   ;;  %v1527_v8 = vld [vmem:[%s2027_s1 + $0x50] sm:$0xff]  }
   0x2   :  { %v1520_v1 = vld [vmem:[%s2027_s1 + $0xc0] sm:$0xff]   ;;  %1347 = vmatprep.subr.bf16.mxu0 %v1519_v0  ;;  %v1524_v5 = vld [vmem:[%s2027_s1 + $0xc8] sm:$0xff]   ;;  %v1528_v9 = vld [vmem:[%s2027_s1 + $0xd0] sm:$0xff]  }
   0x3   :  { %v1521_v2 = vld [vmem:[%s2027_s1] sm:$0xff]   ;;  %1411 = vmatprep.subr.bf16.mxu1 %v1520_v1  ;;  %v1525_v6 = vld [vmem:[%s2027_s1 + $0x8] sm:$0xff]   ;;  %v1529_v10 = vld [vmem:[%s2027_s1 + $0x10] sm:$0xff]  }
   0x4   :  { %v1522_v3 = vld [vmem:[%s2027_s1 + $0x80] sm:$0xff]   ;;  %1348 = vmatpush3.bf16.msra.mxu0 %v1521_v2  ;;  %v1526_v7 = vld [vmem:[%s2027_s1 + $0x88] sm:$0xff]   ;;  %v1530_v11 = vld [vmem:[%s2027_s1 + $0x90] sm:$0xff]  }
   0x5   :  { %1412 = vmatpush3.bf16.msra.mxu1 %v1522_v3  ;;  %1349 = vmatprep.subr.bf16.mxu0 %v1523_v4  ;;  %v1531_v12 = vld [vmem:[%s2027_s1 + $0x58] sm:$0xff]   ;;  %v1535_v16 = vld [vmem:[%s2027_s1 + $0x60] sm:$0xff]   ;;  %v1539_v20 = vld [vmem:[%s2027_s1 + $0x68] sm:$0xff]  }
   0x6   :  { %1413 = vmatprep.subr.bf16.mxu1 %v1524_v5  ;;  %v1532_v13 = vld [vmem:[%s2027_s1 + $0xd8] sm:$0xff]   ;;  %v1536_v17 = vld [vmem:[%s2027_s1 + $0xe0] sm:$0xff]   ;;  %v1540_v21 = vld [vmem:[%s2027_s1 + $0xe8] sm:$0xff]  }
   0x7   :  { %v1533_v14 = vld [vmem:[%s2027_s1 + $0x18] sm:$0xff]   ;;  %v1537_v18 = vld [vmem:[%s2027_s1 + $0x20] sm:$0xff]   ;;  %v1541_v22 = vld [vmem:[%s2027_s1 + $0x28] sm:$0xff]  }
   0x8   :  { %1350 = vmatpush3.bf16.msra.mxu0 %v1525_v6  ;;  %v1534_v15 = vld [vmem:[%s2027_s1 + $0x98] sm:$0xff]   ;;  %v1538_v19 = vld [vmem:[%s2027_s1 + $0xa0] sm:$0xff]   ;;  %v1542_v23 = vld [vmem:[%s2027_s1 + $0xa8] sm:$0xff]  }
   0x9   :  { %1414 = vmatpush3.bf16.msra.mxu1 %v1526_v7  ;;  %1351 = vmatprep.subr.bf16.mxu0 %v1527_v8  ;;  %v1543_v24 = vld [vmem:[%s2027_s1 + $0x70] sm:$0xff]   ;;  %v1547_v28 = vld [vmem:[%s2027_s1 + $0x78] sm:$0xff]   ;;  %v1556_v35 = vld [vmem:[%s2028_s0 + $0xc] ss:$20 sps:$4 sm:$0xff]  }
   0xa   :  { %1415 = vmatprep.subr.bf16.mxu1 %v1528_v9  ;;  %v1544_v25 = vld [vmem:[%s2027_s1 + $0xf0] sm:$0xff]   ;;  %v1548_v29 = vld [vmem:[%s2027_s1 + $0xf8] sm:$0xff]   ;;  %v1557_v36 = vld [vmem:[%s2027_s1 + $0x100] sm:$0xff]   ;;  %744 = vmatprep.mubr.bf16.mxu1 %v1556_v35 }
   0xb   :  { %v1545_v26 = vld [vmem:[%s2027_s1 + $0x30] sm:$0xff]   ;;  %v1549_v30 = vld [vmem:[%s2027_s1 + $0x38] sm:$0xff]   ;;  %v1558_v37 = vld [vmem:[%s2028_s0 + $0x2c] ss:$20 sps:$4 sm:$0xff]  }
   0xc   :  { %1352 = vmatpush3.bf16.msra.mxu0 %v1529_v10  ;;  %v1546_v27 = vld [vmem:[%s2027_s1 + $0xb0] sm:$0xff]   ;;  %v1550_v31 = vld [vmem:[%s2027_s1 + $0xb8] sm:$0xff]   ;;  %v1570_v42 = vld [vmem:[%s2027_s1 + $0x108] sm:$0xff]  }
   0xd   :  { %1416 = vmatpush3.bf16.msra.mxu1 %v1530_v11  ;;  %1353 = vmatprep.subr.bf16.mxu0 %v1531_v12  ;;  %v1551_v32 = vld [vmem:[%s2028_s0] ss:$20 sps:$4 sm:$0xff]   ;;  %v1553_v33 = vld [vmem:[%s2028_s0 + $0x4] ss:$20 sps:$4 sm:$0xff]   ;;  %v1554_v34 = vld [vmem:[%s2028_s0 + $0x8] ss:$20 sps:$4 sm:$0xff]  }
   0xe   :  { %1417 = vmatprep.subr.bf16.mxu1 %v1532_v13  ;;  %647 = vmatprep.mubr.bf16.mxu0 %v1553_v33  ;;  %v1560_v38 = vld [vmem:[%s2028_s0 + $0x34] ss:$20 sps:$4 sm:$0xff]   ;;  %v1563_v40 = vld [vmem:[%s2028_s0 + $0x30] ss:$20 sps:$4 sm:$0xff]   ;;  %v1569_v45 = vld [vmem:[%s2028_s0 + $0x58] ss:$20 sps:$4 sm:$0xff]  }
   0xf   :  { %v1562_v39 = vld [vmem:[%s2028_s0 + $0x28] ss:$20 sps:$4 sm:$0xff]   ;;  %v1568_v44 = vld [vmem:[%s2028_s0 + $0x50] ss:$20 sps:$4 sm:$0xff]   ;;  %v1575_v50 = vld [vmem:[%s2028_s0 + $0x78] ss:$20 sps:$4 sm:$0xff]  }
  0x10   :  { %1354 = vmatpush3.bf16.msra.mxu0 %v1533_v14  ;;  %v1564_v41 = vld [vmem:[%s2028_s0 + $0x54] ss:$20 sps:$4 sm:$0xff]   ;;  %v1566_v43 = vld [vmem:[%s2028_s0 + $0x5c] ss:$20 sps:$4 sm:$0xff]   ;;  %v1573_v48 = vld [vmem:[%s2028_s0 + $0x84] ss:$20 sps:$4 sm:$0xff]  }
  0x11   :  { %1418 = vmatpush3.bf16.msra.mxu1 %v1534_v15  ;;  %1355 = vmatprep.subr.bf16.mxu0 %v1535_v16  ;;  %v1583_v46 = vld [vmem:[%s2027_s1 + $0x110] sm:$0xff]   ;;  %v1596_v49 = vld [vmem:[%s2027_s1 + $0x118] sm:$0xff]   ;;  %v1579_v53 = vld [vmem:[%s2028_s0 + $0xac] ss:$20 sps:$4 sm:$0xff]  }
  0x12   :  { %1419 = vmatprep.subr.bf16.mxu1 %v1536_v17  ;;  %v1571_v47 = vld [vmem:[%s2028_s0 + $0x7c] ss:$20 sps:$4 sm:$0xff]   ;;  %v1576_v51 = vld [vmem:[%s2028_s0 + $0x80] ss:$20 sps:$4 sm:$0xff]   ;;  %v1577_v52 = vld [vmem:[%s2028_s0 + $0xa4] ss:$20 sps:$4 sm:$0xff]  }
  0x13   :  { %v1581_v54 = vld [vmem:[%s2028_s0 + $0xa0] ss:$20 sps:$4 sm:$0xff]   ;;  %v1582_v55 = vld [vmem:[%s2028_s0 + $0xa8] ss:$20 sps:$4 sm:$0xff]   ;;  %v1589_v59 = vld [vmem:[%s2028_s0 + $0xd0] ss:$20 sps:$4 sm:$0xff]  }
  0x14   :  { %1356 = vmatpush3.bf16.msra.mxu0 %v1537_v18  ;;  %v1584_v56 = vld [vmem:[%s2028_s0 + $0xcc] ss:$20 sps:$4 sm:$0xff]   ;;  %v1586_v57 = vld [vmem:[%s2028_s0 + $0xd4] ss:$20 sps:$4 sm:$0xff]   ;;  %v1592_v61 = vld [vmem:[%s2028_s0 + $0xfc] ss:$20 sps:$4 sm:$0xff]  }
  0x15   :  { %1420 = vmatpush3.bf16.msra.mxu1 %v1538_v19  ;;  %1357 = vmatprep.subr.bf16.mxu0 %v1539_v20  ;;  %v1588_v58 = vld [vmem:[%s2028_s0 + $0xc8] ss:$20 sps:$4 sm:$0xff]   ;;  %v1594_v62 = vld [vmem:[%s2028_s0 + $0xf0] ss:$20 sps:$4 sm:$0xff]   ;;  %v1595_v63 = vld [vmem:[%s2028_s0 + $0xf8] ss:$20 sps:$4 sm:$0xff]  }
  0x16   :  { %1421 = vmatprep.subr.bf16.mxu1 %v1540_v21  ;;  %v1590_v60 = vld [vmem:[%s2028_s0 + $0xf4] ss:$20 sps:$4 sm:$0xff]   ;;  %v1597_v0 = vld [vmem:[%s2028_s0 + $0x11c] ss:$20 sps:$4 sm:$0xff]   ;;  %v1599_v1 = vld [vmem:[%s2028_s0 + $0x124] ss:$20 sps:$4 sm:$0xff]  }
  0x17   :  { %v1601_v2 = vld [vmem:[%s2028_s0 + $0x118] ss:$20 sps:$4 sm:$0xff]   ;;  %v1602_v3 = vld [vmem:[%s2028_s0 + $0x120] ss:$20 sps:$4 sm:$0xff]   ;;  %v1603_v4 = vld [vmem:[%s2028_s0 + $0x10] ss:$20 sps:$4 sm:$0xff]  }
  0x18   :  { %1358 = vmatpush3.bf16.msra.mxu0 %v1541_v22  ;;  %v1604_v5 = vld [vmem:[%s2028_s0 + $0xb0] ss:$20 sps:$4 sm:$0xff]   ;;  %v1605_v6 = vld [vmem:[%s2028_s0 + $0x38] ss:$20 sps:$4 sm:$0xff]   ;;  %v1607_v8 = vld [vmem:[%s2028_s0 + $0x60] ss:$20 sps:$4 sm:$0xff]  }
  0x19   :  { %1422 = vmatpush3.bf16.msra.mxu1 %v1542_v23  ;;  %1359 = vmatprep.subr.bf16.mxu0 %v1543_v24  ;;  %v1606_v7 = vld [vmem:[%s2028_s0 + $0xd8] ss:$20 sps:$4 sm:$0xff]   ;;  %v1608_v9 = vld [vmem:[%s2028_s0 + $0x100] ss:$20 sps:$4 sm:$0xff]   ;;  %v1609_v10 = vld [vmem:[%s2028_s0 + $0x88] ss:$20 sps:$4 sm:$0xff]  }
  0x1a   :  { %1423 = vmatprep.subr.bf16.mxu1 %v1544_v25  ;;  %v1610_v11 = vld [vmem:[%s2028_s0 + $0x128] ss:$20 sps:$4 sm:$0xff]  }
  0x1c   :  { %1360 = vmatpush3.bf16.msra.mxu0 %v1545_v26 }
  0x1d   :  { %1424 = vmatpush3.bf16.msra.mxu1 %v1546_v27  ;;  %1361 = vmatprep.subr.bf16.mxu0 %v1547_v28 }
  0x1e   :  { %1425 = vmatprep.subr.bf16.mxu1 %v1548_v29 }
  0x20   :  { %1362 = vmatpush3.bf16.msra.mxu0 %v1549_v30 }
  0x21   :  { %1426 = vmatpush3.bf16.msra.mxu1 %v1550_v31  ;;  %1487 = vmatprep.subr.bf16.mxu0 %v1557_v36 }
  0x22   :  { %1511 = vmatprep.subr.bf16.mxu1 %v1557_v36 }
  0x23   :  { %648 = vmatmul.mubr.bf16.vlgmr.msra.gmra.mrb[0].mxu0 %v1551_v32 }
  0x24   :  { %745 = vmatmul.mubr.bf16.vlgmr.msra.gmra.mrb[0].mxu1 %v1554_v34  ;;  %1488 = vmatpush3.bf16.msra.mxu0 %v1557_v36 }
  0x25   :  { %655 = vmatprep.mubr.bf16.mxu0 %v1558_v37  ;;  %752 = vmatprep.mubr.bf16.mxu1 %v1560_v38 }
  0x26   :  { %1515 = vmatpush3.bf16.msra.mxu1 %v1557_v36  ;;  %1489 = vmatprep.subr.bf16.mxu0 %v1570_v42 }
  0x27   :  { %1512 = vmatprep.subr.bf16.mxu1 %v1570_v42 }
  0x28   :  { %1490 = vmatpush3.bf16.msra.mxu0 %v1570_v42 }
  0x29   :  { %1491 = vmatprep.subr.bf16.mxu0 %v1583_v46 }
  0x2a   :  { %1516 = vmatpush3.bf16.msra.mxu1 %v1570_v42 }
  0x2b   :  { %656 = vmatmul.mubr.bf16.gmra.mrb[4].mxu0 %v1562_v39  ;;  %1513 = vmatprep.subr.bf16.mxu1 %v1583_v46 }
  0x2c   :  { %753 = vmatmul.mubr.bf16.gmra.mrb[4].mxu1 %v1563_v40  ;;  %663 = vmatprep.mubr.bf16.mxu0 %v1564_v41 }
  0x2d   :  { %760 = vmatprep.mubr.bf16.mxu1 %v1566_v43  ;;  %1492 = vmatpush3.bf16.msra.mxu0 %v1583_v46 }
  0x2e   :  { %1517 = vmatpush3.bf16.msra.mxu1 %v1583_v46  ;;  %1493 = vmatprep.subr.bf16.mxu0 %v1596_v49 }
  0x2f   :  { %1514 = vmatprep.subr.bf16.mxu1 %v1596_v49 }
  0x31   :  { %1494 = vmatpush3.bf16.msra.mxu0 %v1596_v49 }
  0x32   :  { %1518 = vmatpush3.bf16.msra.mxu1 %v1596_v49 }
  0x33   :  { %664 = vmatmul.mubr.bf16.gmra.mrb[8].mxu0 %v1568_v44 }
  0x34   :  { %761 = vmatmul.mubr.bf16.gmra.mrb[8].mxu1 %v1569_v45  ;;  %671 = vmatprep.mubr.bf16.mxu0 %v1571_v47 }
  0x35   :  { %768 = vmatprep.mubr.bf16.mxu1 %v1573_v48 }
  0x3b   :  { %672 = vmatmul.mubr.bf16.gmra.mrb[12].mxu0 %v1575_v50 }
  0x3c   :  { %769 = vmatmul.mubr.bf16.gmra.mrb[12].mxu1 %v1576_v51  ;;  %679 = vmatprep.mubr.bf16.mxu0 %v1577_v52 }
  0x3d   :  { %776 = vmatprep.mubr.bf16.mxu1 %v1579_v53 }
  0x43   :  { %680 = vmatmul.mubr.bf16.gmra.mrb[16].mxu0 %v1581_v54 }
  0x44   :  { %777 = vmatmul.mubr.bf16.gmra.mrb[16].mxu1 %v1582_v55  ;;  %687 = vmatprep.mubr.bf16.mxu0 %v1584_v56 }
  0x45   :  { %784 = vmatprep.mubr.bf16.mxu1 %v1586_v57 }
  0x4b   :  { %688 = vmatmul.mubr.bf16.gmra.mrb[20].mxu0 %v1588_v58 }
  0x4c   :  { %785 = vmatmul.mubr.bf16.gmra.mrb[20].mxu1 %v1589_v59  ;;  %695 = vmatprep.mubr.bf16.mxu0 %v1590_v60 }
  0x4d   :  { %792 = vmatprep.mubr.bf16.mxu1 %v1592_v61 }
  0x53   :  { %696 = vmatmul.mubr.bf16.gmra.mrb[24].mxu0 %v1594_v62 }
  0x54   :  { %793 = vmatmul.mubr.bf16.gmra.mrb[24].mxu1 %v1595_v63  ;;  %703 = vmatprep.mubr.bf16.mxu0 %v1597_v0 }
  0x55   :  { %800 = vmatprep.mubr.bf16.mxu1 %v1599_v1 }
  0x5b   :  { %704 = vmatmul.mubr.bf16.gmra.mrb[28].mxu0 %v1601_v2 }
  0x5c   :  { %801 = vmatmul.mubr.bf16.gmra.mrb[28].mxu1 %v1602_v3  ;;  %1495 = vmatprep.mubr.msk.bf16.mxu0 %vm590_vm0, %v1603_v4 }
  0x5d   :  { %1503 = vmatprep.mubr.msk.bf16.mxu1 %vm590_vm0, %v1604_v5 }
  0x63   :  { %1496 = vmatmul.mubr.msk.bf16.vlgmr.msra.gmra.mrb[32].mxu0 %vm590_vm0, %v1605_v6 }
  0x64   :  { %1504 = vmatmul.mubr.msk.bf16.vlgmr.msra.gmra.mrb[32].mxu1 %vm590_vm0, %v1606_v7  ;;  %1499 = vmatprep.mubr.msk.bf16.mxu0 %vm590_vm0, %v1607_v8 }
  0x65   :  { %1507 = vmatprep.mubr.msk.bf16.mxu1 %vm590_vm0, %v1608_v9 }
  0x6b   :  { %1500 = vmatmul.mubr.msk.bf16.gmra.mrb[36].mxu0 %vm590_vm0, %v1609_v10 }
  0x6c   :  { %1508 = vmatmul.mubr.msk.bf16.gmra.mrb[36].mxu1 %vm590_vm0, %v1610_v11 }
  0xf6   :  { %v1363_v12 = vpop.f32.mrb[0].mxu0 }
  0xf7   :  { %v1427_v13 = vpop.f32.mrb[0].mxu1  ;;  %v1364_v14 = vpop.f32.mrb[1].mxu0 }
  0xf8   :  { %v1365_v15 = vadd.f32 %v1364_v14, %v1363_v12  ;;  %v1428_v16 = vpop.f32.mrb[1].mxu1  ;;  %v1366_v17 = vpop.f32.mrb[2].mxu0 }
  0xf9   :  { %v1429_v18 = vadd.f32 %v1428_v16, %v1427_v13  ;;  %v1430_v19 = vpop.f32.mrb[2].mxu1  ;;  %v1367_v20 = vpop.f32.mrb[3].mxu0 }
  0xfa   :  { %v1368_v21 = vadd.f32 %v1367_v20, %v1366_v17  ;;  %v1431_v22 = vpop.f32.mrb[3].mxu1 }
  0xfb   :  { %v1432_v23 = vadd.f32 %v1431_v22, %v1430_v19  ;;  %v1874_v24 = vadd.f32 %v1429_v18, %v1365_v15 }
  0xfd   :  { %v1876_v25 = vadd.f32 %v1432_v23, %v1368_v21 }
  0xfe   :  { %v1369_v26 = vpop.f32.mrb[4].mxu0 }
  0xff   :  { %v1433_v27 = vpop.f32.mrb[4].mxu1  ;;  %v1370_v28 = vpop.f32.mrb[5].mxu0 }
 0x100   :  { %v1371_v29 = vadd.f32 %v1370_v28, %v1369_v26  ;;  %v1434_v30 = vpop.f32.mrb[5].mxu1  ;;  %v1372_v31 = vpop.f32.mrb[6].mxu0 }
 0x101   :  { %v1435_v32 = vadd.f32 %v1434_v30, %v1433_v27  ;;  %v1436_v33 = vpop.f32.mrb[6].mxu1  ;;  %v1373_v34 = vpop.f32.mrb[7].mxu0 }
 0x102   :  { %v1374_v35 = vadd.f32 %v1373_v34, %v1372_v31  ;;  %v1437_v36 = vpop.f32.mrb[7].mxu1 }
 0x103   :  { %v1438_v37 = vadd.f32 %v1437_v36, %v1436_v33  ;;  %v1878_v38 = vadd.f32 %v1435_v32, %v1371_v29 }
 0x105   :  { %v1880_v39 = vadd.f32 %v1438_v37, %v1374_v35 }
 0x106   :  { %v1375_v40 = vpop.f32.mrb[8].mxu0 }
 0x107   :  { %v1439_v41 = vpop.f32.mrb[8].mxu1  ;;  %v1376_v42 = vpop.f32.mrb[9].mxu0 }
 0x108   :  { %v1377_v43 = vadd.f32 %v1376_v42, %v1375_v40  ;;  %v1440_v44 = vpop.f32.mrb[9].mxu1  ;;  %v1378_v45 = vpop.f32.mrb[10].mxu0 }
 0x109   :  { %v1441_v46 = vadd.f32 %v1440_v44, %v1439_v41  ;;  %v1442_v47 = vpop.f32.mrb[10].mxu1  ;;  %v1379_v48 = vpop.f32.mrb[11].mxu0 }
 0x10a   :  { %v1380_v49 = vadd.f32 %v1379_v48, %v1378_v45  ;;  %v1443_v50 = vpop.f32.mrb[11].mxu1 }
 0x10b   :  { %v1444_v51 = vadd.f32 %v1443_v50, %v1442_v47  ;;  %v1882_v52 = vadd.f32 %v1441_v46, %v1377_v43 }
 0x10d   :  { %v1884_v53 = vadd.f32 %v1444_v51, %v1380_v49 }
 0x10e   :  { %v1381_v54 = vpop.f32.mrb[12].mxu0 }
 0x10f   :  { %v1445_v55 = vpop.f32.mrb[12].mxu1  ;;  %v1382_v56 = vpop.f32.mrb[13].mxu0 }
 0x110   :  { %v1383_v57 = vadd.f32 %v1382_v56, %v1381_v54  ;;  %v1446_v58 = vpop.f32.mrb[13].mxu1  ;;  %v1384_v59 = vpop.f32.mrb[14].mxu0 }
 0x111   :  { %v1447_v60 = vadd.f32 %v1446_v58, %v1445_v55  ;;  %v1448_v61 = vpop.f32.mrb[14].mxu1  ;;  %v1385_v62 = vpop.f32.mrb[15].mxu0 }
 0x112   :  { %v1386_v63 = vadd.f32 %v1385_v62, %v1384_v59  ;;  %v1449_v0 = vpop.f32.mrb[15].mxu1 }
 0x113   :  { %v1450_v1 = vadd.f32 %v1449_v0, %v1448_v61  ;;  %v1886_v2 = vadd.f32 %v1447_v60, %v1383_v57 }
 0x115   :  { %v1888_v3 = vadd.f32 %v1450_v1, %v1386_v63 }
 0x116   :  { %v1387_v4 = vpop.f32.mrb[16].mxu0 }
 0x117   :  { %v1451_v5 = vpop.f32.mrb[16].mxu1  ;;  %v1388_v6 = vpop.f32.mrb[17].mxu0 }
 0x118   :  { %v1389_v7 = vadd.f32 %v1388_v6, %v1387_v4  ;;  %v1452_v8 = vpop.f32.mrb[17].mxu1  ;;  %v1390_v9 = vpop.f32.mrb[18].mxu0 }
 0x119   :  { %v1453_v10 = vadd.f32 %v1452_v8, %v1451_v5  ;;  %v1454_v11 = vpop.f32.mrb[18].mxu1  ;;  %v1391_v12 = vpop.f32.mrb[19].mxu0 }
 0x11a   :  { %v1392_v13 = vadd.f32 %v1391_v12, %v1390_v9  ;;  %v1455_v14 = vpop.f32.mrb[19].mxu1 }
 0x11b   :  { %v1456_v15 = vadd.f32 %v1455_v14, %v1454_v11  ;;  %v779_v16 = vadd.f32 %v1453_v10, %v1389_v7 }
 0x11d   :  { %v782_v17 = vadd.f32 %v1456_v15, %v1392_v13 }
 0x11e   :  { %v1393_v18 = vpop.f32.mrb[20].mxu0 }
 0x11f   :  { %v1457_v19 = vpop.f32.mrb[20].mxu1  ;;  %v1394_v20 = vpop.f32.mrb[21].mxu0 }
 0x120   :  { %v1395_v21 = vadd.f32 %v1394_v20, %v1393_v18  ;;  %v1458_v22 = vpop.f32.mrb[21].mxu1  ;;  %v1396_v23 = vpop.f32.mrb[22].mxu0 }
 0x121   :  { %v1459_v26 = vadd.f32 %v1458_v22, %v1457_v19  ;;  %v1460_v27 = vpop.f32.mrb[22].mxu1  ;;  %v1397_v28 = vpop.f32.mrb[23].mxu0 }
 0x122   :  { %v1398_v29 = vadd.f32 %v1397_v28, %v1396_v23  ;;  %v1461_v30 = vpop.f32.mrb[23].mxu1 }
 0x123   :  { %v1462_v31 = vadd.f32 %v1461_v30, %v1460_v27  ;;  %v787_v32 = vadd.f32 %v1459_v26, %v1395_v21 }
 0x125   :  { %v790_v33 = vadd.f32 %v1462_v31, %v1398_v29 }
 0x126   :  { %v1399_v34 = vpop.f32.mrb[24].mxu0 }
 0x127   :  { %v1463_v35 = vpop.f32.mrb[24].mxu1  ;;  %v1400_v36 = vpop.f32.mrb[25].mxu0 }
 0x128   :  { %v1401_v37 = vadd.f32 %v1400_v36, %v1399_v34  ;;  %v1464_v40 = vpop.f32.mrb[25].mxu1  ;;  %v1402_v41 = vpop.f32.mrb[26].mxu0 }
 0x129   :  { %v1465_v42 = vadd.f32 %v1464_v40, %v1463_v35  ;;  %v1466_v43 = vpop.f32.mrb[26].mxu1  ;;  %v1403_v44 = vpop.f32.mrb[27].mxu0 }
 0x12a   :  { %v1404_v45 = vadd.f32 %v1403_v44, %v1402_v41  ;;  %v1467_v46 = vpop.f32.mrb[27].mxu1 }
 0x12b   :  { %v1468_v47 = vadd.f32 %v1467_v46, %v1466_v43  ;;  %v795_v48 = vadd.f32 %v1465_v42, %v1401_v37 }
 0x12d   :  { %v798_v49 = vadd.f32 %v1468_v47, %v1404_v45 }
 0x12e   :  { %v1405_v50 = vpop.f32.mrb[28].mxu0 }
 0x12f   :  { %v1469_v51 = vpop.f32.mrb[28].mxu1  ;;  %v1406_v54 = vpop.f32.mrb[29].mxu0 }
 0x130   :  { %v1407_v55 = vadd.f32 %v1406_v54, %v1405_v50  ;;  %v1470_v56 = vpop.f32.mrb[29].mxu1  ;;  %v1408_v57 = vpop.f32.mrb[30].mxu0 }
 0x131   :  { %v1471_v58 = vadd.f32 %v1470_v56, %v1469_v51  ;;  %v1472_v59 = vpop.f32.mrb[30].mxu1  ;;  %v1409_v60 = vpop.f32.mrb[31].mxu0 }
 0x132   :  { %v1410_v61 = vadd.f32 %v1409_v60, %v1408_v57  ;;  %v1473_v62 = vpop.f32.mrb[31].mxu1 }
 0x133   :  { %v1474_v63 = vadd.f32 %v1473_v62, %v1472_v59  ;;  %v803_v0 = vadd.f32 %v1471_v58, %v1407_v55 }
 0x135   :  { %v806_v1 = vadd.f32 %v1474_v63, %v1410_v61 }
 0x136   :  { %v1497_v4 = vpop.f32.mrb[32].mxu0 }
 0x137   :  { %v1891_v5 = vadd.f32 %v1497_v4, %v1878_v38  ;;  %v1505_v6 = vpop.f32.mrb[32].mxu1  ;;  %v843_v7 = vpop.f32.mrb[33].mxu0 }
 0x138   :  { %v1893_v8 = vadd.f32 %v1505_v6, %v787_v32  ;;  %v1896_v9 = vadd.f32 %v843_v7, %v1874_v24  ;;  %v875_v10 = vpop.f32.mrb[33].mxu1  ;;  %v1498_v11 = vpop.f32.mrb[34].mxu0 }
 0x139   :  { %v1898_v12 = vadd.f32 %v875_v10, %v779_v16  ;;  %v1901_v13 = vadd.f32 %v1498_v11, %v1880_v39  ;;  %v1506_v14 = vpop.f32.mrb[34].mxu1  ;;  %v846_v15 = vpop.f32.mrb[35].mxu0 }
 0x13a   :  { %v1903_v18 = vadd.f32 %v1506_v14, %v790_v33  ;;  %v1906_v38 = vadd.f32 %v846_v15, %v1876_v25  ;;  %v878_v19 = vpop.f32.mrb[35].mxu1 }
 0x13b   :  { %v1908_v20 = vadd.f32 %v878_v19, %v782_v17 }
 0x13c   :  { %v957_v24 = vadd.f32 %v1906_v38, %v1896_v9 }
 0x13e   :  { %v958_v21 = vadd.f32 %v957_v24, %v1891_v5  ;;  %v1501_v16 = vpop.f32.mrb[36].mxu0 }
 0x13f   :  { %v1914_v22 = vadd.f32 %v1501_v16, %v1886_v2  ;;  %v1509_v39 = vpop.f32.mrb[36].mxu1  ;;  %v859_v23 = vpop.f32.mrb[37].mxu0 }
 0x140   :  { %v1916_v26 = vadd.f32 %v1509_v39, %v803_v0  ;;  %v1919_v27 = vadd.f32 %v859_v23, %v1882_v52  ;;  %v959_v25 = vadd.f32 %v958_v21, %v1901_v13  ;;  %v891_v17 = vpop.f32.mrb[37].mxu1  ;;  %v1502_v28 = vpop.f32.mrb[38].mxu0 }
 0x141   :  { %v1922_v29 = vadd.f32 %v891_v17, %v795_v48  ;;  %v1925_v30 = vadd.f32 %v1502_v28, %v1888_v3  ;;  %v1510_v31 = vpop.f32.mrb[38].mxu1  ;;  %v862_v32 = vpop.f32.mrb[39].mxu0 }
 0x142   :  { %v960_v2 = vadd.f32 %v959_v25, %v1919_v27  ;;  %v1928_v33 = vadd.f32 %v1510_v31, %v806_v1  ;;  %v1931_v34 = vadd.f32 %v862_v32, %v1884_v53  ;;  %v894_v52 = vpop.f32.mrb[39].mxu1 }
 0x143   :  { %v1933_v35 = vadd.f32 %v894_v52, %v798_v49 }
 0x144   :  { %v961_v36 = vadd.f32 %v960_v2, %v1931_v34 }
 0x146   :  { %v962_v37 = vadd.f32 %v961_v36, %v1914_v22 }
 0x148   :  { %v963_v40 = vadd.f32 %v962_v37, %v1925_v30 }
 0x14a   :  { %v964_v3 = vadd.f32 %v963_v40, %v1898_v12 }
 0x14c   :  { %v965_v41 = vadd.f32 %v964_v3, %v1908_v20 }
 0x14e   :  { %v966_v42 = vadd.f32 %v965_v41, %v1893_v8 }
 0x150   :  { %v967_v43 = vadd.f32 %v966_v42, %v1903_v18 }
 0x152   :  { %v968_v53 = vadd.f32 %v967_v43, %v1922_v29 }
 0x154   :  { %v969_v44 = vadd.f32 %v968_v53, %v1933_v35 }
 0x156   :  { %v970_v45 = vadd.f32 %v969_v44, %v1916_v26 }
 0x158   :  { %v971_v46 = vadd.f32 %v970_v45, %v1928_v33 }
 0x15a   :  { %v972_v47 = vrot.slane %v971_v46, 4 }
 0x15c   :  { %v973_v48 = vadd.f32 %v972_v47, %v971_v46 }
 0x15e   :  { %v974_v49 = vrot.slane %v973_v48, 2 }
 0x160   :  { %v975_v50 = vadd.f32 %v974_v49, %v973_v48 }
 0x162   :  { %v976_v51 = vrot.slane %v975_v50, 1 }
 0x164   :  { %v977_v54 = vadd.f32 %v976_v51, %v975_v50 }
 0x166   :  { %v1946_v55 = vmul.f32 0.0078125, %v977_v54 }
 0x168   :  { %v979_v56 = vsub.f32 %v1896_v9, %v1946_v55  ;;  %v980_v57 = vsub.f32 %v1906_v38, %v1946_v55  ;;  %v981_v58 = vsub.f32 %v1891_v5, %v1946_v55  ;;  %v982_v61 = vsub.f32 %v1901_v13, %v1946_v55 }
 0x169   :  { %v983_v62 = vsub.f32 %v1919_v27, %v1946_v55  ;;  %v984_v1 = vsub.f32 %v1931_v34, %v1946_v55  ;;  %v985_v7 = vsub.f32 %v1914_v22, %v1946_v55  ;;  %v986_v14 = vsub.f32 %v1925_v30, %v1946_v55 }
 0x16a   :  { %v995_v59 = vmul.f32 %v979_v56, %v979_v56  ;;  %v996_v60 = vmul.f32 %v980_v57, %v980_v57  ;;  %v997_v63 = vmul.f32 %v981_v58, %v981_v58  ;;  %v998_v4 = vmul.f32 %v982_v61, %v982_v61 }
 0x16b   :  { %v999_v10 = vmul.f32 %v983_v62, %v983_v62  ;;  %v1000_v15 = vmul.f32 %v984_v1, %v984_v1  ;;  %v987_v24 = vsub.f32 %v1898_v12, %v1946_v55  ;;  %v1001_v21 = vmul.f32 %v985_v7, %v985_v7 }
 0x16c   :  { %v1011_v0 = vadd.f32 %v996_v60, %v995_v59  ;;  %v988_v39 = vsub.f32 %v1908_v20, %v1946_v55  ;;  %v1002_v23 = vmul.f32 %v986_v14, %v986_v14  ;;  %v989_v17 = vsub.f32 %v1893_v8, %v1946_v55 }
 0x16d   :  { %v1003_v28 = vmul.f32 %v987_v24, %v987_v24  ;;  %v990_v32 = vsub.f32 %v1903_v18, %v1946_v55  ;;  %v991_v36 = vsub.f32 %v1922_v29, %v1946_v55  ;;  %v992_v3 = vsub.f32 %v1933_v35, %v1946_v55 }
 0x16e   :  { %v1012_v6 = vadd.f32 %v1011_v0, %v997_v63  ;;  %v1004_v2 = vmul.f32 %v988_v39, %v988_v39  ;;  %v1005_v37 = vmul.f32 %v989_v17, %v989_v17  ;;  %v993_v43 = vsub.f32 %v1916_v26, %v1946_v55 }
 0x16f   :  { %v1006_v41 = vmul.f32 %v990_v32, %v990_v32  ;;  %v1007_v53 = vmul.f32 %v991_v36, %v991_v36  ;;  %v994_v45 = vsub.f32 %v1928_v33, %v1946_v55  ;;  %v1008_v46 = vmul.f32 %v992_v3, %v992_v3 }
 0x170   :  { %v1013_v11 = vadd.f32 %v1012_v6, %v998_v4  ;;  %v1009_v48 = vmul.f32 %v993_v43, %v993_v43  ;;  %v1041_v0 = vlaneseq  ;;  %v1033_v4 = vld [vmem:[%s2029_s2] sm:$0x1] }
 0x171   :  { %v1010_v50 = vmul.f32 %v994_v45, %v994_v45 }
 0x172   :  { %v1014_v19 = vadd.f32 %v1013_v11, %v999_v10  ;;  %v1042_v1 = vshrl.u32 %v1041_v0, 7  ;;  %v1037_v11 = vld [vmem:[%s2030_s3] sm:$0x1] }
 0x174   :  { %v1015_v16 = vadd.f32 %v1014_v19, %v1000_v15  ;;  %v1043_v6 = vsub.s32 0, %v1042_v1 }
 0x176   :  { %v1016_v25 = vadd.f32 %v1015_v16, %v1001_v21 }
 0x178   :  { %v1017_v31 = vadd.f32 %v1016_v25, %v1002_v23 }
 0x17a   :  { %v1018_v52 = vadd.f32 %v1017_v31, %v1003_v28 }
 0x17c   :  { %v1019_v40 = vadd.f32 %v1018_v52, %v1004_v2 }
 0x17e   :  { %v1020_v42 = vadd.f32 %v1019_v40, %v1005_v37 }
 0x180   :  { %v1021_v44 = vadd.f32 %v1020_v42, %v1006_v41 }
 0x182   :  { %v1022_v47 = vadd.f32 %v1021_v44, %v1007_v53 }
 0x184   :  { %v1023_v49 = vadd.f32 %v1022_v47, %v1008_v46 }
 0x186   :  { %v1024_v51 = vadd.f32 %v1023_v49, %v1009_v48 }
 0x188   :  { %v1025_v54 = vadd.f32 %v1024_v51, %v1010_v50 }
 0x18a   :  { %v1026_v56 = vrot.slane %v1025_v54, 4 }
 0x18c   :  { %v1027_v57 = vadd.f32 %v1026_v56, %v1025_v54 }
 0x18e   :  { %v1028_v58 = vrot.slane %v1027_v57, 2 }
 0x190   :  { %v1029_v59 = vadd.f32 %v1028_v58, %v1027_v57 }
 0x192   :  { %v1030_v60 = vrot.slane %v1029_v59, 1 }
 0x194   :  { %v1031_v61 = vadd.f32 %v1030_v60, %v1029_v59 }
 0x196   :  { %v1032_v62 = vmul.f32 0.0078125, %v1031_v61 }
 0x198   :  { %v1034_v63 = vadd.f32 1e-05, %v1032_v62 }
 0x19a   :  { %1611 = vrsqrt.f32 %v1034_v63 }
 0x1a4   :  { %v1612_v7 = vpop.eup %1611 }
 0x1a5   :  { %v1036_v10 = vmul.f32 %v1612_v7, %v1033_v4 }
 0x1a7   :  { %v1038_v14 = vmul.f32 %v1036_v10, %v1946_v55  ;;  %v1044_v15 = vrot.slane %v1036_v10, %v1043_v6 }
 0x1a9   :  { %v1039_v19 = vsub.f32 %v1037_v11, %v1038_v14  ;;  %v1046_v24 = vmul.f32 %v1044_v15, %v1896_v9  ;;  %v1047_v21 = vmul.f32 %v1044_v15, %v1906_v38  ;;  %v1048_v16 = vmul.f32 %v1044_v15, %v1891_v5 }
 0x1aa   :  { %v1049_v39 = vmul.f32 %v1044_v15, %v1901_v13  ;;  %v1050_v23 = vmul.f32 %v1044_v15, %v1919_v27  ;;  %v1051_v25 = vmul.f32 %v1044_v15, %v1931_v34  ;;  %v1052_v17 = vmul.f32 %v1044_v15, %v1914_v22 }
 0x1ab   :  { %v1053_v28 = vmul.f32 %v1044_v15, %v1925_v30  ;;  %v1054_v55 = vmul.f32 %v1044_v15, %v1898_v12  ;;  %v1055_v31 = vmul.f32 %v1044_v15, %v1908_v20  ;;  %v1056_v9 = vmul.f32 %v1044_v15, %v1893_v8 }
 0x1ac   :  { %v1057_v38 = vmul.f32 %v1044_v15, %v1903_v18  ;;  %v1066_v32 = vrot.slane %v1039_v19, %v1043_v6  ;;  %v1058_v5 = vmul.f32 %v1044_v15, %v1922_v29  ;;  %v1059_v13 = vmul.f32 %v1044_v15, %v1933_v35 }
 0x1ad   :  { %v1060_v27 = vmul.f32 %v1044_v15, %v1916_v26  ;;  %v1061_v34 = vmul.f32 %v1044_v15, %v1928_v33 }
 0x1ae   :  { %v1068_v22 = vadd.f32 %v1066_v32, %v1046_v24  ;;  %v1069_v2 = vadd.f32 %v1066_v32, %v1047_v21  ;;  %v1070_v30 = vadd.f32 %v1066_v32, %v1048_v16  ;;  %v1071_v52 = vadd.f32 %v1066_v32, %v1049_v39 }
 0x1af   :  { %v1072_v12 = vadd.f32 %v1066_v32, %v1050_v23  ;;  %v1073_v36 = vadd.f32 %v1066_v32, %v1051_v25  ;;  %v1074_v20 = vadd.f32 %v1066_v32, %v1052_v17  ;;  %v1075_v37 = vadd.f32 %v1066_v32, %v1053_v28 }
 0x1b0   :  { %v1076_v8 = vadd.f32 %v1066_v32, %v1054_v55  ;;  %v1077_v40 = vadd.f32 %v1066_v32, %v1055_v31  ;;  %v1078_v18 = vadd.f32 %v1066_v32, %v1056_v9  ;;  %v1079_v3 = vadd.f32 %v1066_v32, %v1057_v38 }
 0x1b1   :  { %v1080_v41 = vadd.f32 %v1066_v32, %v1058_v5  ;;  %v1081_v29 = vadd.f32 %v1066_v32, %v1059_v13  ;;  %v1082_v42 = vadd.f32 %v1066_v32, %v1060_v27  ;;  %v1083_v35 = vadd.f32 %v1066_v32, %v1061_v34 }
 0x1b2   :  { %v1084_v43 = vmax.f32 %v1068_v22, 0.0  ;;  %v1085_v26 = vmax.f32 %v1069_v2, 0.0  ;;  %v1086_v53 = vmax.f32 %v1070_v30, 0.0  ;;  %v1087_v33 = vmax.f32 %v1071_v52, 0.0 }
 0x1b3   :  { %v1088_v44 = vmax.f32 %v1072_v12, 0.0  ;;  %v1089_v45 = vmax.f32 %v1073_v36, 0.0  ;;  %v1090_v46 = vmax.f32 %v1074_v20, 0.0  ;;  %v1091_v47 = vmax.f32 %v1075_v37, 0.0 }
 0x1b4   :  { %v1092_v48 = vmax.f32 %v1076_v8, 0.0  ;;  %v1093_v49 = vmax.f32 %v1077_v40, 0.0  ;;  %v1094_v50 = vmax.f32 %v1078_v18, 0.0  ;;  %v1095_v51 = vmax.f32 %v1079_v3, 0.0 }
 0x1b5   :  { %v1096_v54 = vmax.f32 %v1080_v41, 0.0  ;;  %v1097_v56 = vmax.f32 %v1081_v29, 0.0  ;;  %v1098_v57 = vmax.f32 %v1082_v42, 0.0  ;;  %v1099_v58 = vmax.f32 %v1083_v35, 0.0 }
 0x1b6   :  { %v1303_v59 = vpack.c.bf16 %v1085_v26, %v1084_v43  ;;  %v1308_v60 = vpack.c.bf16 %v1087_v33, %v1086_v53  ;;  %v1313_v61 = vpack.c.bf16 %v1089_v45, %v1088_v44  ;;  %v1318_v62 = vpack.c.bf16 %v1091_v47, %v1090_v46 }
 0x1b7   :  { %v1323_v63 = vpack.c.bf16 %v1093_v49, %v1092_v48  ;;  %v1328_v0 = vpack.c.bf16 %v1095_v51, %v1094_v50  ;;  %v1333_v1 = vpack.c.bf16 %v1097_v56, %v1096_v54  ;;  %v1338_v4 = vpack.c.bf16 %v1099_v58, %v1098_v57 }
 0x1b8   :  { %1304 = vst [vmem:[%s2031_s4] sm:$0xff] %v1303_v59   ;;  %1340 = vst [vmem:[%s2031_s4 + $0x8] sm:$0xff] %v1308_v60  }
 0x1b9   :  { %1341 = vst [vmem:[%s2031_s4 + $0x10] sm:$0xff] %v1313_v61   ;;  %1342 = vst [vmem:[%s2031_s4 + $0x18] sm:$0xff] %v1318_v62  }
 0x1ba   :  { %1343 = vst [vmem:[%s2031_s4 + $0x20] sm:$0xff] %v1323_v63   ;;  %1344 = vst [vmem:[%s2031_s4 + $0x28] sm:$0xff] %v1328_v0  }
 0x1bb   :  { %1345 = vst [vmem:[%s2031_s4 + $0x30] sm:$0xff] %v1333_v1   ;;  %1346 = vst [vmem:[%s2031_s4 + $0x38] sm:$0xff] %v1338_v4  }

// kernel: vade_forward.19
= control target key start
LH: loop header
LB: loop body
LE: loop exit
PB: predicated region body
PF: predicated region fallthrough
CT: control target
= control target key end

     0   :  { %s1964_s12 = smov 0   ;;  %s1966_s13 = smov 0   ;;  %s2222_s0 = inlined_call_operand.vmem [shape: bf16[512,288], index: 0, kind: input, shape index: {}]   ;;  %s2223_s1 = inlined_call_operand.vmem [shape: bf16[288,128], index: 1, kind: input, shape index: {}]   ;;  %s2224_s2 = inlined_call_operand.vmem [shape: f32[1,128], index: 2, kind: input, shape index: {}]   ;;  %s2225_s3 = inlined_call_operand.vmem [shape: f32[512,128], index: 3, kind: output, shape index: {}]  }
   0x1   :  { %s1968_s14 = smov 0  }
   0x2 LB: > { %s32_s15 = sadd.s32 1, %s1938_s13  ;;  %p1477_p0 = scmp.ge.s32.totalorder %s1942_s14, 1  ;;  %s1942_s14 = sphi %s1968_s14, %s13_s14   ;;  %s1938_s13 = sphi %s1966_s13, %s2227_s13   ;;  %s1934_s12 = sphi %s1964_s12, %s2226_s12  }
   0x3   : > { %p34_p1 = scmp.ge.s32.totalorder %s32_s15, 2  ;;  %p191_p2 = scmp.lt.s32.totalorder %s1942_s14, 3 }
   0x5   : > { %s2229_s15 = smov (%p34_p1, %s32_s15), 0  ;;  %p192_p3 = pnand %p1477_p0, %p191_p2 }
   0x6   : > { %v1774_v0 = vld [vmem:[%s2223_s1 + $0x40] sm:$0xff] (!%p192_p3)   ;;  %s1478_s18 = sshll.u32 (!%p192_p3), %s1934_s12, 5  ;;  %v1776_v2 = vld [vmem:[%s2223_s1 + $0x48] sm:$0xff] (!%p192_p3)   ;;  %v1778_v4 = vld [vmem:[%s2223_s1 + $0x50] sm:$0xff] (!%p192_p3)   ;;  %vm784_vm0 = vcmask (!%p192_p3), 261120  }
   0x7   : > { %195 = sbr.rel (%p192_p3) target bundleno = 361 (0x169), region = 32  ;;  %v1775_v1 = vld [vmem:[%s2223_s1] sm:$0xff] (!%p192_p3)   ;;  %1567 = vmatprep.subr.bf16.mxu0 (!%p192_p3), %v1774_v0  ;;  %1733 = vmatprep.subr.bf16.mxu1 (!%p192_p3), %v1774_v0  ;;  %p236_p4 = scmp.lt.s32.totalorder (!%p192_p3), %s1478_s18, 63  ;;  %v1777_v3 = vld [vmem:[%s2223_s1 + $0x8] sm:$0xff] (!%p192_p3)   ;;  %v1779_v5 = vld [vmem:[%s2223_s1 + $0x10] sm:$0xff] (!%p192_p3)  }
   0x8   : > { %1568 = vmatpush3.bf16.msra.mxu0 (!%p192_p3), %v1775_v1  ;;  %1741 = vmatpush3.bf16.msra.mxu1 (!%p192_p3), %v1775_v1  ;;  %v1780_v6 = vld [vmem:[%s2223_s1 + $0x58] sm:$0xff] (!%p192_p3)   ;;  %v1782_v8 = vld [vmem:[%s2223_s1 + $0x60] sm:$0xff] (!%p192_p3)   ;;  %v1784_v10 = vld [vmem:[%s2223_s1 + $0x68] sm:$0xff] (!%p192_p3)  }
   0x9   : > { %1569 = vmatprep.subr.bf16.mxu0 (!%p192_p3), %v1776_v2  ;;  %1734 = vmatprep.subr.bf16.mxu1 (!%p192_p3), %v1776_v2  ;;  %v1781_v7 = vld [vmem:[%s2223_s1 + $0x18] sm:$0xff] (!%p192_p3)   ;;  %v1783_v9 = vld [vmem:[%s2223_s1 + $0x20] sm:$0xff] (!%p192_p3)   ;;  %v1785_v13 = vld [vmem:[%s2223_s1 + $0x28] sm:$0xff] (!%p192_p3)  }
   0xa   : > { %v1786_v14 = vld [vmem:[%s2223_s1 + $0x70] sm:$0xff] (!%p192_p3)   ;;  %v1788_v16 = vld [vmem:[%s2223_s1 + $0x78] sm:$0xff] (!%p192_p3)   ;;  %v1796_v18 = vld [vmem:[%s2223_s1 + $0x80] sm:$0xff] (!%p192_p3)  }
   0xb   : > { %v1787_v15 = vld [vmem:[%s2223_s1 + $0x30] sm:$0xff] (!%p192_p3)   ;;  %v1789_v17 = vld [vmem:[%s2223_s1 + $0x38] sm:$0xff] (!%p192_p3)   ;;  %v1809_v23 = vld [vmem:[%s2223_s1 + $0x88] sm:$0xff] (!%p192_p3)  }
   0xc   : > { %1570 = vmatpush3.bf16.msra.mxu0 (!%p192_p3), %v1777_v3  ;;  %1742 = vmatpush3.bf16.msra.mxu1 (!%p192_p3), %v1777_v3 }
   0xd   : > { %1571 = vmatprep.subr.bf16.mxu0 (!%p192_p3), %v1778_v4  ;;  %1735 = vmatprep.subr.bf16.mxu1 (!%p192_p3), %v1778_v4 }
   0xe   : > { %s2231_s18 = smov (!%p236_p4, %s1478_s18), 63 }
   0xf   : > { %s1749_s4 = smul.u32 12, %s2231_s18  ;;  %s1481_s9 = sshll.u32 %s2231_s18, 3 }
  0x10   : > { %1572 = vmatpush3.bf16.msra.mxu0 %v1779_v5  ;;  %1743 = vmatpush3.bf16.msra.mxu1 %v1779_v5  ;;  %s2139_s12 = scalar_lea.vmem %s2225_s3, %s1481_s9 }
  0x11   : > { %1573 = vmatprep.subr.bf16.mxu0 %v1780_v6  ;;  %1736 = vmatprep.subr.bf16.mxu1 %v1780_v6  ;;  %s2015_s11 = scalar_lea.vmem %s2222_s0, %s1749_s4 }
  0x12   : > { %v1792_v11 = vld [vmem:[%s2015_s11 + $0x4] ss:$12 sps:$4 sm:$0xff]   ;;  %v1790_v19 = vld [vmem:[%s2015_s11] ss:$12 sps:$4 sm:$0xff]   ;;  %v1797_v21 = vld [vmem:[%s2015_s11 + $0x1c] ss:$12 sps:$4 sm:$0xff]  }
  0x13   : > { %v1795_v12 = vld [vmem:[%s2015_s11 + $0x124] ss:$12 sps:$4 sm:$0xff]   ;;  %865 = vmatprep.mubr.bf16.mxu0 %v1792_v11  ;;  %v1793_v20 = vld [vmem:[%s2015_s11 + $0x120] ss:$12 sps:$4 sm:$0xff]   ;;  %v1799_v22 = vld [vmem:[%s2015_s11 + $0x13c] ss:$12 sps:$4 sm:$0xff]  }
  0x14   : > { %1574 = vmatpush3.bf16.msra.mxu0 %v1781_v7  ;;  %1744 = vmatpush3.bf16.msra.mxu1 %v1781_v7  ;;  %v1801_v24 = vld [vmem:[%s2015_s11 + $0x18] ss:$12 sps:$4 sm:$0xff]   ;;  %v1803_v26 = vld [vmem:[%s2015_s11 + $0x34] ss:$12 sps:$4 sm:$0xff]   ;;  %v1807_v28 = vld [vmem:[%s2015_s11 + $0x30] ss:$12 sps:$4 sm:$0xff]  }
  0x15   : > { %1575 = vmatprep.subr.bf16.mxu0 %v1782_v8  ;;  %1737 = vmatprep.subr.bf16.mxu1 %v1782_v8  ;;  %v1802_v25 = vld [vmem:[%s2015_s11 + $0x138] ss:$12 sps:$4 sm:$0xff]   ;;  %v1805_v27 = vld [vmem:[%s2015_s11 + $0x154] ss:$12 sps:$4 sm:$0xff]   ;;  %v1808_v29 = vld [vmem:[%s2015_s11 + $0x150] ss:$12 sps:$4 sm:$0xff]  }
  0x16   : > { %961 = vmatprep.mubr.bf16.mxu1 %v1795_v12  ;;  %v1810_v30 = vld [vmem:[%s2015_s11 + $0x4c] ss:$12 sps:$4 sm:$0xff]   ;;  %v1814_v32 = vld [vmem:[%s2015_s11 + $0x48] ss:$12 sps:$4 sm:$0xff]   ;;  %v1816_v34 = vld [vmem:[%s2015_s11 + $0x64] ss:$12 sps:$4 sm:$0xff]  }
  0x17   : > { %v1812_v31 = vld [vmem:[%s2015_s11 + $0x16c] ss:$12 sps:$4 sm:$0xff]   ;;  %v1815_v33 = vld [vmem:[%s2015_s11 + $0x168] ss:$12 sps:$4 sm:$0xff]   ;;  %v1825_v41 = vld [vmem:[%s2015_s11 + $0x50] ss:$12 sps:$4 sm:$0xff]  }
  0x18   : > { %1576 = vmatpush3.bf16.msra.mxu0 %v1783_v9  ;;  %1745 = vmatpush3.bf16.msra.mxu1 %v1783_v9  ;;  %v1818_v35 = vld [vmem:[%s2015_s11 + $0x8] ss:$12 sps:$4 sm:$0xff]   ;;  %v1819_v36 = vld [vmem:[%s2015_s11 + $0x60] ss:$12 sps:$4 sm:$0xff]   ;;  %v1823_v39 = vld [vmem:[%s2015_s11 + $0x38] ss:$12 sps:$4 sm:$0xff]  }
  0x19   : > { %1577 = vmatprep.subr.bf16.mxu0 %v1784_v10  ;;  %1738 = vmatprep.subr.bf16.mxu1 %v1784_v10  ;;  %v1820_v37 = vld [vmem:[%s2015_s11 + $0x20] ss:$12 sps:$4 sm:$0xff]   ;;  %v1821_v38 = vld [vmem:[%s2015_s11 + $0x7c] ss:$12 sps:$4 sm:$0xff]   ;;  %v1824_v40 = vld [vmem:[%s2015_s11 + $0x78] ss:$12 sps:$4 sm:$0xff]  }
  0x1a   : > { %v1826_v42 = vld [vmem:[%s2015_s11 + $0x94] ss:$12 sps:$4 sm:$0xff]   ;;  %v1829_v44 = vld [vmem:[%s2015_s11 + $0x90] ss:$12 sps:$4 sm:$0xff]   ;;  %v1831_v46 = vld [vmem:[%s2015_s11 + $0xac] ss:$12 sps:$4 sm:$0xff]  }
  0x1b   : > { %v1828_v43 = vld [vmem:[%s2015_s11 + $0x68] ss:$12 sps:$4 sm:$0xff]   ;;  %v1830_v45 = vld [vmem:[%s2015_s11 + $0x80] ss:$12 sps:$4 sm:$0xff]   ;;  %v1833_v47 = vld [vmem:[%s2015_s11 + $0x98] ss:$12 sps:$4 sm:$0xff]  }
  0x1c   : > { %1578 = vmatpush3.bf16.msra.mxu0 %v1785_v13  ;;  %1746 = vmatpush3.bf16.msra.mxu1 %v1785_v13  ;;  %v1834_v48 = vld [vmem:[%s2015_s11 + $0xa8] ss:$12 sps:$4 sm:$0xff]   ;;  %v1835_v49 = vld [vmem:[%s2015_s11 + $0xb0] ss:$12 sps:$4 sm:$0xff]   ;;  %v1839_v52 = vld [vmem:[%s2015_s11 + $0xc0] ss:$12 sps:$4 sm:$0xff]  }
  0x1d   : > { %1579 = vmatprep.subr.bf16.mxu0 %v1786_v14  ;;  %1739 = vmatprep.subr.bf16.mxu1 %v1786_v14  ;;  %v1836_v50 = vld [vmem:[%s2015_s11 + $0xc4] ss:$12 sps:$4 sm:$0xff]   ;;  %v1838_v51 = vld [vmem:[%s2015_s11 + $0xc8] ss:$12 sps:$4 sm:$0xff]   ;;  %v1840_v53 = vld [vmem:[%s2015_s11 + $0xe0] ss:$12 sps:$4 sm:$0xff]  }
  0x1e   : > { %v1841_v54 = vld [vmem:[%s2015_s11 + $0xdc] ss:$12 sps:$4 sm:$0xff]   ;;  %v1843_v55 = vld [vmem:[%s2015_s11 + $0xf8] ss:$12 sps:$4 sm:$0xff]   ;;  %v1846_v58 = vld [vmem:[%s2015_s11 + $0xf4] ss:$12 sps:$4 sm:$0xff]  }
  0x1f   : > { %v1844_v56 = vld [vmem:[%s2015_s11 + $0xd8] ss:$12 sps:$4 sm:$0xff]   ;;  %v1845_v57 = vld [vmem:[%s2015_s11 + $0x110] ss:$12 sps:$4 sm:$0xff]   ;;  %v1848_v59 = vld [vmem:[%s2015_s11 + $0x128] ss:$12 sps:$4 sm:$0xff]  }
  0x20   : > { %1580 = vmatpush3.bf16.msra.mxu0 %v1787_v15  ;;  %1747 = vmatpush3.bf16.msra.mxu1 %v1787_v15  ;;  %v1849_v60 = vld [vmem:[%s2015_s11 + $0xf0] ss:$12 sps:$4 sm:$0xff]   ;;  %v1850_v61 = vld [vmem:[%s2015_s11 + $0x140] ss:$12 sps:$4 sm:$0xff]   ;;  %v1853_v63 = vld [vmem:[%s2015_s11 + $0x158] ss:$12 sps:$4 sm:$0xff]  }
  0x21   : > { %1581 = vmatprep.subr.bf16.mxu0 %v1788_v16  ;;  %1740 = vmatprep.subr.bf16.mxu1 %v1788_v16  ;;  %v1851_v62 = vld [vmem:[%s2015_s11 + $0x10c] ss:$12 sps:$4 sm:$0xff]   ;;  %v1854_v0 = vld [vmem:[%s2015_s11 + $0x108] ss:$12 sps:$4 sm:$0xff]   ;;  %v1855_v1 = vld [vmem:[%s2015_s11 + $0x170] ss:$12 sps:$4 sm:$0xff]  }
  0x24   : > { %1582 = vmatpush3.bf16.msra.mxu0 %v1789_v17  ;;  %1748 = vmatpush3.bf16.msra.mxu1 %v1789_v17 }
  0x25   : > { %1697 = vmatprep.subr.bf16.mxu1 %v1796_v18 }
  0x27   : > { %866 = vmatmul.mubr.bf16.vlgmr.msra.gmra.mrb[0].mxu0 %v1790_v19  ;;  %962 = vmatmul.mubr.bf16.vlgmr.msra.gmra.mrb[0].mxu1 %v1793_v20 }
  0x28   : > { %1698 = vmatpush3.bf16.msra.mxu1 %v1796_v18  ;;  %873 = vmatprep.mubr.bf16.mxu0 %v1797_v21 }
  0x29   : > { %969 = vmatprep.mubr.bf16.mxu1 %v1799_v22  ;;  %1699 = vmatprep.subr.bf16.mxu1 %v1809_v23 }
  0x2c   : > { %1700 = vmatpush3.bf16.msra.mxu1 %v1809_v23 }
  0x2f   : > { %874 = vmatmul.mubr.bf16.gmra.mrb[4].mxu0 %v1801_v24  ;;  %970 = vmatmul.mubr.bf16.gmra.mrb[4].mxu1 %v1802_v25 }
  0x30   : > { %881 = vmatprep.mubr.bf16.mxu0 %v1803_v26  ;;  %977 = vmatprep.mubr.bf16.mxu1 %v1805_v27 }
  0x37   : > { %882 = vmatmul.mubr.bf16.gmra.mrb[8].mxu0 %v1807_v28  ;;  %978 = vmatmul.mubr.bf16.gmra.mrb[8].mxu1 %v1808_v29 }
  0x38   : > { %889 = vmatprep.mubr.bf16.mxu0 %v1810_v30  ;;  %985 = vmatprep.mubr.bf16.mxu1 %v1812_v31 }
  0x3f   : > { %890 = vmatmul.mubr.bf16.gmra.mrb[12].mxu0 %v1814_v32  ;;  %986 = vmatmul.mubr.bf16.gmra.mrb[12].mxu1 %v1815_v33 }
  0x40   : > { %897 = vmatprep.mubr.bf16.mxu0 %v1816_v34  ;;  %1701 = vmatprep.mubr.msk.bf16.mxu1 %vm784_vm0, %v1818_v35 }
  0x47   : > { %898 = vmatmul.mubr.bf16.gmra.mrb[16].mxu0 %v1819_v36  ;;  %1702 = vmatmul.mubr.msk.bf16.vlgmr.msra.gmra.mrb[16].mxu1 %vm784_vm0, %v1820_v37 }
  0x48   : > { %905 = vmatprep.mubr.bf16.mxu0 %v1821_v38  ;;  %1705 = vmatprep.mubr.msk.bf16.mxu1 %vm784_vm0, %v1823_v39 }
  0x4f   : > { %906 = vmatmul.mubr.bf16.gmra.mrb[20].mxu0 %v1824_v40  ;;  %1706 = vmatmul.mubr.msk.bf16.gmra.mrb[20].mxu1 %vm784_vm0, %v1825_v41 }
  0x50   : > { %913 = vmatprep.mubr.bf16.mxu0 %v1826_v42  ;;  %1709 = vmatprep.mubr.msk.bf16.mxu1 %vm784_vm0, %v1828_v43 }
  0x57   : > { %914 = vmatmul.mubr.bf16.gmra.mrb[24].mxu0 %v1829_v44  ;;  %1710 = vmatmul.mubr.msk.bf16.gmra.mrb[24].mxu1 %vm784_vm0, %v1830_v45 }
  0x58   : > { %921 = vmatprep.mubr.bf16.mxu0 %v1831_v46  ;;  %1713 = vmatprep.mubr.msk.bf16.mxu1 %vm784_vm0, %v1833_v47 }
  0x5f   : > { %922 = vmatmul.mubr.bf16.gmra.mrb[28].mxu0 %v1834_v48  ;;  %1714 = vmatmul.mubr.msk.bf16.gmra.mrb[28].mxu1 %vm784_vm0, %v1835_v49 }
  0x60   : > { %929 = vmatprep.mubr.bf16.mxu0 %v1836_v50  ;;  %1717 = vmatprep.mubr.msk.bf16.mxu1 %vm784_vm0, %v1838_v51 }
  0x67   : > { %930 = vmatmul.mubr.bf16.gmra.mrb[32].mxu0 %v1839_v52  ;;  %1718 = vmatmul.mubr.msk.bf16.gmra.mrb[32].mxu1 %vm784_vm0, %v1840_v53  ;;  %v2127_v52 = vld [vmem:[%s2224_s2] ss:$0 sm:$0xff] }
  0x68   : > { %937 = vmatprep.mubr.bf16.mxu0 %v1841_v54  ;;  %1721 = vmatprep.mubr.msk.bf16.mxu1 %vm784_vm0, %v1843_v55 }
  0x6f   : > { %938 = vmatmul.mubr.bf16.gmra.mrb[36].mxu0 %v1844_v56  ;;  %1722 = vmatmul.mubr.msk.bf16.gmra.mrb[36].mxu1 %vm784_vm0, %v1845_v57 }
  0x70   : > { %945 = vmatprep.mubr.bf16.mxu0 %v1846_v58  ;;  %1725 = vmatprep.mubr.msk.bf16.mxu1 %vm784_vm0, %v1848_v59 }
  0x77   : > { %946 = vmatmul.mubr.bf16.gmra.mrb[40].mxu0 %v1849_v60  ;;  %1726 = vmatmul.mubr.msk.bf16.gmra.mrb[40].mxu1 %vm784_vm0, %v1850_v61 }
  0x78   : > { %953 = vmatprep.mubr.bf16.mxu0 %v1851_v62  ;;  %1729 = vmatprep.mubr.msk.bf16.mxu1 %vm784_vm0, %v1853_v63 }
  0x7f   : > { %954 = vmatmul.mubr.bf16.gmra.mrb[44].mxu0 %v1854_v0  ;;  %1730 = vmatmul.mubr.msk.bf16.gmra.mrb[44].mxu1 %vm784_vm0, %v1855_v1 }
  0xfa   : > { %v1583_v2 = vpop.f32.mrb[0].mxu0  ;;  %v1655_v3 = vpop.f32.mrb[0].mxu1 }
  0xfb   : > { %v1584_v4 = vpop.f32.mrb[1].mxu0  ;;  %v1656_v5 = vpop.f32.mrb[1].mxu1 }
  0xfc   : > { %v1585_v6 = vadd.f32 %v1584_v4, %v1583_v2  ;;  %v2108_v7 = vadd.f32 %v1656_v5, %v1655_v3  ;;  %v1586_v8 = vpop.f32.mrb[2].mxu0  ;;  %v1658_v9 = vpop.f32.mrb[2].mxu1 }
  0xfd   : > { %v1587_v10 = vpop.f32.mrb[3].mxu0  ;;  %v1659_v11 = vpop.f32.mrb[3].mxu1 }
  0xfe   : > { %v1588_v12 = vadd.f32 %v1587_v10, %v1586_v8  ;;  %v2110_v13 = vadd.f32 %v1659_v11, %v1658_v9 }
 0x102   : > { %v1589_v14 = vpop.f32.mrb[4].mxu0  ;;  %v1661_v15 = vpop.f32.mrb[4].mxu1 }
 0x103   : > { %v1590_v16 = vpop.f32.mrb[5].mxu0  ;;  %v1662_v17 = vpop.f32.mrb[5].mxu1 }
 0x104   : > { %v1591_v18 = vadd.f32 %v1590_v16, %v1589_v14  ;;  %v2112_v19 = vadd.f32 %v1662_v17, %v1661_v15  ;;  %v1592_v20 = vpop.f32.mrb[6].mxu0  ;;  %v1664_v21 = vpop.f32.mrb[6].mxu1 }
 0x105   : > { %v1593_v22 = vpop.f32.mrb[7].mxu0  ;;  %v1665_v23 = vpop.f32.mrb[7].mxu1 }
 0x106   : > { %v1594_v24 = vadd.f32 %v1593_v22, %v1592_v20  ;;  %v2114_v25 = vadd.f32 %v1665_v23, %v1664_v21 }
 0x10a   : > { %v1595_v26 = vpop.f32.mrb[8].mxu0  ;;  %v1667_v27 = vpop.f32.mrb[8].mxu1 }
 0x10b   : > { %v1596_v28 = vpop.f32.mrb[9].mxu0  ;;  %v1668_v29 = vpop.f32.mrb[9].mxu1 }
 0x10c   : > { %v1597_v30 = vadd.f32 %v1596_v28, %v1595_v26  ;;  %v2116_v31 = vadd.f32 %v1668_v29, %v1667_v27  ;;  %v1598_v32 = vpop.f32.mrb[10].mxu0  ;;  %v1670_v33 = vpop.f32.mrb[10].mxu1 }
 0x10d   : > { %v1599_v34 = vpop.f32.mrb[11].mxu0  ;;  %v1671_v35 = vpop.f32.mrb[11].mxu1 }
 0x10e   : > { %v1600_v36 = vadd.f32 %v1599_v34, %v1598_v32  ;;  %v2118_v37 = vadd.f32 %v1671_v35, %v1670_v33 }
 0x112   : > { %v1601_v38 = vpop.f32.mrb[12].mxu0  ;;  %v1673_v39 = vpop.f32.mrb[12].mxu1 }
 0x113   : > { %v1602_v40 = vpop.f32.mrb[13].mxu0  ;;  %v1674_v41 = vpop.f32.mrb[13].mxu1 }
 0x114   : > { %v1603_v42 = vadd.f32 %v1602_v40, %v1601_v38  ;;  %v2120_v43 = vadd.f32 %v1674_v41, %v1673_v39  ;;  %v1604_v44 = vpop.f32.mrb[14].mxu0  ;;  %v1676_v45 = vpop.f32.mrb[14].mxu1 }
 0x115   : > { %v1605_v46 = vpop.f32.mrb[15].mxu0  ;;  %v1677_v47 = vpop.f32.mrb[15].mxu1 }
 0x116   : > { %v1606_v48 = vadd.f32 %v1605_v46, %v1604_v44  ;;  %v2122_v49 = vadd.f32 %v1677_v47, %v1676_v45 }
 0x11a   : > { %v1607_v50 = vpop.f32.mrb[16].mxu0  ;;  %v1703_v51 = vpop.f32.mrb[16].mxu1 }
 0x11b   : > { %v1037_v53 = vadd.f32 %v1703_v51, %v1591_v18  ;;  %v1608_v54 = vpop.f32.mrb[17].mxu0  ;;  %v1028_v55 = vpop.f32.mrb[17].mxu1 }
 0x11c   : > { %v1609_v56 = vadd.f32 %v1608_v54, %v1607_v50  ;;  %v1029_v57 = vadd.f32 %v1585_v6, %v1028_v55  ;;  %v1610_v58 = vpop.f32.mrb[18].mxu0  ;;  %v1704_v59 = vpop.f32.mrb[18].mxu1 }
 0x11d   : > { %v1263_v60 = vadd.f32 %v2127_v52, %v1037_v53  ;;  %v1040_v61 = vadd.f32 %v1704_v59, %v1594_v24  ;;  %v1611_v62 = vpop.f32.mrb[19].mxu0  ;;  %v1031_v63 = vpop.f32.mrb[19].mxu1 }
 0x11e   : > { %v1261_v0 = vadd.f32 %v2127_v52, %v1029_v57  ;;  %v1612_v1 = vadd.f32 %v1611_v62, %v1610_v58  ;;  %v1032_v2 = vadd.f32 %v1588_v12, %v1031_v63 }
 0x11f   : > { %1856 = vtanh.f32 %v1263_v60  ;;  %v1264_v3 = vadd.f32 %v2127_v52, %v1040_v61 }
 0x120   : > { %1858 = vtanh.f32 %v1261_v0  ;;  %v1262_v4 = vadd.f32 %v2127_v52, %v1032_v2 }
 0x121   : > { %1860 = vtanh.f32 %v1264_v3 }
 0x122   : > { %1862 = vtanh.f32 %v1262_v4  ;;  %v1613_v5 = vpop.f32.mrb[20].mxu0  ;;  %v1707_v6 = vpop.f32.mrb[20].mxu1 }
 0x123   : > { %v1053_v8 = vadd.f32 %v1707_v6, %v1603_v42  ;;  %v1614_v9 = vpop.f32.mrb[21].mxu0  ;;  %v1044_v10 = vpop.f32.mrb[21].mxu1 }
 0x124   : > { %v1615_v11 = vadd.f32 %v1614_v9, %v1613_v5  ;;  %v1045_v14 = vadd.f32 %v1597_v30, %v1044_v10  ;;  %v1616_v15 = vpop.f32.mrb[22].mxu0  ;;  %v1708_v16 = vpop.f32.mrb[22].mxu1 }
 0x125   : > { %v1267_v12 = vadd.f32 %v2127_v52, %v1053_v8  ;;  %v1056_v17 = vadd.f32 %v1708_v16, %v1606_v48  ;;  %v1617_v18 = vpop.f32.mrb[23].mxu0  ;;  %v1047_v20 = vpop.f32.mrb[23].mxu1 }
 0x126   : > { %v1265_v21 = vadd.f32 %v2127_v52, %v1045_v14  ;;  %v1618_v22 = vadd.f32 %v1617_v18, %v1616_v15  ;;  %v1048_v23 = vadd.f32 %v1600_v36, %v1047_v20 }
 0x127   : > { %1864 = vtanh.f32 %v1267_v12  ;;  %v1268_v24 = vadd.f32 %v2127_v52, %v1056_v17 }
 0x128   : > { %1866 = vtanh.f32 %v1265_v21  ;;  %v1266_v26 = vadd.f32 %v2127_v52, %v1048_v23 }
 0x129   : > { %v1857_v27 = vpop.eup %1856  ;;  %1868 = vtanh.f32 %v1268_v24 }
 0x12a   : > { %v1859_v28 = vpop.eup %1858  ;;  %1327 = vst [vmem:[%s2139_s12 + $0x10] sm:$0xff] %v1857_v27  ;;  %1870 = vtanh.f32 %v1266_v26  ;;  %v1619_v29 = vpop.f32.mrb[24].mxu0 }
 0x12b   : > { %v1711_v30 = vpop.f32.mrb[24].mxu1  ;;  %v1861_v32 = vpop.eup %1860  ;;  %1325 = vst [vmem:[%s2139_s12] sm:$0xff] %v1859_v28 }
 0x12c   : > { %v1069_v33 = vadd.f32 %v1711_v30, %v1615_v11  ;;  %v1620_v34 = vpop.f32.mrb[25].mxu0  ;;  %v1060_v35 = vpop.f32.mrb[25].mxu1  ;;  %1328 = vst [vmem:[%s2139_s12 + $0x18] sm:$0xff] %v1861_v32 }
 0x12d   : > { %v1863_v36 = vpop.eup %1862  ;;  %v1621_v38 = vadd.f32 %v1620_v34, %v1619_v29  ;;  %v1061_v39 = vadd.f32 %v1609_v56, %v1060_v35  ;;  %v1622_v40 = vpop.f32.mrb[26].mxu0 }
 0x12e   : > { %v1712_v41 = vpop.f32.mrb[26].mxu1  ;;  %1326 = vst [vmem:[%s2139_s12 + $0x8] sm:$0xff] %v1863_v36  ;;  %v1271_v42 = vadd.f32 %v2127_v52, %v1069_v33  ;;  %v1623_v45 = vpop.f32.mrb[27].mxu0 }
 0x12f   : > { %v1072_v44 = vadd.f32 %v1712_v41, %v1618_v22  ;;  %v1063_v46 = vpop.f32.mrb[27].mxu1  ;;  %v1269_v47 = vadd.f32 %v2127_v52, %v1061_v39  ;;  %v1624_v48 = vadd.f32 %v1623_v45, %v1622_v40 }
 0x130   : > { %v1064_v50 = vadd.f32 %v1612_v1, %v1063_v46  ;;  %1872 = vtanh.f32 %v1271_v42 }
 0x131   : > { %v1272_v51 = vadd.f32 %v2127_v52, %v1072_v44  ;;  %1874 = vtanh.f32 %v1269_v47  ;;  %v1865_v54 = vpop.eup %1864 }
 0x132   : > { %v1270_v53 = vadd.f32 %v2127_v52, %v1064_v50  ;;  %v1867_v55 = vpop.eup %1866  ;;  %1331 = vst [vmem:[%s2139_s12 + $0x30] sm:$0xff] %v1865_v54  ;;  %v1625_v56 = vpop.f32.mrb[28].mxu0 }
 0x133   : > { %1876 = vtanh.f32 %v1272_v51  ;;  %v1715_v57 = vpop.f32.mrb[28].mxu1  ;;  %v1869_v58 = vpop.eup %1868  ;;  %1329 = vst [vmem:[%s2139_s12 + $0x20] sm:$0xff] %v1867_v55 }
 0x134   : > { %1878 = vtanh.f32 %v1270_v53  ;;  %v1626_v59 = vpop.f32.mrb[29].mxu0  ;;  %v1076_v60 = vpop.f32.mrb[29].mxu1  ;;  %1332 = vst [vmem:[%s2139_s12 + $0x38] sm:$0xff] %v1869_v58 }
 0x135   : > { %v1871_v61 = vpop.eup %1870  ;;  %v1627_v62 = vadd.f32 %v1626_v59, %v1625_v56  ;;  %v1077_v63 = vadd.f32 %v1621_v38, %v1076_v60  ;;  %v1628_v0 = vpop.f32.mrb[30].mxu0 }
 0x136   : > { %v1716_v1 = vpop.f32.mrb[30].mxu1  ;;  %1330 = vst [vmem:[%s2139_s12 + $0x28] sm:$0xff] %v1871_v61  ;;  %v1629_v2 = vpop.f32.mrb[31].mxu0 }
 0x137   : > { %v1079_v3 = vpop.f32.mrb[31].mxu1  ;;  %v1085_v4 = vadd.f32 %v1715_v57, %v1627_v62  ;;  %v1273_v5 = vadd.f32 %v2127_v52, %v1077_v63  ;;  %v1630_v6 = vadd.f32 %v1629_v2, %v1628_v0 }
 0x138   : > { %v1080_v8 = vadd.f32 %v1624_v48, %v1079_v3 }
 0x139   : > { %v1275_v9 = vadd.f32 %v2127_v52, %v1085_v4  ;;  %1880 = vtanh.f32 %v1273_v5  ;;  %v1088_v10 = vadd.f32 %v1716_v1, %v1630_v6 }
 0x13a   : > { %v1274_v11 = vadd.f32 %v2127_v52, %v1080_v8  ;;  %v1873_v14 = vpop.eup %1872  ;;  %v1631_v12 = vpop.f32.mrb[32].mxu0 }
 0x13b   : > { %v1875_v15 = vpop.eup %1874  ;;  %1335 = vst [vmem:[%s2139_s12 + $0x50] sm:$0xff] %v1873_v14  ;;  %1882 = vtanh.f32 %v1275_v9  ;;  %v1276_v16 = vadd.f32 %v2127_v52, %v1088_v10  ;;  %v1719_v17 = vpop.f32.mrb[32].mxu1 }
 0x13c   : > { %1333 = vst [vmem:[%s2139_s12 + $0x40] sm:$0xff] %v1875_v15  ;;  %1884 = vtanh.f32 %v1274_v11  ;;  %v1632_v20 = vpop.f32.mrb[33].mxu0  ;;  %v1092_v21 = vpop.f32.mrb[33].mxu1 }
 0x13d   : > { %v1877_v18 = vpop.eup %1876  ;;  %1886 = vtanh.f32 %v1276_v16  ;;  %v1633_v23 = vadd.f32 %v1632_v20, %v1631_v12  ;;  %v1634_v24 = vpop.f32.mrb[34].mxu0 }
 0x13e   : > { %v1879_v22 = vpop.eup %1878  ;;  %1336 = vst [vmem:[%s2139_s12 + $0x58] sm:$0xff] %v1877_v18  ;;  %v1720_v26 = vpop.f32.mrb[34].mxu1 }
 0x13f   : > { %1334 = vst [vmem:[%s2139_s12 + $0x48] sm:$0xff] %v1879_v22  ;;  %v1635_v27 = vpop.f32.mrb[35].mxu0  ;;  %v1095_v28 = vpop.f32.mrb[35].mxu1  ;;  %v1093_v29 = vadd.f32 %v1633_v23, %v1092_v21 }
 0x140   : > { %v1636_v30 = vadd.f32 %v1635_v27, %v1634_v24 }
 0x141   : > { %v1277_v32 = vadd.f32 %v2127_v52, %v1093_v29 }
 0x142   : > { %v1096_v33 = vadd.f32 %v1636_v30, %v1095_v28  ;;  %v1637_v36 = vpop.f32.mrb[36].mxu0  ;;  %v2165_v38 = vpop.f32.mrb[36].mxu1 }
 0x143   : > { %v1881_v34 = vpop.eup %1880  ;;  %1888 = vtanh.f32 %v1277_v32  ;;  %v1638_v39 = vpop.f32.mrb[37].mxu0 }
 0x144   : > { %v1278_v35 = vadd.f32 %v2127_v52, %v1096_v33  ;;  %1337 = vst [vmem:[%s2139_s12 + $0x60] sm:$0xff] %v1881_v34  ;;  %v1108_v40 = vpop.f32.mrb[37].mxu1  ;;  %v1639_v42 = vadd.f32 %v1638_v39, %v1637_v36  ;;  %v1640_v44 = vpop.f32.mrb[38].mxu0 }
 0x145   : > { %v1883_v41 = vpop.eup %1882  ;;  %v2168_v45 = vpop.f32.mrb[38].mxu1 }
 0x146   : > { %1890 = vtanh.f32 %v1278_v35  ;;  %v1885_v46 = vpop.eup %1884  ;;  %1339 = vst [vmem:[%s2139_s12 + $0x70] sm:$0xff] %v1883_v41  ;;  %v1641_v47 = vpop.f32.mrb[39].mxu0  ;;  %v1101_v51 = vadd.f32 %v1719_v17, %v1639_v42 }
 0x147   : > { %v1111_v48 = vpop.f32.mrb[39].mxu1  ;;  %v1887_v50 = vpop.eup %1886  ;;  %1338 = vst [vmem:[%s2139_s12 + $0x68] sm:$0xff] %v1885_v46  ;;  %v1642_v53 = vadd.f32 %v1641_v47, %v1640_v44 }
 0x148   : > { %1340 = vst [vmem:[%s2139_s12 + $0x78] sm:$0xff] %v1887_v50  ;;  %v1279_v54 = vadd.f32 %v2127_v52, %v1101_v51 }
 0x149   : > { %v1104_v55 = vadd.f32 %v1720_v26, %v1642_v53 }
 0x14a   : > { %1892 = vtanh.f32 %v1279_v54  ;;  %v1643_v57 = vpop.f32.mrb[40].mxu0  ;;  %v1727_v58 = vpop.f32.mrb[40].mxu1 }
 0x14b   : > { %v1280_v56 = vadd.f32 %v2127_v52, %v1104_v55  ;;  %v1133_v59 = vadd.f32 %v1727_v58, %v2112_v19  ;;  %v1644_v60 = vpop.f32.mrb[41].mxu0  ;;  %v1124_v61 = vpop.f32.mrb[41].mxu1 }
 0x14c   : > { %v1645_v63 = vadd.f32 %v1644_v60, %v1643_v57  ;;  %v1125_v0 = vadd.f32 %v2108_v7, %v1124_v61  ;;  %v1646_v1 = vpop.f32.mrb[42].mxu0  ;;  %v1728_v2 = vpop.f32.mrb[42].mxu1 }
 0x14d   : > { %v1889_v62 = vpop.eup %1888  ;;  %1894 = vtanh.f32 %v1280_v56  ;;  %v1287_v3 = vadd.f32 %v2127_v52, %v1133_v59  ;;  %v1136_v4 = vadd.f32 %v1728_v2, %v2114_v25  ;;  %v1647_v5 = vpop.f32.mrb[43].mxu0 }
 0x14e   : > { %1341 = vst [vmem:[%s2139_s12 + $0x80] sm:$0xff] %v1889_v62  ;;  %v1127_v6 = vpop.f32.mrb[43].mxu1  ;;  %v1109_v9 = vadd.f32 %v1645_v63, %v1108_v40  ;;  %v1285_v19 = vadd.f32 %v2127_v52, %v1125_v0  ;;  %v1648_v10 = vadd.f32 %v1647_v5, %v1646_v1 }
 0x14f   : > { %v1128_v11 = vadd.f32 %v2110_v13, %v1127_v6  ;;  %1896 = vtanh.f32 %v1287_v3  ;;  %v1288_v7 = vadd.f32 %v2127_v52, %v1136_v4 }
 0x150   : > { %v1891_v8 = vpop.eup %1890  ;;  %v1281_v14 = vadd.f32 %v2127_v52, %v1109_v9  ;;  %1898 = vtanh.f32 %v1285_v19  ;;  %v1112_v15 = vadd.f32 %v1648_v10, %v1111_v48 }
 0x151   : > { %1342 = vst [vmem:[%s2139_s12 + $0x88] sm:$0xff] %v1891_v8  ;;  %v1286_v16 = vadd.f32 %v2127_v52, %v1128_v11  ;;  %1900 = vtanh.f32 %v1288_v7 }
 0x152   : > { %1902 = vtanh.f32 %v1281_v14  ;;  %v1282_v25 = vadd.f32 %v2127_v52, %v1112_v15  ;;  %v1649_v12 = vpop.f32.mrb[44].mxu0  ;;  %v1731_v17 = vpop.f32.mrb[44].mxu1 }
 0x153   : > { %1904 = vtanh.f32 %v1286_v16  ;;  %v1149_v13 = vadd.f32 %v1731_v17, %v2120_v43  ;;  %v1650_v18 = vpop.f32.mrb[45].mxu0  ;;  %v1140_v20 = vpop.f32.mrb[45].mxu1 }
 0x154   : > { %v1893_v21 = vpop.eup %1892  ;;  %1906 = vtanh.f32 %v1282_v25  ;;  %v1651_v22 = vadd.f32 %v1650_v18, %v1649_v12  ;;  %v1141_v23 = vadd.f32 %v2116_v31, %v1140_v20  ;;  %v1652_v24 = vpop.f32.mrb[46].mxu0 }
 0x155   : > { %v1732_v26 = vpop.f32.mrb[46].mxu1  ;;  %1343 = vst [vmem:[%s2139_s12 + $0x90] sm:$0xff] %v1893_v21  ;;  %v1291_v27 = vadd.f32 %v2127_v52, %v1149_v13  ;;  %v1653_v29 = vpop.f32.mrb[47].mxu0 }
 0x156   : > { %v1152_v28 = vadd.f32 %v1732_v26, %v2122_v49  ;;  %v1143_v30 = vpop.f32.mrb[47].mxu1  ;;  %v1117_v43 = vadd.f32 %v2165_v38, %v1651_v22  ;;  %v1289_v33 = vadd.f32 %v2127_v52, %v1141_v23  ;;  %v1654_v34 = vadd.f32 %v1653_v29, %v1652_v24 }
 0x157   : > { %v1895_v32 = vpop.eup %1894  ;;  %v1144_v35 = vadd.f32 %v2118_v37, %v1143_v30  ;;  %1908 = vtanh.f32 %v1291_v27 }
 0x158   : > { %1344 = vst [vmem:[%s2139_s12 + $0x98] sm:$0xff] %v1895_v32  ;;  %v1292_v31 = vadd.f32 %v2127_v52, %v1152_v28  ;;  %v1283_v36 = vadd.f32 %v2127_v52, %v1117_v43  ;;  %1910 = vtanh.f32 %v1289_v33  ;;  %v1120_v49 = vadd.f32 %v2168_v45, %v1654_v34 }
 0x159   : > { %v1290_v39 = vadd.f32 %v2127_v52, %v1144_v35  ;;  %v1897_v38 = vpop.eup %1896 }
 0x15a   : > { %1912 = vtanh.f32 %v1292_v31  ;;  %v1899_v40 = vpop.eup %1898  ;;  %1351 = vst [vmem:[%s2139_s12 + $0xd0] sm:$0xff] %v1897_v38  ;;  %v1284_v37 = vadd.f32 %v2127_v52, %v1120_v49 }
 0x15b   : > { %1914 = vtanh.f32 %v1283_v36  ;;  %v1901_v41 = vpop.eup %1900  ;;  %1349 = vst [vmem:[%s2139_s12 + $0xc0] sm:$0xff] %v1899_v40 }
 0x15c   : > { %1916 = vtanh.f32 %v1290_v39  ;;  %v1903_v42 = vpop.eup %1902  ;;  %1352 = vst [vmem:[%s2139_s12 + $0xd8] sm:$0xff] %v1901_v41 }
 0x15d   : > { %1918 = vtanh.f32 %v1284_v37  ;;  %v1905_v44 = vpop.eup %1904  ;;  %1345 = vst [vmem:[%s2139_s12 + $0xa0] sm:$0xff] %v1903_v42 }
 0x15e   : > { %v1907_v45 = vpop.eup %1906  ;;  %1350 = vst [vmem:[%s2139_s12 + $0xc8] sm:$0xff] %v1905_v44 }
 0x15f   : > { %1346 = vst [vmem:[%s2139_s12 + $0xa8] sm:$0xff] %v1907_v45 }
 0x161   : > { %v1909_v46 = vpop.eup %1908 }
 0x162   : > { %v1911_v47 = vpop.eup %1910  ;;  %1355 = vst [vmem:[%s2139_s12 + $0xf0] sm:$0xff] %v1909_v46 }
 0x163   : > { %1353 = vst [vmem:[%s2139_s12 + $0xe0] sm:$0xff] %v1911_v47 }
 0x164   : > { %v1913_v52 = vpop.eup %1912 }
 0x165   : > { %v1915_v48 = vpop.eup %1914  ;;  %1356 = vst [vmem:[%s2139_s12 + $0xf8] sm:$0xff] %v1913_v52 }
 0x166   : > { %v1917_v50 = vpop.eup %1916  ;;  %1347 = vst [vmem:[%s2139_s12 + $0xb0] sm:$0xff] %v1915_v48 }
 0x167   : > { %v1919_v51 = vpop.eup %1918  ;;  %1354 = vst [vmem:[%s2139_s12 + $0xe8] sm:$0xff] %v1917_v50 }
 0x168   : > { %1348 = vst [vmem:[%s2139_s12 + $0xb8] sm:$0xff] %v1919_v51 }
 0x169 PF: > { %s13_s14 = sadd.s32 1, %s1942_s14   ;;  %s2226_s12 = smov %s1938_s13 }
 0x16a   : > { %p10_p5 = scmp.ge.s32.totalorder %s13_s14, 4   ;;  %s2227_s13 = smov %s2229_s15 }
 0x16c   :  { %12 = sbr.rel (!%p10_p5) target bundleno = 2 (0x2), region = 76 }

</bundles_post_ra>
